<compile_context>
chip_gen: v7x
topology: tpu7x:2x2x1
jax: 0.10.0
libtpu: 0.0.40
codegen_flags: <defaults>
</compile_context>

<pallas_src>
import jax
import jax.numpy as jnp
from jax.experimental import pallas as pl
from jax.experimental.pallas import tpu as pltpu

EPS = 1e-5  # torch.nn.InstanceNorm2d default eps


def _resblock_kernel(x_ref, w1_ref, w2_ref, o_ref, pad_ref):
    # x_ref  : (1, H, W, C) f32   input image tile (residual source)
    # w1_ref : (9*C, C)           conv1 weights, row index = (kh*3+kw)*C + ic
    # w2_ref : (9*C, C)           conv2 weights
    # o_ref  : (1, H, W, C) f32   output
    # pad_ref: (H+2, W+2, C)      reflection-pad scratch in the MXU operand
    #                             dtype, reused for both convolutions
    _, H, W, C = x_ref.shape
    pad_dtype = pad_ref.dtype

    def fix_borders():
        # Interior [1:H+1, 1:W+1] must already be written.  ReflectionPad2d(1):
        # fill top/bottom rows (interior columns) first, then full-height
        # left/right columns so the four corners pick up the doubly-reflected
        # value (pad[0, 0] == img[1, 1]).
        pad_ref[0:1, 1:W + 1, :] = pad_ref[2:3, 1:W + 1, :]            # top
        pad_ref[H + 1:H + 2, 1:W + 1, :] = pad_ref[H - 1:H, 1:W + 1, :]  # bottom
        pad_ref[:, 0:1, :] = pad_ref[:, 2:3, :]                        # left
        pad_ref[:, W + 1:W + 2, :] = pad_ref[:, W - 1:W, :]            # right

    def conv3x3(w_ref):
        # 9 per-tap MXU matmuls with f32 accumulation: no materialized
        # (H*W, 9C) im2col patch, no 9x concat copies.  M = H*W (large),
        # K = C per matmul.  (Per-kh (H*W, 3C) slabs would raise K to 3C at
        # the cost of extra concat copies; per-tap is the copy-minimal form.)
        acc = None
        for kh in range(3):
            for kw in range(3):
                tap = pad_ref[kh:kh + H, kw:kw + W, :].reshape(H * W, C)
                w_tap = w_ref[(kh * 3 + kw) * C:(kh * 3 + kw + 1) * C, :]
                part = jnp.dot(tap, w_tap, preferred_element_type=jnp.float32)
                acc = part if acc is None else acc + part
        return acc  # (H*W, C), f32

    def instance_norm(y):
        # Two-pass (centered) variance: avoids the catastrophic cancellation
        # of E[y^2] - E[y]^2 when conv outputs have large mean vs. std.
        inv_n = 1.0 / float(H * W)
        mean = jnp.sum(y, axis=0, keepdims=True) * inv_n
        d = y - mean
        var = jnp.sum(d * d, axis=0, keepdims=True) * inv_n
        return d * jax.lax.rsqrt(var + EPS)

    # ---- pad(x) -> conv1 -> InstanceNorm -> ReLU --------------------------
    pad_ref[1:H + 1, 1:W + 1, :] = x_ref[0].astype(pad_dtype)
    fix_borders()
    h1 = jnp.maximum(instance_norm(conv3x3(w1_ref)), 0.0)   # (H*W, C) f32
    # h1 goes straight into the pad scratch interior (cast to the MXU operand
    # dtype); x_ref still holds the original f32 input for the residual add.
    pad_ref[1:H + 1, 1:W + 1, :] = h1.reshape(H, W, C).astype(pad_dtype)
    fix_borders()

    # ---- pad(h1) -> conv2 -> InstanceNorm -> residual add -----------------
    y2 = instance_norm(conv3x3(w2_ref)).reshape(H, W, C)     # f32
    o_ref[0] = (y2 + x_ref[0]).astype(o_ref.dtype)


def resblock_forward_nhwc(x_nhwc, w1_hwio, w2_hwio, *, matmul_dtype=jnp.float32):
    """ResBlock forward on NHWC input (preferred entry point: no layout
    round trips — use this end-to-end in NHWC models).

    x_nhwc : (B, H, W, C) float32.
    w*_hwio: (3, 3, C, C) conv weights in HWIO (PyTorch OIHW weights should
             be transposed with .transpose(2, 3, 1, 0)); bias=False.
    matmul_dtype: dtype of the MXU operands (padded activations + weights).
        jnp.bfloat16 is recommended for performance on ALL TPU generations
        (v5e/v6e/v7x MXUs are bf16-native); accumulation, InstanceNorm and
        the residual add stay f32.  Default f32 matches PyTorch numerics.
    """
    B, H, W, C = x_nhwc.shape
    assert w1_hwio.shape == (3, 3, C, C) and w2_hwio.shape == (3, 3, C, C)
    assert H >= 2 and W >= 2, "reflection pad=1 requires H, W >= 2"
    # NOTE: channels map to the 128-wide lane axis; real ResBlocks
    # (C = 128/256) are lane-dense.  Small C (the C=4 test) runs correctly
    # but with mostly-padded lanes.

    Hp, Wp = H + 2, W + 2
    op_bytes = jnp.dtype(matmul_dtype).itemsize

    # HWIO (3,3,C,C) -> (9*C, C): row (kh*3+kw)*C + ic matches the in-kernel
    # per-tap weight slices.
    w1 = w1_hwio.reshape(9 * C, C).astype(matmul_dtype)
    w2 = w2_hwio.reshape(9 * C, C).astype(matmul_dtype)

    # ---- VMEM budget (bytes), sized from the actual working set -----------
    img_f32 = H * W * C * 4
    est = (
        2 * 2 * img_f32                  # x + out blocks, double-buffered
        + 2 * 9 * C * C * op_bytes       # two resident weight blocks (not 2x)
        + Hp * Wp * C * op_bytes         # reflection-pad scratch
        + Hp * Wp * C * op_bytes         # tap-slice relayout temp (slack)
        + 5 * img_f32                    # conv acc / centered / norm temps
    )
    try:
        cap_phys = getattr(pltpu.get_tpu_info(), "vmem_capacity_bytes",
                           128 * 1024 * 1024)
    except Exception:  # conservative fallback if hw query is unavailable
        cap_phys = 64 * 1024 * 1024
    cap = (cap_phys * 7) // 8            # leave headroom for compiler scratch
    vmem_limit = int(min(max(est * 3 // 2, 32 * 1024 * 1024), cap))

    return pl.pallas_call(
        _resblock_kernel,
        out_shape=jax.ShapeDtypeStruct((B, H, W, C), jnp.float32),
        grid=(B,),
        in_specs=[
            pl.BlockSpec((1, H, W, C), lambda b: (b, 0, 0, 0)),
            pl.BlockSpec((9 * C, C), lambda b: (0, 0)),   # resident weights
            pl.BlockSpec((9 * C, C), lambda b: (0, 0)),
        ],
        out_specs=pl.BlockSpec((1, H, W, C), lambda b: (b, 0, 0, 0)),
        scratch_shapes=[pltpu.VMEM((Hp, Wp, C), matmul_dtype)],
        compiler_params=pltpu.CompilerParams(
            dimension_semantics=("parallel",),
            vmem_limit_bytes=vmem_limit),
    )(x_nhwc.astype(jnp.float32), w1, w2)


def resblock_forward(x_nchw, w1_hwio, w2_hwio, *, matmul_dtype=jnp.float32):
    """NCHW wrapper kept only for parity with the PyTorch module.

    NOTE: the two transposes below are full-tensor HBM round trips; in a
    production NHWC model call resblock_forward_nhwc directly instead.
    """
    x_nhwc = jnp.transpose(x_nchw, (0, 2, 3, 1)).astype(jnp.float32)
    out = resblock_forward_nhwc(x_nhwc, w1_hwio, w2_hwio,
                                matmul_dtype=matmul_dtype)
    return jnp.transpose(out, (0, 3, 1, 2)).astype(x_nchw.dtype)


def _reference_resblock(x_nchw, w1_hwio, w2_hwio):
    """Pure-JAX reference matching the PyTorch forward (instancenorm)."""
    dn = ("NCHW", "HWIO", "NCHW")

    def conv(inp, w):
        return jax.lax.conv_general_dilated(inp, w, (1, 1), "VALID",
                                            dimension_numbers=dn)

    def inorm(y):
        m = y.mean(axis=(2, 3), keepdims=True)
        v = ((y - m) ** 2).mean(axis=(2, 3), keepdims=True)
        return (y - m) / jnp.sqrt(v + EPS)

    xp = jnp.pad(x_nchw, ((0, 0), (0, 0), (1, 1), (1, 1)), mode="reflect")
    h = jax.nn.relu(inorm(conv(xp, w1_hwio)))
    hp = jnp.pad(h, ((0, 0), (0, 0), (1, 1), (1, 1)), mode="reflect")
    return inorm(conv(hp, w2_hwio)) + x_nchw


if __name__ == "__main__":
    B, C, H, W = 2, 4, 16, 16  # residual add requires ic == oc
    key = jax.random.PRNGKey(0)
    kx, k1, k2 = jax.random.split(key, 3)

    x = jax.random.normal(kx, (B, C, H, W), dtype=jnp.float32)
    # deterministic synthetic conv weights (HWIO), no bias (bias=False)
    w1 = 0.1 * jax.random.normal(k1, (3, 3, C, C), dtype=jnp.float32)
    w2 = 0.1 * jax.random.normal(k2, (3, 3, C, C), dtype=jnp.float32)

    ref = jax.block_until_ready(_reference_resblock(x, w1, w2))

    # f32 MXU operands: matches the PyTorch module numerics.
    out = jax.block_until_ready(resblock_forward(x, w1, w2))
    assert out.shape == (B, C, H, W)
    assert jnp.allclose(out, ref, atol=1e-4, rtol=1e-4), "f32 mismatch vs reference"

    # bf16 MXU operands (recommended on v5e/v6e/v7x): bf16 operand
    # quantization is amplified by InstanceNorm's 1/std, hence the looser
    # tolerance; accumulation / IN / residual stay f32.
    out_bf16 = jax.block_until_ready(
        resblock_forward(x, w1, w2, matmul_dtype=jnp.bfloat16))
    assert jnp.allclose(out_bf16, ref, atol=5e-2, rtol=5e-2), \
        "bf16 mismatch vs reference"

    print("KERNEL_OK")
</pallas_src>

<mosaic_0001>
module attributes {stable_mosaic.version = 11 : i64} {
  func.func @_resblock_kernel(%arg0: i32, %arg1: memref<1x16x16x4xf32, #tpu.memory_space<vmem>>, %arg2: memref<36x4xf32, #tpu.memory_space<vmem>>, %arg3: memref<36x4xf32, #tpu.memory_space<vmem>>, %arg4: memref<1x16x16x4xf32, #tpu.memory_space<vmem>>, %arg5: memref<18x18x4xf32, #tpu.memory_space<vmem>>) attributes {dimension_semantics = [#tpu.dimension_semantics<parallel>], iteration_bounds = array<i64: 2>, scalar_prefetch = 0 : i64, scratch_operands = 1 : i64, tpu.core_type = #tpu.core_type<tc>, window_params = [{transform_indices = @transform_0, window_bounds = array<i64: 1, 16, 16, 4>}, {pipeline_mode = #tpu.pipeline_mode<synchronous>, transform_indices = @transform_1, window_bounds = array<i64: 36, 4>}, {pipeline_mode = #tpu.pipeline_mode<synchronous>, transform_indices = @transform_2, window_bounds = array<i64: 36, 4>}, {transform_indices = @transform_3, window_bounds = array<i64: 1, 16, 16, 4>}]} {
    %c0 = arith.constant 0 : index
    %c0_0 = arith.constant 0 : index
    %c0_1 = arith.constant 0 : index
    %c0_2 = arith.constant 0 : index
    %0 = vector.load %arg1[%c0, %c0_0, %c0_1, %c0_2] : memref<1x16x16x4xf32, #tpu.memory_space<vmem>>, vector<1x16x16x4xf32>
    %1 = vector.shape_cast %0 : vector<1x16x16x4xf32> to vector<16x16x4xf32>
    %c1 = arith.constant 1 : index
    %c1_3 = arith.constant 1 : index
    %c0_4 = arith.constant 0 : index
    %2 = vector.load %arg5[%c1, %c1_3, %c0_4] : memref<18x18x4xf32, #tpu.memory_space<vmem>>, vector<16x16x4xf32>
    tpu.vector_store %arg5[%c1, %c1_3, %c0_4], %1 {strides = array<i32>} : memref<18x18x4xf32, #tpu.memory_space<vmem>>, vector<16x16x4xf32>,
    %c2 = arith.constant 2 : index
    %c1_5 = arith.constant 1 : index
    %c0_6 = arith.constant 0 : index
    %3 = vector.load %arg5[%c2, %c1_5, %c0_6] : memref<18x18x4xf32, #tpu.memory_space<vmem>>, vector<1x16x4xf32>
    %c0_7 = arith.constant 0 : index
    %c1_8 = arith.constant 1 : index
    %c0_9 = arith.constant 0 : index
    %4 = vector.load %arg5[%c0_7, %c1_8, %c0_9] : memref<18x18x4xf32, #tpu.memory_space<vmem>>, vector<1x16x4xf32>
    tpu.vector_store %arg5[%c0_7, %c1_8, %c0_9], %3 {strides = array<i32>} : memref<18x18x4xf32, #tpu.memory_space<vmem>>, vector<1x16x4xf32>,
    %c15 = arith.constant 15 : index
    %c1_10 = arith.constant 1 : index
    %c0_11 = arith.constant 0 : index
    %5 = vector.load %arg5[%c15, %c1_10, %c0_11] : memref<18x18x4xf32, #tpu.memory_space<vmem>>, vector<1x16x4xf32>
    %c17 = arith.constant 17 : index
    %c1_12 = arith.constant 1 : index
    %c0_13 = arith.constant 0 : index
    %6 = vector.load %arg5[%c17, %c1_12, %c0_13] : memref<18x18x4xf32, #tpu.memory_space<vmem>>, vector<1x16x4xf32>
    tpu.vector_store %arg5[%c17, %c1_12, %c0_13], %5 {strides = array<i32>} : memref<18x18x4xf32, #tpu.memory_space<vmem>>, vector<1x16x4xf32>,
    %c0_14 = arith.constant 0 : index
    %c2_15 = arith.constant 2 : index
    %c0_16 = arith.constant 0 : index
    %7 = vector.load %arg5[%c0_14, %c2_15, %c0_16] : memref<18x18x4xf32, #tpu.memory_space<vmem>>, vector<18x1x4xf32>
    %c0_17 = arith.constant 0 : index
    %c0_18 = arith.constant 0 : index
    %c0_19 = arith.constant 0 : index
    %8 = vector.load %arg5[%c0_17, %c0_18, %c0_19] : memref<18x18x4xf32, #tpu.memory_space<vmem>>, vector<18x1x4xf32>
    tpu.vector_store %arg5[%c0_17, %c0_18, %c0_19], %7 {strides = array<i32>} : memref<18x18x4xf32, #tpu.memory_space<vmem>>, vector<18x1x4xf32>,
    %c0_20 = arith.constant 0 : index
    %c15_21 = arith.constant 15 : index
    %c0_22 = arith.constant 0 : index
    %9 = vector.load %arg5[%c0_20, %c15_21, %c0_22] : memref<18x18x4xf32, #tpu.memory_space<vmem>>, vector<18x1x4xf32>
    %c0_23 = arith.constant 0 : index
    %c17_24 = arith.constant 17 : index
    %c0_25 = arith.constant 0 : index
    %10 = vector.load %arg5[%c0_23, %c17_24, %c0_25] : memref<18x18x4xf32, #tpu.memory_space<vmem>>, vector<18x1x4xf32>
    tpu.vector_store %arg5[%c0_23, %c17_24, %c0_25], %9 {strides = array<i32>} : memref<18x18x4xf32, #tpu.memory_space<vmem>>, vector<18x1x4xf32>,
    %c0_26 = arith.constant 0 : index
    %c0_27 = arith.constant 0 : index
    %c0_28 = arith.constant 0 : index
    %11 = vector.load %arg5[%c0_26, %c0_27, %c0_28] : memref<18x18x4xf32, #tpu.memory_space<vmem>>, vector<16x16x4xf32>
    %12 = vector.shape_cast %11 : vector<16x16x4xf32> to vector<256x4xf32>
    %c0_29 = arith.constant 0 : index
    %c0_30 = arith.constant 0 : index
    %13 = vector.load %arg2[%c0_29, %c0_30] : memref<36x4xf32, #tpu.memory_space<vmem>>, vector<4x4xf32>
    %cst = arith.constant dense<0.000000e+00> : vector<256x4xf32>
    %14 = tpu.matmul %12, %13, %cst {dimension_numbers = #tpu.dot_dimension_numbers<[1], [0], [0], [1], [0, 0, 1, 1], [], []>} : vector<256x4xf32>, vector<4x4xf32>, vector<256x4xf32> -> vector<256x4xf32>
    %c0_31 = arith.constant 0 : index
    %c1_32 = arith.constant 1 : index
    %c0_33 = arith.constant 0 : index
    %15 = vector.load %arg5[%c0_31, %c1_32, %c0_33] : memref<18x18x4xf32, #tpu.memory_space<vmem>>, vector<16x16x4xf32>
    %16 = vector.shape_cast %15 : vector<16x16x4xf32> to vector<256x4xf32>
    %c4 = arith.constant 4 : index
    %c0_34 = arith.constant 0 : index
    %17 = vector.load %arg2[%c4, %c0_34] : memref<36x4xf32, #tpu.memory_space<vmem>>, vector<4x4xf32>
    %cst_35 = arith.constant dense<0.000000e+00> : vector<256x4xf32>
    %18 = tpu.matmul %16, %17, %cst_35 {dimension_numbers = #tpu.dot_dimension_numbers<[1], [0], [0], [1], [0, 0, 1, 1], [], []>} : vector<256x4xf32>, vector<4x4xf32>, vector<256x4xf32> -> vector<256x4xf32>
    %19 = arith.addf %14, %18 : vector<256x4xf32>
    %c0_36 = arith.constant 0 : index
    %c2_37 = arith.constant 2 : index
    %c0_38 = arith.constant 0 : index
    %20 = vector.load %arg5[%c0_36, %c2_37, %c0_38] : memref<18x18x4xf32, #tpu.memory_space<vmem>>, vector<16x16x4xf32>
    %21 = vector.shape_cast %20 : vector<16x16x4xf32> to vector<256x4xf32>
    %c8 = arith.constant 8 : index
    %c0_39 = arith.constant 0 : index
    %22 = vector.load %arg2[%c8, %c0_39] : memref<36x4xf32, #tpu.memory_space<vmem>>, vector<4x4xf32>
    %cst_40 = arith.constant dense<0.000000e+00> : vector<256x4xf32>
    %23 = tpu.matmul %21, %22, %cst_40 {dimension_numbers = #tpu.dot_dimension_numbers<[1], [0], [0], [1], [0, 0, 1, 1], [], []>} : vector<256x4xf32>, vector<4x4xf32>, vector<256x4xf32> -> vector<256x4xf32>
    %24 = arith.addf %19, %23 : vector<256x4xf32>
    %c1_41 = arith.constant 1 : index
    %c0_42 = arith.constant 0 : index
    %c0_43 = arith.constant 0 : index
    %25 = vector.load %arg5[%c1_41, %c0_42, %c0_43] : memref<18x18x4xf32, #tpu.memory_space<vmem>>, vector<16x16x4xf32>
    %26 = vector.shape_cast %25 : vector<16x16x4xf32> to vector<256x4xf32>
    %c12 = arith.constant 12 : index
    %c0_44 = arith.constant 0 : index
    %27 = vector.load %arg2[%c12, %c0_44] : memref<36x4xf32, #tpu.memory_space<vmem>>, vector<4x4xf32>
    %cst_45 = arith.constant dense<0.000000e+00> : vector<256x4xf32>
    %28 = tpu.matmul %26, %27, %cst_45 {dimension_numbers = #tpu.dot_dimension_numbers<[1], [0], [0], [1], [0, 0, 1, 1], [], []>} : vector<256x4xf32>, vector<4x4xf32>, vector<256x4xf32> -> vector<256x4xf32>
    %29 = arith.addf %24, %28 : vector<256x4xf32>
    %c1_46 = arith.constant 1 : index
    %c1_47 = arith.constant 1 : index
    %c0_48 = arith.constant 0 : index
    %30 = vector.load %arg5[%c1_46, %c1_47, %c0_48] : memref<18x18x4xf32, #tpu.memory_space<vmem>>, vector<16x16x4xf32>
    %31 = vector.shape_cast %30 : vector<16x16x4xf32> to vector<256x4xf32>
    %c16 = arith.constant 16 : index
    %c0_49 = arith.constant 0 : index
    %32 = vector.load %arg2[%c16, %c0_49] : memref<36x4xf32, #tpu.memory_space<vmem>>, vector<4x4xf32>
    %cst_50 = arith.constant dense<0.000000e+00> : vector<256x4xf32>
    %33 = tpu.matmul %31, %32, %cst_50 {dimension_numbers = #tpu.dot_dimension_numbers<[1], [0], [0], [1], [0, 0, 1, 1], [], []>} : vector<256x4xf32>, vector<4x4xf32>, vector<256x4xf32> -> vector<256x4xf32>
    %34 = arith.addf %29, %33 : vector<256x4xf32>
    %c1_51 = arith.constant 1 : index
    %c2_52 = arith.constant 2 : index
    %c0_53 = arith.constant 0 : index
    %35 = vector.load %arg5[%c1_51, %c2_52, %c0_53] : memref<18x18x4xf32, #tpu.memory_space<vmem>>, vector<16x16x4xf32>
    %36 = vector.shape_cast %35 : vector<16x16x4xf32> to vector<256x4xf32>
    %c20 = arith.constant 20 : index
    %c0_54 = arith.constant 0 : index
    %37 = vector.load %arg2[%c20, %c0_54] : memref<36x4xf32, #tpu.memory_space<vmem>>, vector<4x4xf32>
    %cst_55 = arith.constant dense<0.000000e+00> : vector<256x4xf32>
    %38 = tpu.matmul %36, %37, %cst_55 {dimension_numbers = #tpu.dot_dimension_numbers<[1], [0], [0], [1], [0, 0, 1, 1], [], []>} : vector<256x4xf32>, vector<4x4xf32>, vector<256x4xf32> -> vector<256x4xf32>
    %39 = arith.addf %34, %38 : vector<256x4xf32>
    %c2_56 = arith.constant 2 : index
    %c0_57 = arith.constant 0 : index
    %c0_58 = arith.constant 0 : index
    %40 = vector.load %arg5[%c2_56, %c0_57, %c0_58] : memref<18x18x4xf32, #tpu.memory_space<vmem>>, vector<16x16x4xf32>
    %41 = vector.shape_cast %40 : vector<16x16x4xf32> to vector<256x4xf32>
    %c24 = arith.constant 24 : index
    %c0_59 = arith.constant 0 : index
    %42 = vector.load %arg2[%c24, %c0_59] : memref<36x4xf32, #tpu.memory_space<vmem>>, vector<4x4xf32>
    %cst_60 = arith.constant dense<0.000000e+00> : vector<256x4xf32>
    %43 = tpu.matmul %41, %42, %cst_60 {dimension_numbers = #tpu.dot_dimension_numbers<[1], [0], [0], [1], [0, 0, 1, 1], [], []>} : vector<256x4xf32>, vector<4x4xf32>, vector<256x4xf32> -> vector<256x4xf32>
    %44 = arith.addf %39, %43 : vector<256x4xf32>
    %c2_61 = arith.constant 2 : index
    %c1_62 = arith.constant 1 : index
    %c0_63 = arith.constant 0 : index
    %45 = vector.load %arg5[%c2_61, %c1_62, %c0_63] : memref<18x18x4xf32, #tpu.memory_space<vmem>>, vector<16x16x4xf32>
    %46 = vector.shape_cast %45 : vector<16x16x4xf32> to vector<256x4xf32>
    %c28 = arith.constant 28 : index
    %c0_64 = arith.constant 0 : index
    %47 = vector.load %arg2[%c28, %c0_64] : memref<36x4xf32, #tpu.memory_space<vmem>>, vector<4x4xf32>
    %cst_65 = arith.constant dense<0.000000e+00> : vector<256x4xf32>
    %48 = tpu.matmul %46, %47, %cst_65 {dimension_numbers = #tpu.dot_dimension_numbers<[1], [0], [0], [1], [0, 0, 1, 1], [], []>} : vector<256x4xf32>, vector<4x4xf32>, vector<256x4xf32> -> vector<256x4xf32>
    %49 = arith.addf %44, %48 : vector<256x4xf32>
    %c2_66 = arith.constant 2 : index
    %c2_67 = arith.constant 2 : index
    %c0_68 = arith.constant 0 : index
    %50 = vector.load %arg5[%c2_66, %c2_67, %c0_68] : memref<18x18x4xf32, #tpu.memory_space<vmem>>, vector<16x16x4xf32>
    %51 = vector.shape_cast %50 : vector<16x16x4xf32> to vector<256x4xf32>
    %c32 = arith.constant 32 : index
    %c0_69 = arith.constant 0 : index
    %52 = vector.load %arg2[%c32, %c0_69] : memref<36x4xf32, #tpu.memory_space<vmem>>, vector<4x4xf32>
    %cst_70 = arith.constant dense<0.000000e+00> : vector<256x4xf32>
    %53 = tpu.matmul %51, %52, %cst_70 {dimension_numbers = #tpu.dot_dimension_numbers<[1], [0], [0], [1], [0, 0, 1, 1], [], []>} : vector<256x4xf32>, vector<4x4xf32>, vector<256x4xf32> -> vector<256x4xf32>
    %54 = arith.addf %49, %53 : vector<256x4xf32>
    %cst_71 = arith.constant dense<0.000000e+00> : vector<4xf32>
    %55 = vector.multi_reduction <add>, %54, %cst_71 [0] : vector<256x4xf32> to vector<4xf32>
    %56 = vector.shape_cast %55 : vector<4xf32> to vector<1x4xf32>
    %cst_72 = arith.constant 3.906250e-03 : f32
    %57 = vector.broadcast %cst_72 : f32 to vector<1x4xf32>
    %58 = arith.mulf %56, %57 : vector<1x4xf32>
    %59 = vector.broadcast %58 : vector<1x4xf32> to vector<256x4xf32>
    %60 = arith.subf %54, %59 : vector<256x4xf32>
    %61 = arith.mulf %60, %60 : vector<256x4xf32>
    %cst_73 = arith.constant dense<0.000000e+00> : vector<4xf32>
    %62 = vector.multi_reduction <add>, %61, %cst_73 [0] : vector<256x4xf32> to vector<4xf32>
    %63 = vector.shape_cast %62 : vector<4xf32> to vector<1x4xf32>
    %cst_74 = arith.constant 3.906250e-03 : f32
    %64 = vector.broadcast %cst_74 : f32 to vector<1x4xf32>
    %65 = arith.mulf %63, %64 : vector<1x4xf32>
    %cst_75 = arith.constant 9.99999974E-6 : f32
    %66 = vector.broadcast %cst_75 : f32 to vector<1x4xf32>
    %67 = arith.addf %65, %66 : vector<1x4xf32>
    %68 = math.rsqrt %67 : vector<1x4xf32>
    %69 = vector.broadcast %68 : vector<1x4xf32> to vector<256x4xf32>
    %70 = arith.mulf %60, %69 : vector<256x4xf32>
    %cst_76 = arith.constant 0.000000e+00 : f32
    %71 = vector.broadcast %cst_76 : f32 to vector<256x4xf32>
    %72 = arith.maximumf %70, %71 : vector<256x4xf32>
    %73 = vector.shape_cast %72 : vector<256x4xf32> to vector<16x16x4xf32>
    %c1_77 = arith.constant 1 : index
    %c1_78 = arith.constant 1 : index
    %c0_79 = arith.constant 0 : index
    %74 = vector.load %arg5[%c1_77, %c1_78, %c0_79] : memref<18x18x4xf32, #tpu.memory_space<vmem>>, vector<16x16x4xf32>
    tpu.vector_store %arg5[%c1_77, %c1_78, %c0_79], %73 {strides = array<i32>} : memref<18x18x4xf32, #tpu.memory_space<vmem>>, vector<16x16x4xf32>,
    %c2_80 = arith.constant 2 : index
    %c1_81 = arith.constant 1 : index
    %c0_82 = arith.constant 0 : index
    %75 = vector.load %arg5[%c2_80, %c1_81, %c0_82] : memref<18x18x4xf32, #tpu.memory_space<vmem>>, vector<1x16x4xf32>
    %c0_83 = arith.constant 0 : index
    %c1_84 = arith.constant 1 : index
    %c0_85 = arith.constant 0 : index
    %76 = vector.load %arg5[%c0_83, %c1_84, %c0_85] : memref<18x18x4xf32, #tpu.memory_space<vmem>>, vector<1x16x4xf32>
    tpu.vector_store %arg5[%c0_83, %c1_84, %c0_85], %75 {strides = array<i32>} : memref<18x18x4xf32, #tpu.memory_space<vmem>>, vector<1x16x4xf32>,
    %c15_86 = arith.constant 15 : index
    %c1_87 = arith.constant 1 : index
    %c0_88 = arith.constant 0 : index
    %77 = vector.load %arg5[%c15_86, %c1_87, %c0_88] : memref<18x18x4xf32, #tpu.memory_space<vmem>>, vector<1x16x4xf32>
    %c17_89 = arith.constant 17 : index
    %c1_90 = arith.constant 1 : index
    %c0_91 = arith.constant 0 : index
    %78 = vector.load %arg5[%c17_89, %c1_90, %c0_91] : memref<18x18x4xf32, #tpu.memory_space<vmem>>, vector<1x16x4xf32>
    tpu.vector_store %arg5[%c17_89, %c1_90, %c0_91], %77 {strides = array<i32>} : memref<18x18x4xf32, #tpu.memory_space<vmem>>, vector<1x16x4xf32>,
    %c0_92 = arith.constant 0 : index
    %c2_93 = arith.constant 2 : index
    %c0_94 = arith.constant 0 : index
    %79 = vector.load %arg5[%c0_92, %c2_93, %c0_94] : memref<18x18x4xf32, #tpu.memory_space<vmem>>, vector<18x1x4xf32>
    %c0_95 = arith.constant 0 : index
    %c0_96 = arith.constant 0 : index
    %c0_97 = arith.constant 0 : index
    %80 = vector.load %arg5[%c0_95, %c0_96, %c0_97] : memref<18x18x4xf32, #tpu.memory_space<vmem>>, vector<18x1x4xf32>
    tpu.vector_store %arg5[%c0_95, %c0_96, %c0_97], %79 {strides = array<i32>} : memref<18x18x4xf32, #tpu.memory_space<vmem>>, vector<18x1x4xf32>,
    %c0_98 = arith.constant 0 : index
    %c15_99 = arith.constant 15 : index
    %c0_100 = arith.constant 0 : index
    %81 = vector.load %arg5[%c0_98, %c15_99, %c0_100] : memref<18x18x4xf32, #tpu.memory_space<vmem>>, vector<18x1x4xf32>
    %c0_101 = arith.constant 0 : index
    %c17_102 = arith.constant 17 : index
    %c0_103 = arith.constant 0 : index
    %82 = vector.load %arg5[%c0_101, %c17_102, %c0_103] : memref<18x18x4xf32, #tpu.memory_space<vmem>>, vector<18x1x4xf32>
    tpu.vector_store %arg5[%c0_101, %c17_102, %c0_103], %81 {strides = array<i32>} : memref<18x18x4xf32, #tpu.memory_space<vmem>>, vector<18x1x4xf32>,
    %c0_104 = arith.constant 0 : index
    %c0_105 = arith.constant 0 : index
    %c0_106 = arith.constant 0 : index
    %83 = vector.load %arg5[%c0_104, %c0_105, %c0_106] : memref<18x18x4xf32, #tpu.memory_space<vmem>>, vector<16x16x4xf32>
    %84 = vector.shape_cast %83 : vector<16x16x4xf32> to vector<256x4xf32>
    %c0_107 = arith.constant 0 : index
    %c0_108 = arith.constant 0 : index
    %85 = vector.load %arg3[%c0_107, %c0_108] : memref<36x4xf32, #tpu.memory_space<vmem>>, vector<4x4xf32>
    %cst_109 = arith.constant dense<0.000000e+00> : vector<256x4xf32>
    %86 = tpu.matmul %84, %85, %cst_109 {dimension_numbers = #tpu.dot_dimension_numbers<[1], [0], [0], [1], [0, 0, 1, 1], [], []>} : vector<256x4xf32>, vector<4x4xf32>, vector<256x4xf32> -> vector<256x4xf32>
    %c0_110 = arith.constant 0 : index
    %c1_111 = arith.constant 1 : index
    %c0_112 = arith.constant 0 : index
    %87 = vector.load %arg5[%c0_110, %c1_111, %c0_112] : memref<18x18x4xf32, #tpu.memory_space<vmem>>, vector<16x16x4xf32>
    %88 = vector.shape_cast %87 : vector<16x16x4xf32> to vector<256x4xf32>
    %c4_113 = arith.constant 4 : index
    %c0_114 = arith.constant 0 : index
    %89 = vector.load %arg3[%c4_113, %c0_114] : memref<36x4xf32, #tpu.memory_space<vmem>>, vector<4x4xf32>
    %cst_115 = arith.constant dense<0.000000e+00> : vector<256x4xf32>
    %90 = tpu.matmul %88, %89, %cst_115 {dimension_numbers = #tpu.dot_dimension_numbers<[1], [0], [0], [1], [0, 0, 1, 1], [], []>} : vector<256x4xf32>, vector<4x4xf32>, vector<256x4xf32> -> vector<256x4xf32>
    %91 = arith.addf %86, %90 : vector<256x4xf32>
    %c0_116 = arith.constant 0 : index
    %c2_117 = arith.constant 2 : index
    %c0_118 = arith.constant 0 : index
    %92 = vector.load %arg5[%c0_116, %c2_117, %c0_118] : memref<18x18x4xf32, #tpu.memory_space<vmem>>, vector<16x16x4xf32>
    %93 = vector.shape_cast %92 : vector<16x16x4xf32> to vector<256x4xf32>
    %c8_119 = arith.constant 8 : index
    %c0_120 = arith.constant 0 : index
    %94 = vector.load %arg3[%c8_119, %c0_120] : memref<36x4xf32, #tpu.memory_space<vmem>>, vector<4x4xf32>
    %cst_121 = arith.constant dense<0.000000e+00> : vector<256x4xf32>
    %95 = tpu.matmul %93, %94, %cst_121 {dimension_numbers = #tpu.dot_dimension_numbers<[1], [0], [0], [1], [0, 0, 1, 1], [], []>} : vector<256x4xf32>, vector<4x4xf32>, vector<256x4xf32> -> vector<256x4xf32>
    %96 = arith.addf %91, %95 : vector<256x4xf32>
    %c1_122 = arith.constant 1 : index
    %c0_123 = arith.constant 0 : index
    %c0_124 = arith.constant 0 : index
    %97 = vector.load %arg5[%c1_122, %c0_123, %c0_124] : memref<18x18x4xf32, #tpu.memory_space<vmem>>, vector<16x16x4xf32>
    %98 = vector.shape_cast %97 : vector<16x16x4xf32> to vector<256x4xf32>
    %c12_125 = arith.constant 12 : index
    %c0_126 = arith.constant 0 : index
    %99 = vector.load %arg3[%c12_125, %c0_126] : memref<36x4xf32, #tpu.memory_space<vmem>>, vector<4x4xf32>
    %cst_127 = arith.constant dense<0.000000e+00> : vector<256x4xf32>
    %100 = tpu.matmul %98, %99, %cst_127 {dimension_numbers = #tpu.dot_dimension_numbers<[1], [0], [0], [1], [0, 0, 1, 1], [], []>} : vector<256x4xf32>, vector<4x4xf32>, vector<256x4xf32> -> vector<256x4xf32>
    %101 = arith.addf %96, %100 : vector<256x4xf32>
    %c1_128 = arith.constant 1 : index
    %c1_129 = arith.constant 1 : index
    %c0_130 = arith.constant 0 : index
    %102 = vector.load %arg5[%c1_128, %c1_129, %c0_130] : memref<18x18x4xf32, #tpu.memory_space<vmem>>, vector<16x16x4xf32>
    %103 = vector.shape_cast %102 : vector<16x16x4xf32> to vector<256x4xf32>
    %c16_131 = arith.constant 16 : index
    %c0_132 = arith.constant 0 : index
    %104 = vector.load %arg3[%c16_131, %c0_132] : memref<36x4xf32, #tpu.memory_space<vmem>>, vector<4x4xf32>
    %cst_133 = arith.constant dense<0.000000e+00> : vector<256x4xf32>
    %105 = tpu.matmul %103, %104, %cst_133 {dimension_numbers = #tpu.dot_dimension_numbers<[1], [0], [0], [1], [0, 0, 1, 1], [], []>} : vector<256x4xf32>, vector<4x4xf32>, vector<256x4xf32> -> vector<256x4xf32>
    %106 = arith.addf %101, %105 : vector<256x4xf32>
    %c1_134 = arith.constant 1 : index
    %c2_135 = arith.constant 2 : index
    %c0_136 = arith.constant 0 : index
    %107 = vector.load %arg5[%c1_134, %c2_135, %c0_136] : memref<18x18x4xf32, #tpu.memory_space<vmem>>, vector<16x16x4xf32>
    %108 = vector.shape_cast %107 : vector<16x16x4xf32> to vector<256x4xf32>
    %c20_137 = arith.constant 20 : index
    %c0_138 = arith.constant 0 : index
    %109 = vector.load %arg3[%c20_137, %c0_138] : memref<36x4xf32, #tpu.memory_space<vmem>>, vector<4x4xf32>
    %cst_139 = arith.constant dense<0.000000e+00> : vector<256x4xf32>
    %110 = tpu.matmul %108, %109, %cst_139 {dimension_numbers = #tpu.dot_dimension_numbers<[1], [0], [0], [1], [0, 0, 1, 1], [], []>} : vector<256x4xf32>, vector<4x4xf32>, vector<256x4xf32> -> vector<256x4xf32>
    %111 = arith.addf %106, %110 : vector<256x4xf32>
    %c2_140 = arith.constant 2 : index
    %c0_141 = arith.constant 0 : index
    %c0_142 = arith.constant 0 : index
    %112 = vector.load %arg5[%c2_140, %c0_141, %c0_142] : memref<18x18x4xf32, #tpu.memory_space<vmem>>, vector<16x16x4xf32>
    %113 = vector.shape_cast %112 : vector<16x16x4xf32> to vector<256x4xf32>
    %c24_143 = arith.constant 24 : index
    %c0_144 = arith.constant 0 : index
    %114 = vector.load %arg3[%c24_143, %c0_144] : memref<36x4xf32, #tpu.memory_space<vmem>>, vector<4x4xf32>
    %cst_145 = arith.constant dense<0.000000e+00> : vector<256x4xf32>
    %115 = tpu.matmul %113, %114, %cst_145 {dimension_numbers = #tpu.dot_dimension_numbers<[1], [0], [0], [1], [0, 0, 1, 1], [], []>} : vector<256x4xf32>, vector<4x4xf32>, vector<256x4xf32> -> vector<256x4xf32>
    %116 = arith.addf %111, %115 : vector<256x4xf32>
    %c2_146 = arith.constant 2 : index
    %c1_147 = arith.constant 1 : index
    %c0_148 = arith.constant 0 : index
    %117 = vector.load %arg5[%c2_146, %c1_147, %c0_148] : memref<18x18x4xf32, #tpu.memory_space<vmem>>, vector<16x16x4xf32>
    %118 = vector.shape_cast %117 : vector<16x16x4xf32> to vector<256x4xf32>
    %c28_149 = arith.constant 28 : index
    %c0_150 = arith.constant 0 : index
    %119 = vector.load %arg3[%c28_149, %c0_150] : memref<36x4xf32, #tpu.memory_space<vmem>>, vector<4x4xf32>
    %cst_151 = arith.constant dense<0.000000e+00> : vector<256x4xf32>
    %120 = tpu.matmul %118, %119, %cst_151 {dimension_numbers = #tpu.dot_dimension_numbers<[1], [0], [0], [1], [0, 0, 1, 1], [], []>} : vector<256x4xf32>, vector<4x4xf32>, vector<256x4xf32> -> vector<256x4xf32>
    %121 = arith.addf %116, %120 : vector<256x4xf32>
    %c2_152 = arith.constant 2 : index
    %c2_153 = arith.constant 2 : index
    %c0_154 = arith.constant 0 : index
    %122 = vector.load %arg5[%c2_152, %c2_153, %c0_154] : memref<18x18x4xf32, #tpu.memory_space<vmem>>, vector<16x16x4xf32>
    %123 = vector.shape_cast %122 : vector<16x16x4xf32> to vector<256x4xf32>
    %c32_155 = arith.constant 32 : index
    %c0_156 = arith.constant 0 : index
    %124 = vector.load %arg3[%c32_155, %c0_156] : memref<36x4xf32, #tpu.memory_space<vmem>>, vector<4x4xf32>
    %cst_157 = arith.constant dense<0.000000e+00> : vector<256x4xf32>
    %125 = tpu.matmul %123, %124, %cst_157 {dimension_numbers = #tpu.dot_dimension_numbers<[1], [0], [0], [1], [0, 0, 1, 1], [], []>} : vector<256x4xf32>, vector<4x4xf32>, vector<256x4xf32> -> vector<256x4xf32>
    %126 = arith.addf %121, %125 : vector<256x4xf32>
    %cst_158 = arith.constant dense<0.000000e+00> : vector<4xf32>
    %127 = vector.multi_reduction <add>, %126, %cst_158 [0] : vector<256x4xf32> to vector<4xf32>
    %128 = vector.shape_cast %127 : vector<4xf32> to vector<1x4xf32>
    %cst_159 = arith.constant 3.906250e-03 : f32
    %129 = vector.broadcast %cst_159 : f32 to vector<1x4xf32>
    %130 = arith.mulf %128, %129 : vector<1x4xf32>
    %131 = vector.broadcast %130 : vector<1x4xf32> to vector<256x4xf32>
    %132 = arith.subf %126, %131 : vector<256x4xf32>
    %133 = arith.mulf %132, %132 : vector<256x4xf32>
    %cst_160 = arith.constant dense<0.000000e+00> : vector<4xf32>
    %134 = vector.multi_reduction <add>, %133, %cst_160 [0] : vector<256x4xf32> to vector<4xf32>
    %135 = vector.shape_cast %134 : vector<4xf32> to vector<1x4xf32>
    %cst_161 = arith.constant 3.906250e-03 : f32
    %136 = vector.broadcast %cst_161 : f32 to vector<1x4xf32>
    %137 = arith.mulf %135, %136 : vector<1x4xf32>
    %cst_162 = arith.constant 9.99999974E-6 : f32
    %138 = vector.broadcast %cst_162 : f32 to vector<1x4xf32>
    %139 = arith.addf %137, %138 : vector<1x4xf32>
    %140 = math.rsqrt %139 : vector<1x4xf32>
    %141 = vector.broadcast %140 : vector<1x4xf32> to vector<256x4xf32>
    %142 = arith.mulf %132, %141 : vector<256x4xf32>
    %143 = vector.shape_cast %142 : vector<256x4xf32> to vector<16x16x4xf32>
    %c0_163 = arith.constant 0 : index
    %c0_164 = arith.constant 0 : index
    %c0_165 = arith.constant 0 : index
    %c0_166 = arith.constant 0 : index
    %144 = vector.load %arg1[%c0_163, %c0_164, %c0_165, %c0_166] : memref<1x16x16x4xf32, #tpu.memory_space<vmem>>, vector<1x16x16x4xf32>
    %145 = vector.shape_cast %144 : vector<1x16x16x4xf32> to vector<16x16x4xf32>
    %146 = arith.addf %143, %145 : vector<16x16x4xf32>
    %c0_167 = arith.constant 0 : index
    %c0_168 = arith.constant 0 : index
    %c0_169 = arith.constant 0 : index
    %c0_170 = arith.constant 0 : index
    %147 = vector.load %arg4[%c0_167, %c0_168, %c0_169, %c0_170] : memref<1x16x16x4xf32, #tpu.memory_space<vmem>>, vector<1x16x16x4xf32>
    %148 = vector.shape_cast %147 : vector<1x16x16x4xf32> to vector<16x16x4xf32>
    %149 = vector.shape_cast %146 : vector<16x16x4xf32> to vector<1x16x16x4xf32>
    tpu.vector_store %arg4[%c0_167, %c0_168, %c0_169, %c0_170], %149 {strides = array<i32>} : memref<1x16x16x4xf32, #tpu.memory_space<vmem>>, vector<1x16x16x4xf32>,
    return
  }
  func.func @transform_0(%arg0: i32) -> (i32, i32, i32, i32) {
    %c0_i32 = arith.constant 0 : i32
    %c0_i32_0 = arith.constant 0 : i32
    %c0_i32_1 = arith.constant 0 : i32
    %c0_i32_2 = arith.constant 0 : i32
    return %arg0, %c0_i32, %c0_i32_0, %c0_i32_1 : i32, i32, i32, i32
  }
  func.func @transform_1(%arg0: i32) -> (i32, i32) {
    %c0_i32 = arith.constant 0 : i32
    %c0_i32_0 = arith.constant 0 : i32
    %c0_i32_1 = arith.constant 0 : i32
    return %c0_i32, %c0_i32_0 : i32, i32
  }
  func.func @transform_2(%arg0: i32) -> (i32, i32) {
    %c0_i32 = arith.constant 0 : i32
    %c0_i32_0 = arith.constant 0 : i32
    %c0_i32_1 = arith.constant 0 : i32
    return %c0_i32, %c0_i32_0 : i32, i32
  }
  func.func @transform_3(%arg0: i32) -> (i32, i32, i32, i32) {
    %c0_i32 = arith.constant 0 : i32
    %c0_i32_0 = arith.constant 0 : i32
    %c0_i32_1 = arith.constant 0 : i32
    %c0_i32_2 = arith.constant 0 : i32
    return %arg0, %c0_i32, %c0_i32_0, %c0_i32_1 : i32, i32, i32, i32
  }
}

</mosaic_0001>

<bundles_post_ra>
// kernel: tpu_custom_call.1
= control target key start
LH: loop header
LB: loop body
LE: loop exit
PB: predicated region body
PF: predicated region fallthrough
CT: control target
= control target key end

     0   :  { %s10620_s12 = smov 0   ;;  %s13234_s0 = inlined_call_operand.vmem [shape: f32[2,16,16,4], index: 0, kind: input, shape index: {}]   ;;  %s13235_s1 = inlined_call_operand.vmem [shape: f32[36,4], index: 1, kind: input, shape index: {}]   ;;  %s13236_s2 = inlined_call_operand.vmem [shape: f32[36,4], index: 2, kind: input, shape index: {}]   ;;  %s13237_s3 = inlined_call_operand.vmem [shape: f32[2,16,16,4], index: 3, kind: output, shape index: {}]  }
   0x1 LB: > { %s7967_s13 = sadd.s32 4294967295, %s10598_s12   ;;  %p7971_p0 = scmp.ge.s32.totalorder %s10598_s12, 1  ;;  %s10598_s12 = sphi %s10620_s12, %s13_s12  }
   0x2   : > { %p137_p1 = scmp.lt.s32.totalorder %s10598_s12, 3 }
   0x4   : > { %p138_p2 = pnand %p7971_p0, %p137_p1 }
   0x6   : > { %141 = sbr.rel (%p138_p2) target bundleno = 1910 (0x776), region = 32 }
   0xd   : > { %v386_v0 = vld [vmem:[%s13235_s1 + $0x4] sm:$0xf]  ;;  %vm483_vm0 = vcmask 1043456   ;;  %p161_p3 = scmp.lt.s32.totalorder %s7967_s13, 1  ;;  %v10635_v1 = vld [vmem:[%s13235_s1] sm:$0xf] }
   0xe   : > { %9168 = vmatprep.subr.msk.mxu0 %vm483_vm0, %v386_v0  ;;  %vm204_vm1 = vcmask 31744   ;;  %v10711_v29 = vld [vmem:[%s13235_s1 + $0x8] sm:$0xf]  ;;  %vm266_vm2 = vcmask 24576  }
   0xf   : > { %9169 = vmatpush3.msk.msra.mxu0 %vm483_vm0, %v386_v0  ;;  %s13456_s13 = smov (!%p161_p3, %s7967_s13), 1 }
  0x10   : > { %9218 = vmatprep.subr.msk.mxu0 %vm483_vm0, %v10635_v1  ;;  %s8572_s18 = sshll.u32 %s13456_s13, 8 }
  0x11   : > { %s10648_s21 = scalar_lea.vmem %s13234_s0, %s8572_s18  ;;  %s13115_s6 = scalar_lea.vmem %s13237_s3, %s8572_s18 }
  0x12   : > { %v173_v2 = vld [vmem:[%s10648_s21 + $0x10] sm:$0xff]  ;;  %v174_v3 = vld [vmem:[%s10648_s21 + $0x18] sm:$0xff]  ;;  %v171_v4 = vld [vmem:[%s10648_s21] sm:$0xff] }
  0x13   : > { %207 = vst.msk [vmem:[#allocation2 + $0x31] sm:$0xff] %vm204_vm1, %v173_v2  ;;  %208 = vst.msk [vmem:[#allocation2 + $0x39] sm:$0xff] %vm204_vm1, %v174_v3  ;;  %v172_v5 = vld [vmem:[%s10648_s21 + $0x8] sm:$0xff]  ;;  %v175_v6 = vld [vmem:[%s10648_s21 + $0x20] sm:$0xff] }
  0x14   : > { %205 = vst.msk [vmem:[#allocation2 + $0x19] sm:$0xff] %vm204_vm1, %v171_v4  ;;  %v176_v7 = vld [vmem:[%s10648_s21 + $0x28] sm:$0xff]  ;;  %206 = vst.msk [vmem:[#allocation2 + $0x21] sm:$0xff] %vm204_vm1, %v172_v5  ;;  %v177_v8 = vld [vmem:[%s10648_s21 + $0x30] sm:$0xff] }
  0x15   : > { %209 = vst.msk [vmem:[#allocation2 + $0x49] sm:$0xff] %vm204_vm1, %v175_v6  ;;  %210 = vst.msk [vmem:[#allocation2 + $0x51] sm:$0xff] %vm204_vm1, %v176_v7  ;;  %v178_v9 = vld [vmem:[%s10648_s21 + $0x38] sm:$0xff]  ;;  %v179_v10 = vld [vmem:[%s10648_s21 + $0x40] sm:$0xff] }
  0x16   : > { %211 = vst.msk [vmem:[#allocation2 + $0x61] sm:$0xff] %vm204_vm1, %v177_v8  ;;  %212 = vst.msk [vmem:[#allocation2 + $0x69] sm:$0xff] %vm204_vm1, %v178_v9  ;;  %v180_v11 = vld [vmem:[%s10648_s21 + $0x48] sm:$0xff]  ;;  %v181_v12 = vld [vmem:[%s10648_s21 + $0x50] sm:$0xff] }
  0x17   : > { %213 = vst.msk [vmem:[#allocation2 + $0x79] sm:$0xff] %vm204_vm1, %v179_v10  ;;  %v182_v13 = vld [vmem:[%s10648_s21 + $0x58] sm:$0xff]  ;;  %214 = vst.msk [vmem:[#allocation2 + $0x81] sm:$0xff] %vm204_vm1, %v180_v11  ;;  %v183_v14 = vld [vmem:[%s10648_s21 + $0x60] sm:$0xff] }
  0x18   : > { %215 = vst.msk [vmem:[#allocation2 + $0x91] sm:$0xff] %vm204_vm1, %v181_v12  ;;  %216 = vst.msk [vmem:[#allocation2 + $0x99] sm:$0xff] %vm204_vm1, %v182_v13  ;;  %v184_v15 = vld [vmem:[%s10648_s21 + $0x68] sm:$0xff]  ;;  %v185_v16 = vld [vmem:[%s10648_s21 + $0x70] sm:$0xff] }
  0x19   : > { %217 = vst.msk [vmem:[#allocation2 + $0xa9] sm:$0xff] %vm204_vm1, %v183_v14  ;;  %218 = vst.msk [vmem:[#allocation2 + $0xb1] sm:$0xff] %vm204_vm1, %v184_v15  ;;  %v186_v17 = vld [vmem:[%s10648_s21 + $0x78] sm:$0xff]  ;;  %v187_v18 = vld [vmem:[%s10648_s21 + $0x80] sm:$0xff] }
  0x1a   : > { %219 = vst.msk [vmem:[#allocation2 + $0xc1] sm:$0xff] %vm204_vm1, %v185_v16  ;;  %v188_v19 = vld [vmem:[%s10648_s21 + $0x88] sm:$0xff]  ;;  %220 = vst.msk [vmem:[#allocation2 + $0xc9] sm:$0xff] %vm204_vm1, %v186_v17  ;;  %v189_v20 = vld [vmem:[%s10648_s21 + $0x90] sm:$0xff] }
  0x1b   : > { %221 = vst.msk [vmem:[#allocation2 + $0xd9] sm:$0xff] %vm204_vm1, %v187_v18  ;;  %222 = vst.msk [vmem:[#allocation2 + $0xe1] sm:$0xff] %vm204_vm1, %v188_v19  ;;  %v190_v21 = vld [vmem:[%s10648_s21 + $0x98] sm:$0xff]  ;;  %v191_v22 = vld [vmem:[%s10648_s21 + $0xa0] sm:$0xff] }
  0x1c   : > { %223 = vst.msk [vmem:[#allocation2 + $0xf1] sm:$0xff] %vm204_vm1, %v189_v20  ;;  %224 = vst.msk [vmem:[#allocation2 + $0xf9] sm:$0xff] %vm204_vm1, %v190_v21  ;;  %v192_v23 = vld [vmem:[%s10648_s21 + $0xa8] sm:$0xff]  ;;  %v193_v24 = vld [vmem:[%s10648_s21 + $0xb0] sm:$0xff] }
  0x1d   : > { %225 = vst.msk [vmem:[#allocation2 + $0x109] sm:$0xff] %vm204_vm1, %v191_v22  ;;  %v194_v25 = vld [vmem:[%s10648_s21 + $0xb8] sm:$0xff]  ;;  %226 = vst.msk [vmem:[#allocation2 + $0x111] sm:$0xff] %vm204_vm1, %v192_v23  ;;  %v195_v32 = vld [vmem:[%s10648_s21 + $0xc0] sm:$0xff] }
  0x1e   : > { %v10695_v26 = vld [vmem:[#allocation2 + $0x31] sm:$0xff]  ;;  %v10697_v27 = vld [vmem:[#allocation2 + $0x39] sm:$0xff]  ;;  %227 = vst.msk [vmem:[#allocation2 + $0x121] sm:$0xff] %vm204_vm1, %v193_v24  ;;  %228 = vst.msk [vmem:[#allocation2 + $0x129] sm:$0xff] %vm204_vm1, %v194_v25 }
  0x1f   : > { %240 = vst.msk [vmem:[#allocation2 + $0x1] sm:$0xff] %vm204_vm1, %v10695_v26  ;;  %241 = vst.msk [vmem:[#allocation2 + $0x9] sm:$0xff] %vm204_vm1, %v10697_v27  ;;  %v10706_v28 = vld [vmem:[#allocation2 + $0x19] sm:$0xff]  ;;  %v196_v33 = vld [vmem:[%s10648_s21 + $0xc8] sm:$0xff] }
  0x20   : > { %229 = vst.msk [vmem:[#allocation2 + $0x139] sm:$0xff] %vm204_vm1, %v195_v32  ;;  %v197_v34 = vld [vmem:[%s10648_s21 + $0xd0] sm:$0xff]  ;;  %v198_v35 = vld [vmem:[%s10648_s21 + $0xd8] sm:$0xff]  ;;  %230 = vst.msk [vmem:[#allocation2 + $0x141] sm:$0xff] %vm204_vm1, %v196_v33 }
  0x21   : > { %231 = vst.msk [vmem:[#allocation2 + $0x151] sm:$0xff] %vm204_vm1, %v197_v34  ;;  %232 = vst.msk [vmem:[#allocation2 + $0x159] sm:$0xff] %vm204_vm1, %v198_v35  ;;  %v199_v36 = vld [vmem:[%s10648_s21 + $0xe0] sm:$0xff]  ;;  %v200_v37 = vld [vmem:[%s10648_s21 + $0xe8] sm:$0xff] }
  0x22   : > { %v10729_v39 = vld [vmem:[#allocation2 + $0x21] sm:$0xff]  ;;  %233 = vst.msk [vmem:[#allocation2 + $0x169] sm:$0xff] %vm204_vm1, %v199_v36  ;;  %234 = vst.msk [vmem:[#allocation2 + $0x171] sm:$0xff] %vm204_vm1, %v200_v37  ;;  %v249_v40 = vld [vmem:[#allocation2 + $0x1a] sm:$0x1] }
  0x23   : > { %268 = vst.msk [vmem:[#allocation2 + $0x18] sm:$0x1] %vm266_vm2, %v249_v40  ;;  %v250_v41 = vld [vmem:[#allocation2 + $0x32] sm:$0x1]  ;;  %v251_v42 = vld [vmem:[#allocation2 + $0x4a] sm:$0x1] }
  0x24   : > { %269 = vst.msk [vmem:[#allocation2 + $0x30] sm:$0x1] %vm266_vm2, %v250_v41  ;;  %270 = vst.msk [vmem:[#allocation2 + $0x48] sm:$0x1] %vm266_vm2, %v251_v42  ;;  %v252_v43 = vld [vmem:[#allocation2 + $0x62] sm:$0x1] }
  0x25   : > { %271 = vst.msk [vmem:[#allocation2 + $0x60] sm:$0x1] %vm266_vm2, %v252_v43  ;;  %v253_v44 = vld [vmem:[#allocation2 + $0x7a] sm:$0x1]  ;;  %v254_v45 = vld [vmem:[#allocation2 + $0x92] sm:$0x1] }
  0x26   : > { %v354_v30 = vld [vmem:[#allocation2 + $0x1] sm:$0xff]  ;;  %v355_v31 = vld [vmem:[#allocation2 + $0x9] sm:$0xff]  ;;  %272 = vst.msk [vmem:[#allocation2 + $0x78] sm:$0x1] %vm266_vm2, %v253_v44  ;;  %273 = vst.msk [vmem:[#allocation2 + $0x90] sm:$0x1] %vm266_vm2, %v254_v45 }
  0x27   : > { %9170 = vmatprep.mubr.msk.f32.mxu0 %vm204_vm1, %v354_v30  ;;  %v248_v38 = vld [vmem:[#allocation2 + $0x2] sm:$0x1]  ;;  %v255_v46 = vld [vmem:[#allocation2 + $0xaa] sm:$0x1]  ;;  %v10758_v51 = vld [vmem:[#allocation2 + $0x51] sm:$0xff] }
  0x28   : > { %9171 = vmatmul.mubr.msk.f32.vlgmr.msra.gmra.mrb[0].mxu0 %vm204_vm1, %v355_v31  ;;  %267 = vst.msk [vmem:[#allocation2] sm:$0x1] %vm266_vm2, %v248_v38  ;;  %v10746_v47 = vld [vmem:[#allocation2 + $0x49] sm:$0xff]  ;;  %274 = vst.msk [vmem:[#allocation2 + $0xa8] sm:$0x1] %vm266_vm2, %v255_v46  ;;  %v10764_v53 = vld [vmem:[#allocation2 + $0x61] sm:$0xff] }
  0x29   : > { %9219 = vmatpush3.msk.msra.mxu0 %vm483_vm0, %v10635_v1  ;;  %9173 = vmatprep.mubr.msk.f32.mxu0 %vm204_vm1, %v10706_v28  ;;  %v256_v48 = vld [vmem:[#allocation2 + $0xc2] sm:$0x1]  ;;  %v10752_v49 = vld [vmem:[#allocation2 + $0x169] sm:$0xff]  ;;  %v10754_v50 = vld [vmem:[#allocation2 + $0x171] sm:$0xff] }
  0x2a   : > { %9268 = vmatprep.subr.msk.mxu0 %vm483_vm0, %v10711_v29  ;;  %275 = vst.msk [vmem:[#allocation2 + $0xc0] sm:$0x1] %vm266_vm2, %v256_v48  ;;  %13341 = vst [vmem:[#allocation3_spill] sm:$0xff] %v10752_v49  ;;  %v257_v52 = vld [vmem:[#allocation2 + $0xda] sm:$0x1]  ;;  %v10773_v56 = vld [vmem:[#allocation2 + $0x69] sm:$0xff] }
  0x2b   : > { %13342 = vst [vmem:[#allocation4_spill] sm:$0xff] %v10754_v50  ;;  %246 = vst.msk [vmem:[#allocation2 + $0x199] sm:$0xff] %vm204_vm1, %v10752_v49  ;;  %v258_v54 = vld [vmem:[#allocation2 + $0xf2] sm:$0x1]  ;;  %v259_v55 = vld [vmem:[#allocation2 + $0x10a] sm:$0x1] }
  0x2c   : > { %9174 = vmatmul.mubr.msk.f32.gmra.mrb[2].mxu0 %vm204_vm1, %v10729_v39  ;;  %247 = vst.msk [vmem:[#allocation2 + $0x1a1] sm:$0xff] %vm204_vm1, %v10754_v50  ;;  %v260_v57 = vld [vmem:[#allocation2 + $0x122] sm:$0x1]  ;;  %v10775_v58 = vld [vmem:[#allocation2 + $0x79] sm:$0xff]  ;;  %v262_v60 = vld [vmem:[#allocation2 + $0x152] sm:$0x1] }
  0x2d   : > { %9176 = vmatprep.mubr.msk.f32.mxu0 %vm204_vm1, %v10695_v26  ;;  %276 = vst.msk [vmem:[#allocation2 + $0xd8] sm:$0x1] %vm266_vm2, %v257_v52  ;;  %277 = vst.msk [vmem:[#allocation2 + $0xf0] sm:$0x1] %vm266_vm2, %v258_v54  ;;  %v261_v59 = vld [vmem:[#allocation2 + $0x13a] sm:$0x1] }
  0x2e   : > { %278 = vst.msk [vmem:[#allocation2 + $0x108] sm:$0x1] %vm266_vm2, %v259_v55  ;;  %279 = vst.msk [vmem:[#allocation2 + $0x120] sm:$0x1] %vm266_vm2, %v260_v57  ;;  %v263_v61 = vld [vmem:[#allocation2 + $0x16a] sm:$0x1] }
  0x2f   : > { %280 = vst.msk [vmem:[#allocation2 + $0x138] sm:$0x1] %vm266_vm2, %v261_v59  ;;  %281 = vst.msk [vmem:[#allocation2 + $0x150] sm:$0x1] %vm266_vm2, %v262_v60  ;;  %v10785_v62 = vld [vmem:[#allocation2 + $0x81] sm:$0xff]  ;;  %v10787_v0 = vld [vmem:[#allocation2 + $0x91] sm:$0xff] }
  0x30   : > { %9177 = vmatmul.mubr.msk.f32.gmra.mrb[4].mxu0 %vm204_vm1, %v10697_v27  ;;  %282 = vst.msk [vmem:[#allocation2 + $0x168] sm:$0x1] %vm266_vm2, %v263_v61  ;;  %v285_v63 = vld [vmem:[#allocation2 + $0xf] sm:$0x1]  ;;  %v286_v1 = vld [vmem:[#allocation2 + $0x27] sm:$0x1] }
  0x31   : > { %9179 = vmatprep.mubr.msk.f32.mxu0 %vm204_vm1, %v10746_v47  ;;  %303 = vst.msk [vmem:[#allocation2 + $0x11] sm:$0x1] %vm266_vm2, %v285_v63  ;;  %304 = vst.msk [vmem:[#allocation2 + $0x29] sm:$0x1] %vm266_vm2, %v286_v1  ;;  %v287_v2 = vld [vmem:[#allocation2 + $0x3f] sm:$0x1] }
  0x32   : > { %305 = vst.msk [vmem:[#allocation2 + $0x41] sm:$0x1] %vm266_vm2, %v287_v2  ;;  %v288_v3 = vld [vmem:[#allocation2 + $0x57] sm:$0x1]  ;;  %v289_v4 = vld [vmem:[#allocation2 + $0x6f] sm:$0x1] }
  0x33   : > { %v10796_v5 = vld [vmem:[#allocation2 + $0x99] sm:$0xff]  ;;  %306 = vst.msk [vmem:[#allocation2 + $0x59] sm:$0x1] %vm266_vm2, %v288_v3  ;;  %307 = vst.msk [vmem:[#allocation2 + $0x71] sm:$0x1] %vm266_vm2, %v289_v4  ;;  %v10800_v7 = vld [vmem:[#allocation2 + $0xa9] sm:$0xff] }
  0x34   : > { %9180 = vmatmul.mubr.msk.f32.gmra.mrb[6].mxu0 %vm204_vm1, %v10758_v51  ;;  %v290_v6 = vld [vmem:[#allocation2 + $0x87] sm:$0x1]  ;;  %v291_v8 = vld [vmem:[#allocation2 + $0x9f] sm:$0x1]  ;;  %v292_v9 = vld [vmem:[#allocation2 + $0xb7] sm:$0x1] }
  0x35   : > { %9182 = vmatprep.mubr.msk.f32.mxu0 %vm204_vm1, %v10764_v53  ;;  %308 = vst.msk [vmem:[#allocation2 + $0x89] sm:$0x1] %vm266_vm2, %v290_v6  ;;  %309 = vst.msk [vmem:[#allocation2 + $0xa1] sm:$0x1] %vm266_vm2, %v291_v8  ;;  %v293_v10 = vld [vmem:[#allocation2 + $0xcf] sm:$0x1] }
  0x36   : > { %310 = vst.msk [vmem:[#allocation2 + $0xb9] sm:$0x1] %vm266_vm2, %v292_v9  ;;  %v10809_v11 = vld [vmem:[#allocation2 + $0xb1] sm:$0xff]  ;;  %311 = vst.msk [vmem:[#allocation2 + $0xd1] sm:$0x1] %vm266_vm2, %v293_v10  ;;  %v10812_v12 = vld [vmem:[#allocation2 + $0xc1] sm:$0xff] }
  0x37   : > { %v294_v13 = vld [vmem:[#allocation2 + $0xe7] sm:$0x1]  ;;  %v10819_v14 = vld [vmem:[#allocation2 + $0xc9] sm:$0xff]  ;;  %v10821_v15 = vld [vmem:[#allocation2 + $0xd9] sm:$0xff] }
  0x38   : > { %9183 = vmatmul.mubr.msk.f32.gmra.mrb[8].mxu0 %vm204_vm1, %v10773_v56  ;;  %312 = vst.msk [vmem:[#allocation2 + $0xe9] sm:$0x1] %vm266_vm2, %v294_v13  ;;  %v295_v16 = vld [vmem:[#allocation2 + $0xff] sm:$0x1]  ;;  %v10828_v17 = vld [vmem:[#allocation2 + $0xe1] sm:$0xff]  ;;  %v10830_v18 = vld [vmem:[#allocation2 + $0xf1] sm:$0xff] }
  0x39   : > { %9185 = vmatprep.mubr.msk.f32.mxu0 %vm204_vm1, %v10775_v58  ;;  %313 = vst.msk [vmem:[#allocation2 + $0x101] sm:$0x1] %vm266_vm2, %v295_v16  ;;  %v296_v19 = vld [vmem:[#allocation2 + $0x117] sm:$0x1]  ;;  %v10837_v20 = vld [vmem:[#allocation2 + $0xf9] sm:$0xff]  ;;  %v10839_v21 = vld [vmem:[#allocation2 + $0x109] sm:$0xff] }
  0x3a   : > { %314 = vst.msk [vmem:[#allocation2 + $0x119] sm:$0x1] %vm266_vm2, %v296_v19  ;;  %v297_v22 = vld [vmem:[#allocation2 + $0x12f] sm:$0x1]  ;;  %v10846_v23 = vld [vmem:[#allocation2 + $0x111] sm:$0xff]  ;;  %v10848_v24 = vld [vmem:[#allocation2 + $0x121] sm:$0xff] }
  0x3b   : > { %315 = vst.msk [vmem:[#allocation2 + $0x131] sm:$0x1] %vm266_vm2, %v297_v22  ;;  %v298_v25 = vld [vmem:[#allocation2 + $0x147] sm:$0x1]  ;;  %v10855_v30 = vld [vmem:[#allocation2 + $0x129] sm:$0xff]  ;;  %v10857_v31 = vld [vmem:[#allocation2 + $0x139] sm:$0xff] }
  0x3c   : > { %9186 = vmatmul.mubr.msk.f32.gmra.mrb[10].mxu0 %vm204_vm1, %v10785_v62  ;;  %316 = vst.msk [vmem:[#allocation2 + $0x149] sm:$0x1] %vm266_vm2, %v298_v25  ;;  %v299_v32 = vld [vmem:[#allocation2 + $0x15f] sm:$0x1]  ;;  %v10864_v33 = vld [vmem:[#allocation2 + $0x141] sm:$0xff]  ;;  %v10866_v34 = vld [vmem:[#allocation2 + $0x151] sm:$0xff] }
  0x3d   : > { %9188 = vmatprep.mubr.msk.f32.mxu0 %vm204_vm1, %v10787_v0  ;;  %317 = vst.msk [vmem:[#allocation2 + $0x161] sm:$0x1] %vm266_vm2, %v299_v32  ;;  %v300_v35 = vld [vmem:[#allocation2 + $0x177] sm:$0x1]  ;;  %v10873_v36 = vld [vmem:[#allocation2 + $0x159] sm:$0xff]  ;;  %v322_v38 = vld [vmem:[#allocation2 + $0x8] sm:$0xff] }
  0x3e   : > { %318 = vst.msk [vmem:[#allocation2 + $0x179] sm:$0x1] %vm266_vm2, %v300_v35  ;;  %13343 = vst [vmem:[#allocation5_spill] sm:$0xff] %v10873_v36  ;;  %v321_v37 = vld [vmem:[#allocation2] sm:$0xff]  ;;  %v10882_v40 = vld [vmem:[#allocation2 + $0x18] sm:$0xff] }
  0x3f   : > { %v10887_v41 = vld [vmem:[%s13235_s1 + $0xc] sm:$0xf]  ;;  %v10894_v42 = vld [vmem:[#allocation2 + $0x20] sm:$0xff]  ;;  %v10896_v43 = vld [vmem:[#allocation2 + $0x30] sm:$0xff] }
  0x40   : > { %9189 = vmatmul.mubr.msk.f32.gmra.mrb[12].mxu0 %vm204_vm1, %v10796_v5  ;;  %v10904_v44 = vld [vmem:[#allocation2 + $0x38] sm:$0xff]  ;;  %v10906_v45 = vld [vmem:[#allocation2 + $0x48] sm:$0xff]  ;;  %v10914_v46 = vld [vmem:[#allocation2 + $0x60] sm:$0xff] }
  0x41   : > { %9191 = vmatprep.mubr.msk.f32.mxu0 %vm204_vm1, %v10800_v7  ;;  %v10920_v48 = vld [vmem:[#allocation2 + $0x68] sm:$0xff]  ;;  %v10922_v52 = vld [vmem:[#allocation2 + $0x78] sm:$0xff]  ;;  %v10928_v54 = vld [vmem:[#allocation2 + $0x80] sm:$0xff] }
  0x42   : > { %v10930_v55 = vld [vmem:[#allocation2 + $0x90] sm:$0xff]  ;;  %v10936_v57 = vld [vmem:[#allocation2 + $0x98] sm:$0xff]  ;;  %v10938_v59 = vld [vmem:[#allocation2 + $0xa8] sm:$0xff] }
  0x43   : > { %v10944_v60 = vld [vmem:[#allocation2 + $0xb0] sm:$0xff]  ;;  %v10946_v61 = vld [vmem:[#allocation2 + $0xc0] sm:$0xff]  ;;  %v10952_v63 = vld [vmem:[#allocation2 + $0xc8] sm:$0xff] }
  0x44   : > { %9192 = vmatmul.mubr.msk.f32.gmra.mrb[14].mxu0 %vm204_vm1, %v10809_v11  ;;  %v10954_v1 = vld [vmem:[#allocation2 + $0xd8] sm:$0xff]  ;;  %v10960_v2 = vld [vmem:[#allocation2 + $0xe0] sm:$0xff]  ;;  %v10962_v3 = vld [vmem:[#allocation2 + $0xf0] sm:$0xff] }
  0x45   : > { %9194 = vmatprep.mubr.msk.f32.mxu0 %vm204_vm1, %v10812_v12  ;;  %v10968_v4 = vld [vmem:[#allocation2 + $0xf8] sm:$0xff]  ;;  %v10970_v6 = vld [vmem:[#allocation2 + $0x108] sm:$0xff]  ;;  %v10976_v8 = vld [vmem:[#allocation2 + $0x110] sm:$0xff] }
  0x46   : > { %v10978_v9 = vld [vmem:[#allocation2 + $0x120] sm:$0xff]  ;;  %v201_v10 = vld [vmem:[%s10648_s21 + $0xf0] sm:$0xff]  ;;  %v10986_v13 = vld [vmem:[#allocation2 + $0x128] sm:$0xff] }
  0x47   : > { %235 = vst.msk [vmem:[#allocation2 + $0x181] sm:$0xff] %vm204_vm1, %v201_v10  ;;  %v10988_v16 = vld [vmem:[#allocation2 + $0x138] sm:$0xff]  ;;  %v10994_v19 = vld [vmem:[#allocation2 + $0x140] sm:$0xff]  ;;  %v10996_v22 = vld [vmem:[#allocation2 + $0x150] sm:$0xff] }
  0x48   : > { %9195 = vmatmul.mubr.msk.f32.gmra.mrb[16].mxu0 %vm204_vm1, %v10819_v14  ;;  %v202_v32 = vld [vmem:[%s10648_s21 + $0xf8] sm:$0xff]  ;;  %v1036_v10 = vld [vmem:[#allocation2 + $0x2] sm:$0xff] }
  0x49   : > { %9197 = vmatprep.mubr.msk.f32.mxu0 %vm204_vm1, %v10821_v15  ;;  %236 = vst.msk [vmem:[#allocation2 + $0x189] sm:$0xff] %vm204_vm1, %v202_v32  ;;  %v11005_v35 = vld [vmem:[#allocation2 + $0x158] sm:$0xff] }
  0x4a   : > { %v11018_v32 = vld [vmem:[#allocation2 + $0x1a] sm:$0xff] }
  0x4b   : > { %13344 = vst [vmem:[#allocation6_spill] sm:$0xff] %v11018_v32 }
  0x4c   : > { %9198 = vmatmul.mubr.msk.f32.gmra.mrb[18].mxu0 %vm204_vm1, %v10828_v17 }
  0x4d   : > { %9200 = vmatprep.mubr.msk.f32.mxu0 %vm204_vm1, %v10830_v18 }
  0x4e   : > { %v264_v25 = vld [vmem:[#allocation2 + $0x182] sm:$0x1] }
  0x4f   : > { %283 = vst.msk [vmem:[#allocation2 + $0x180] sm:$0x1] %vm266_vm2, %v264_v25  ;;  %v1037_v25 = vld [vmem:[#allocation2 + $0xa] sm:$0xff] }
  0x50   : > { %9201 = vmatmul.mubr.msk.f32.gmra.mrb[20].mxu0 %vm204_vm1, %v10837_v20 }
  0x51   : > { %9203 = vmatprep.mubr.msk.f32.mxu0 %vm204_vm1, %v10839_v21 }
  0x54   : > { %9204 = vmatmul.mubr.msk.f32.gmra.mrb[22].mxu0 %vm204_vm1, %v10846_v23 }
  0x55   : > { %9206 = vmatprep.mubr.msk.f32.mxu0 %vm204_vm1, %v10848_v24 }
  0x58   : > { %9207 = vmatmul.mubr.msk.f32.gmra.mrb[24].mxu0 %vm204_vm1, %v10855_v30 }
  0x59   : > { %9209 = vmatprep.mubr.msk.f32.mxu0 %vm204_vm1, %v10857_v31 }
  0x5c   : > { %9210 = vmatmul.mubr.msk.f32.gmra.mrb[26].mxu0 %vm204_vm1, %v10864_v33 }
  0x5d   : > { %9212 = vmatprep.mubr.msk.f32.mxu0 %vm204_vm1, %v10866_v34 }
  0x60   : > { %9213 = vmatmul.mubr.msk.f32.gmra.mrb[28].mxu0 %vm204_vm1, %v10873_v36  ;;  %v11032_v36 = vld [vmem:[#allocation2 + $0x32] sm:$0xff] }
  0x61   : > { %9215 = vmatprep.mubr.msk.f32.mxu0 %vm204_vm1, %v10752_v49  ;;  %v11030_v49 = vld [vmem:[#allocation2 + $0x22] sm:$0xff]  ;;  %13346 = vst [vmem:[#allocation8_spill] sm:$0xff] %v11032_v36 }
  0x62   : > { %13345 = vst [vmem:[#allocation7_spill] sm:$0xff] %v11030_v49 }
  0x64   : > { %9216 = vmatmul.mubr.msk.f32.gmra.mrb[30].mxu0 %vm204_vm1, %v10754_v50  ;;  %v11023_v50 = vld [vmem:[%s13235_s1 + $0x10] sm:$0xf] }
  0x65   : > { %9220 = vmatprep.mubr.msk.f32.mxu0 %vm204_vm1, %v321_v37  ;;  %v11007_v37 = vld [vmem:[#allocation2 + $0x168] sm:$0xff] }
  0x68   : > { %9221 = vmatmul.mubr.msk.f32.vlgmr.msra.gmra.mrb[0].mxu0 %vm204_vm1, %v322_v38  ;;  %v11013_v38 = vld [vmem:[#allocation2 + $0x170] sm:$0xff] }
  0x69   : > { %9269 = vmatpush3.msk.msra.mxu0 %vm483_vm0, %v10711_v29  ;;  %9223 = vmatprep.mubr.msk.f32.mxu0 %vm204_vm1, %v10882_v40  ;;  %v10912_v29 = vld [vmem:[#allocation2 + $0x50] sm:$0xff] }
  0x6a   : > { %9318 = vmatprep.subr.msk.mxu0 %vm483_vm0, %v10887_v41 }
  0x6c   : > { %9224 = vmatmul.mubr.msk.f32.gmra.mrb[2].mxu0 %vm204_vm1, %v10894_v42 }
  0x6d   : > { %9226 = vmatprep.mubr.msk.f32.mxu0 %vm204_vm1, %v10896_v43 }
  0x70   : > { %9227 = vmatmul.mubr.msk.f32.gmra.mrb[4].mxu0 %vm204_vm1, %v10904_v44 }
  0x71   : > { %9229 = vmatprep.mubr.msk.f32.mxu0 %vm204_vm1, %v10906_v45 }
  0x74   : > { %9230 = vmatmul.mubr.msk.f32.gmra.mrb[6].mxu0 %vm204_vm1, %v10912_v29 }
  0x75   : > { %9232 = vmatprep.mubr.msk.f32.mxu0 %vm204_vm1, %v10914_v46 }
  0x78   : > { %9233 = vmatmul.mubr.msk.f32.gmra.mrb[8].mxu0 %vm204_vm1, %v10920_v48 }
  0x79   : > { %9235 = vmatprep.mubr.msk.f32.mxu0 %vm204_vm1, %v10922_v52 }
  0x7c   : > { %9236 = vmatmul.mubr.msk.f32.gmra.mrb[10].mxu0 %vm204_vm1, %v10928_v54 }
  0x7d   : > { %9238 = vmatprep.mubr.msk.f32.mxu0 %vm204_vm1, %v10930_v55 }
  0x80   : > { %9239 = vmatmul.mubr.msk.f32.gmra.mrb[12].mxu0 %vm204_vm1, %v10936_v57 }
  0x81   : > { %9241 = vmatprep.mubr.msk.f32.mxu0 %vm204_vm1, %v10938_v59 }
  0x84   : > { %9242 = vmatmul.mubr.msk.f32.gmra.mrb[14].mxu0 %vm204_vm1, %v10944_v60 }
  0x85   : > { %9244 = vmatprep.mubr.msk.f32.mxu0 %vm204_vm1, %v10946_v61 }
  0x88   : > { %9245 = vmatmul.mubr.msk.f32.gmra.mrb[16].mxu0 %vm204_vm1, %v10952_v63 }
  0x89   : > { %9247 = vmatprep.mubr.msk.f32.mxu0 %vm204_vm1, %v10954_v1 }
  0x8c   : > { %9248 = vmatmul.mubr.msk.f32.gmra.mrb[18].mxu0 %vm204_vm1, %v10960_v2 }
  0x8d   : > { %9250 = vmatprep.mubr.msk.f32.mxu0 %vm204_vm1, %v10962_v3 }
  0x90   : > { %9251 = vmatmul.mubr.msk.f32.gmra.mrb[20].mxu0 %vm204_vm1, %v10968_v4 }
  0x91   : > { %9253 = vmatprep.mubr.msk.f32.mxu0 %vm204_vm1, %v10970_v6 }
  0x94   : > { %9254 = vmatmul.mubr.msk.f32.gmra.mrb[22].mxu0 %vm204_vm1, %v10976_v8 }
  0x95   : > { %9256 = vmatprep.mubr.msk.f32.mxu0 %vm204_vm1, %v10978_v9 }
  0x98   : > { %9257 = vmatmul.mubr.msk.f32.gmra.mrb[24].mxu0 %vm204_vm1, %v10986_v13 }
  0x99   : > { %9259 = vmatprep.mubr.msk.f32.mxu0 %vm204_vm1, %v10988_v16 }
  0x9c   : > { %9260 = vmatmul.mubr.msk.f32.gmra.mrb[26].mxu0 %vm204_vm1, %v10994_v19 }
  0x9d   : > { %9262 = vmatprep.mubr.msk.f32.mxu0 %vm204_vm1, %v10996_v22 }
  0xa0   : > { %9263 = vmatmul.mubr.msk.f32.gmra.mrb[28].mxu0 %vm204_vm1, %v11005_v35 }
  0xa1   : > { %9265 = vmatprep.mubr.msk.f32.mxu0 %vm204_vm1, %v11007_v37 }
  0xa4   : > { %9266 = vmatmul.mubr.msk.f32.gmra.mrb[30].mxu0 %vm204_vm1, %v11013_v38 }
  0xa5   : > { %9270 = vmatprep.mubr.msk.f32.mxu0 %vm204_vm1, %v1036_v10  ;;  %v11040_v10 = vld [vmem:[#allocation2 + $0x3a] sm:$0xff] }
  0xa6   : > { %13347 = vst [vmem:[#allocation9_spill] sm:$0xff] %v11040_v10 }
  0xa8   : > { %9271 = vmatmul.mubr.msk.f32.vlgmr.msra.gmra.mrb[0].mxu0 %vm204_vm1, %v1037_v25  ;;  %v11042_v25 = vld [vmem:[#allocation2 + $0x4a] sm:$0xff] }
  0xa9   : > { %9319 = vmatpush3.msk.msra.mxu0 %vm483_vm0, %v10887_v41  ;;  %9273 = vmatprep.mubr.msk.f32.mxu0 %vm204_vm1, %v11018_v32  ;;  %13348 = vst [vmem:[#allocation10_spill] sm:$0xff] %v11042_v25  ;;  %v11048_v41 = vld [vmem:[#allocation2 + $0x52] sm:$0xff]  ;;  %v11050_v32 = vld [vmem:[#allocation2 + $0x62] sm:$0xff] }
  0xaa   : > { %9368 = vmatprep.subr.msk.mxu0 %vm483_vm0, %v11023_v50  ;;  %13349 = vst [vmem:[#allocation11_spill] sm:$0xff] %v11048_v41  ;;  %13350 = vst [vmem:[#allocation12_spill] sm:$0xff] %v11050_v32 }
  0xac   : > { %9274 = vmatmul.mubr.msk.f32.gmra.mrb[2].mxu0 %vm204_vm1, %v11030_v49  ;;  %v11058_v49 = vld [vmem:[#allocation2 + $0x7a] sm:$0xff] }
  0xad   : > { %9276 = vmatprep.mubr.msk.f32.mxu0 %vm204_vm1, %v11032_v36  ;;  %v11056_v36 = vld [vmem:[#allocation2 + $0x6a] sm:$0xff]  ;;  %13352 = vst [vmem:[#allocation14_spill] sm:$0xff] %v11058_v49 }
  0xae   : > { %13351 = vst [vmem:[#allocation13_spill] sm:$0xff] %v11056_v36 }
  0xb0   : > { %9277 = vmatmul.mubr.msk.f32.gmra.mrb[4].mxu0 %vm204_vm1, %v11040_v10  ;;  %v11066_v10 = vld [vmem:[#allocation2 + $0x92] sm:$0xff] }
  0xb1   : > { %9279 = vmatprep.mubr.msk.f32.mxu0 %vm204_vm1, %v11042_v25  ;;  %v11064_v25 = vld [vmem:[#allocation2 + $0x82] sm:$0xff]  ;;  %13354 = vst [vmem:[#allocation16_spill] sm:$0xff] %v11066_v10 }
  0xb2   : > { %13353 = vst [vmem:[#allocation15_spill] sm:$0xff] %v11064_v25 }
  0xb4   : > { %9280 = vmatmul.mubr.msk.f32.gmra.mrb[6].mxu0 %vm204_vm1, %v11048_v41  ;;  %v11074_v41 = vld [vmem:[#allocation2 + $0xaa] sm:$0xff] }
  0xb5   : > { %9282 = vmatprep.mubr.msk.f32.mxu0 %vm204_vm1, %v11050_v32  ;;  %v11072_v32 = vld [vmem:[#allocation2 + $0x9a] sm:$0xff]  ;;  %13356 = vst [vmem:[#allocation18_spill] sm:$0xff] %v11074_v41 }
  0xb6   : > { %13355 = vst [vmem:[#allocation17_spill] sm:$0xff] %v11072_v32 }
  0xb8   : > { %9283 = vmatmul.mubr.msk.f32.gmra.mrb[8].mxu0 %vm204_vm1, %v11056_v36  ;;  %v11082_v36 = vld [vmem:[#allocation2 + $0xc2] sm:$0xff] }
  0xb9   : > { %9285 = vmatprep.mubr.msk.f32.mxu0 %vm204_vm1, %v11058_v49  ;;  %v11080_v49 = vld [vmem:[#allocation2 + $0xb2] sm:$0xff]  ;;  %13358 = vst [vmem:[#allocation20_spill] sm:$0xff] %v11082_v36 }
  0xba   : > { %13357 = vst [vmem:[#allocation19_spill] sm:$0xff] %v11080_v49 }
  0xbc   : > { %9286 = vmatmul.mubr.msk.f32.gmra.mrb[10].mxu0 %vm204_vm1, %v11064_v25  ;;  %v11090_v25 = vld [vmem:[#allocation2 + $0xda] sm:$0xff] }
  0xbd   : > { %9288 = vmatprep.mubr.msk.f32.mxu0 %vm204_vm1, %v11066_v10  ;;  %v11088_v10 = vld [vmem:[#allocation2 + $0xca] sm:$0xff]  ;;  %13360 = vst [vmem:[#allocation22_spill] sm:$0xff] %v11090_v25 }
  0xbe   : > { %13359 = vst [vmem:[#allocation21_spill] sm:$0xff] %v11088_v10 }
  0xc0   : > { %9289 = vmatmul.mubr.msk.f32.gmra.mrb[12].mxu0 %vm204_vm1, %v11072_v32  ;;  %v11098_v32 = vld [vmem:[#allocation2 + $0xf2] sm:$0xff] }
  0xc1   : > { %9291 = vmatprep.mubr.msk.f32.mxu0 %vm204_vm1, %v11074_v41  ;;  %v11096_v41 = vld [vmem:[#allocation2 + $0xe2] sm:$0xff]  ;;  %13362 = vst [vmem:[#allocation24_spill] sm:$0xff] %v11098_v32 }
  0xc2   : > { %13361 = vst [vmem:[#allocation23_spill] sm:$0xff] %v11096_v41 }
  0xc4   : > { %9292 = vmatmul.mubr.msk.f32.gmra.mrb[14].mxu0 %vm204_vm1, %v11080_v49  ;;  %v11106_v49 = vld [vmem:[#allocation2 + $0x10a] sm:$0xff] }
  0xc5   : > { %9294 = vmatprep.mubr.msk.f32.mxu0 %vm204_vm1, %v11082_v36  ;;  %v11104_v36 = vld [vmem:[#allocation2 + $0xfa] sm:$0xff]  ;;  %13364 = vst [vmem:[#allocation26_spill] sm:$0xff] %v11106_v49 }
  0xc6   : > { %13363 = vst [vmem:[#allocation25_spill] sm:$0xff] %v11104_v36 }
  0xc8   : > { %9295 = vmatmul.mubr.msk.f32.gmra.mrb[16].mxu0 %vm204_vm1, %v11088_v10  ;;  %v11114_v10 = vld [vmem:[#allocation2 + $0x122] sm:$0xff] }
  0xc9   : > { %9297 = vmatprep.mubr.msk.f32.mxu0 %vm204_vm1, %v11090_v25  ;;  %v11112_v25 = vld [vmem:[#allocation2 + $0x112] sm:$0xff]  ;;  %13366 = vst [vmem:[#allocation28_spill] sm:$0xff] %v11114_v10 }
  0xca   : > { %13365 = vst [vmem:[#allocation27_spill] sm:$0xff] %v11112_v25 }
  0xcc   : > { %9298 = vmatmul.mubr.msk.f32.gmra.mrb[18].mxu0 %vm204_vm1, %v11096_v41  ;;  %v11122_v41 = vld [vmem:[#allocation2 + $0x13a] sm:$0xff] }
  0xcd   : > { %9300 = vmatprep.mubr.msk.f32.mxu0 %vm204_vm1, %v11098_v32  ;;  %v11120_v32 = vld [vmem:[#allocation2 + $0x12a] sm:$0xff]  ;;  %13367 = vst [vmem:[#allocation29_spill] sm:$0xff] %v11122_v41 }
  0xd0   : > { %9301 = vmatmul.mubr.msk.f32.gmra.mrb[20].mxu0 %vm204_vm1, %v11104_v36  ;;  %v11130_v36 = vld [vmem:[#allocation2 + $0x152] sm:$0xff] }
  0xd1   : > { %9303 = vmatprep.mubr.msk.f32.mxu0 %vm204_vm1, %v11106_v49  ;;  %v11128_v49 = vld [vmem:[#allocation2 + $0x142] sm:$0xff]  ;;  %13368 = vst [vmem:[#allocation30_spill] sm:$0xff] %v11130_v36 }
  0xd4   : > { %9304 = vmatmul.mubr.msk.f32.gmra.mrb[22].mxu0 %vm204_vm1, %v11112_v25  ;;  %v11138_v25 = vld [vmem:[#allocation2 + $0x16a] sm:$0xff] }
  0xd5   : > { %9306 = vmatprep.mubr.msk.f32.mxu0 %vm204_vm1, %v11114_v10  ;;  %v11136_v10 = vld [vmem:[#allocation2 + $0x15a] sm:$0xff] }
  0xd8   : > { %9307 = vmatmul.mubr.msk.f32.gmra.mrb[24].mxu0 %vm204_vm1, %v11120_v32 }
  0xd9   : > { %9309 = vmatprep.mubr.msk.f32.mxu0 %vm204_vm1, %v11122_v41  ;;  %v11144_v41 = vld [vmem:[#allocation2 + $0x172] sm:$0xff] }
  0xdc   : > { %9310 = vmatmul.mubr.msk.f32.gmra.mrb[26].mxu0 %vm204_vm1, %v11128_v49 }
  0xdd   : > { %9312 = vmatprep.mubr.msk.f32.mxu0 %vm204_vm1, %v11130_v36  ;;  %v2235_v36 = vld [vmem:[%s13235_s1 + $0x14] sm:$0xf] }
  0xe0   : > { %9313 = vmatmul.mubr.msk.f32.gmra.mrb[28].mxu0 %vm204_vm1, %v11136_v10 }
  0xe1   : > { %9315 = vmatprep.mubr.msk.f32.mxu0 %vm204_vm1, %v11138_v25 }
  0xe4   : > { %9316 = vmatmul.mubr.msk.f32.gmra.mrb[30].mxu0 %vm204_vm1, %v11144_v41 }
  0xe5   : > { %9320 = vmatprep.mubr.msk.f32.mxu0 %vm204_vm1, %v10882_v40  ;;  %v11213_v40 = vld [vmem:[#allocation2 + $0x180] sm:$0xff] }
  0xe8   : > { %9321 = vmatmul.mubr.msk.f32.vlgmr.msra.gmra.mrb[0].mxu0 %vm204_vm1, %v10894_v42  ;;  %v11219_v42 = vld [vmem:[#allocation2 + $0x188] sm:$0xff] }
  0xe9   : > { %9369 = vmatpush3.msk.msra.mxu0 %vm483_vm0, %v11023_v50  ;;  %9323 = vmatprep.mubr.msk.f32.mxu0 %vm204_vm1, %v10896_v43  ;;  %v301_v50 = vld [vmem:[#allocation2 + $0x18f] sm:$0x1] }
  0xea   : > { %9418 = vmatprep.subr.msk.mxu0 %vm483_vm0, %v2235_v36  ;;  %319 = vst.msk [vmem:[#allocation2 + $0x191] sm:$0x1] %vm266_vm2, %v301_v50  ;;  %v2624_v50 = vld [vmem:[%s13235_s1 + $0x18] sm:$0xf] }
  0xec   : > { %9324 = vmatmul.mubr.msk.f32.gmra.mrb[2].mxu0 %vm204_vm1, %v10904_v44 }
  0xed   : > { %9326 = vmatprep.mubr.msk.f32.mxu0 %vm204_vm1, %v10906_v45 }
  0xf0   : > { %9327 = vmatmul.mubr.msk.f32.gmra.mrb[4].mxu0 %vm204_vm1, %v10912_v29 }
  0xf1   : > { %9329 = vmatprep.mubr.msk.f32.mxu0 %vm204_vm1, %v10914_v46 }
  0xf4   : > { %9330 = vmatmul.mubr.msk.f32.gmra.mrb[6].mxu0 %vm204_vm1, %v10920_v48 }
  0xf5   : > { %9332 = vmatprep.mubr.msk.f32.mxu0 %vm204_vm1, %v10922_v52 }
  0xf8   : > { %9333 = vmatmul.mubr.msk.f32.gmra.mrb[8].mxu0 %vm204_vm1, %v10928_v54 }
  0xf9   : > { %9335 = vmatprep.mubr.msk.f32.mxu0 %vm204_vm1, %v10930_v55 }
  0xfc   : > { %9336 = vmatmul.mubr.msk.f32.gmra.mrb[10].mxu0 %vm204_vm1, %v10936_v57 }
  0xfd   : > { %9338 = vmatprep.mubr.msk.f32.mxu0 %vm204_vm1, %v10938_v59 }
 0x100   : > { %9339 = vmatmul.mubr.msk.f32.gmra.mrb[12].mxu0 %vm204_vm1, %v10944_v60 }
 0x101   : > { %9341 = vmatprep.mubr.msk.f32.mxu0 %vm204_vm1, %v10946_v61 }
 0x104   : > { %9342 = vmatmul.mubr.msk.f32.gmra.mrb[14].mxu0 %vm204_vm1, %v10952_v63 }
 0x105   : > { %9344 = vmatprep.mubr.msk.f32.mxu0 %vm204_vm1, %v10954_v1 }
 0x108   : > { %9345 = vmatmul.mubr.msk.f32.gmra.mrb[16].mxu0 %vm204_vm1, %v10960_v2 }
 0x109   : > { %9347 = vmatprep.mubr.msk.f32.mxu0 %vm204_vm1, %v10962_v3 }
 0x10c   : > { %9348 = vmatmul.mubr.msk.f32.gmra.mrb[18].mxu0 %vm204_vm1, %v10968_v4 }
 0x10d   : > { %9350 = vmatprep.mubr.msk.f32.mxu0 %vm204_vm1, %v10970_v6 }
 0x110   : > { %9351 = vmatmul.mubr.msk.f32.gmra.mrb[20].mxu0 %vm204_vm1, %v10976_v8 }
 0x111   : > { %9353 = vmatprep.mubr.msk.f32.mxu0 %vm204_vm1, %v10978_v9 }
 0x114   : > { %9354 = vmatmul.mubr.msk.f32.gmra.mrb[22].mxu0 %vm204_vm1, %v10986_v13 }
 0x115   : > { %9356 = vmatprep.mubr.msk.f32.mxu0 %vm204_vm1, %v10988_v16 }
 0x118   : > { %9357 = vmatmul.mubr.msk.f32.gmra.mrb[24].mxu0 %vm204_vm1, %v10994_v19 }
 0x119   : > { %9359 = vmatprep.mubr.msk.f32.mxu0 %vm204_vm1, %v10996_v22 }
 0x11c   : > { %9360 = vmatmul.mubr.msk.f32.gmra.mrb[26].mxu0 %vm204_vm1, %v11005_v35 }
 0x11d   : > { %9362 = vmatprep.mubr.msk.f32.mxu0 %vm204_vm1, %v11007_v37 }
 0x120   : > { %9363 = vmatmul.mubr.msk.f32.gmra.mrb[28].mxu0 %vm204_vm1, %v11013_v38 }
 0x121   : > { %9365 = vmatprep.mubr.msk.f32.mxu0 %vm204_vm1, %v11213_v40 }
 0x124   : > { %9366 = vmatmul.mubr.msk.f32.gmra.mrb[30].mxu0 %vm204_vm1, %v11219_v42 }
 0x125   : > { %9370 = vmatprep.mubr.msk.f32.mxu0 %vm204_vm1, %v10706_v28  ;;  %v13370_v28 = vld [vmem:[#allocation3_spill] sm:$0xff] }
 0x128   : > { %9371 = vmatmul.mubr.msk.f32.vlgmr.msra.gmra.mrb[0].mxu0 %vm204_vm1, %v10729_v39  ;;  %v11287_v39 = vld [vmem:[#allocation2 + $0x181] sm:$0xff] }
 0x129   : > { %9419 = vmatpush3.msk.msra.mxu0 %vm483_vm0, %v2235_v36  ;;  %9373 = vmatprep.mubr.msk.f32.mxu0 %vm204_vm1, %v10695_v26  ;;  %v265_v26 = vld [vmem:[#allocation2 + $0x19a] sm:$0x1]  ;;  %v13392_v36 = vld [vmem:[#allocation26_spill] sm:$0xff] }
 0x12a   : > { %9468 = vmatprep.subr.msk.mxu0 %vm483_vm0, %v2624_v50  ;;  %284 = vst.msk [vmem:[#allocation2 + $0x198] sm:$0x1] %vm266_vm2, %v265_v26  ;;  %v13394_v26 = vld [vmem:[#allocation28_spill] sm:$0xff] }
 0x12c   : > { %9374 = vmatmul.mubr.msk.f32.gmra.mrb[2].mxu0 %vm204_vm1, %v10697_v27  ;;  %v13369_v27 = vld [vmem:[#allocation5_spill] sm:$0xff] }
 0x12d   : > { %9376 = vmatprep.mubr.msk.f32.mxu0 %vm204_vm1, %v10746_v47  ;;  %v13371_v47 = vld [vmem:[#allocation4_spill] sm:$0xff] }
 0x130   : > { %9377 = vmatmul.mubr.msk.f32.gmra.mrb[4].mxu0 %vm204_vm1, %v10758_v51  ;;  %v11293_v51 = vld [vmem:[#allocation2 + $0x189] sm:$0xff] }
 0x131   : > { %9379 = vmatprep.mubr.msk.f32.mxu0 %vm204_vm1, %v10764_v53  ;;  %v13372_v53 = vld [vmem:[#allocation6_spill] sm:$0xff] }
 0x134   : > { %9380 = vmatmul.mubr.msk.f32.gmra.mrb[6].mxu0 %vm204_vm1, %v10773_v56  ;;  %v3013_v56 = vld [vmem:[%s13235_s1 + $0x1c] sm:$0xf] }
 0x135   : > { %9382 = vmatprep.mubr.msk.f32.mxu0 %vm204_vm1, %v10775_v58  ;;  %v13373_v58 = vld [vmem:[#allocation7_spill] sm:$0xff] }
 0x138   : > { %9383 = vmatmul.mubr.msk.f32.gmra.mrb[8].mxu0 %vm204_vm1, %v10785_v62  ;;  %v13374_v62 = vld [vmem:[#allocation8_spill] sm:$0xff] }
 0x139   : > { %9385 = vmatprep.mubr.msk.f32.mxu0 %vm204_vm1, %v10787_v0  ;;  %v13375_v0 = vld [vmem:[#allocation9_spill] sm:$0xff] }
 0x13c   : > { %9386 = vmatmul.mubr.msk.f32.gmra.mrb[10].mxu0 %vm204_vm1, %v10796_v5  ;;  %v13376_v5 = vld [vmem:[#allocation10_spill] sm:$0xff] }
 0x13d   : > { %9388 = vmatprep.mubr.msk.f32.mxu0 %vm204_vm1, %v10800_v7  ;;  %v13377_v7 = vld [vmem:[#allocation11_spill] sm:$0xff] }
 0x140   : > { %9389 = vmatmul.mubr.msk.f32.gmra.mrb[12].mxu0 %vm204_vm1, %v10809_v11  ;;  %v13378_v11 = vld [vmem:[#allocation12_spill] sm:$0xff] }
 0x141   : > { %9391 = vmatprep.mubr.msk.f32.mxu0 %vm204_vm1, %v10812_v12  ;;  %v13379_v12 = vld [vmem:[#allocation13_spill] sm:$0xff] }
 0x144   : > { %9392 = vmatmul.mubr.msk.f32.gmra.mrb[14].mxu0 %vm204_vm1, %v10819_v14  ;;  %v13380_v14 = vld [vmem:[#allocation14_spill] sm:$0xff] }
 0x145   : > { %9394 = vmatprep.mubr.msk.f32.mxu0 %vm204_vm1, %v10821_v15  ;;  %v13381_v15 = vld [vmem:[#allocation15_spill] sm:$0xff] }
 0x148   : > { %9395 = vmatmul.mubr.msk.f32.gmra.mrb[16].mxu0 %vm204_vm1, %v10828_v17  ;;  %v13382_v17 = vld [vmem:[#allocation16_spill] sm:$0xff] }
 0x149   : > { %9397 = vmatprep.mubr.msk.f32.mxu0 %vm204_vm1, %v10830_v18  ;;  %v13383_v18 = vld [vmem:[#allocation17_spill] sm:$0xff] }
 0x14c   : > { %9398 = vmatmul.mubr.msk.f32.gmra.mrb[18].mxu0 %vm204_vm1, %v10837_v20  ;;  %v13384_v20 = vld [vmem:[#allocation18_spill] sm:$0xff] }
 0x14d   : > { %9400 = vmatprep.mubr.msk.f32.mxu0 %vm204_vm1, %v10839_v21  ;;  %v13385_v21 = vld [vmem:[#allocation19_spill] sm:$0xff] }
 0x150   : > { %9401 = vmatmul.mubr.msk.f32.gmra.mrb[20].mxu0 %vm204_vm1, %v10846_v23  ;;  %v13386_v23 = vld [vmem:[#allocation20_spill] sm:$0xff] }
 0x151   : > { %9403 = vmatprep.mubr.msk.f32.mxu0 %vm204_vm1, %v10848_v24  ;;  %v13387_v24 = vld [vmem:[#allocation21_spill] sm:$0xff] }
 0x154   : > { %9404 = vmatmul.mubr.msk.f32.gmra.mrb[22].mxu0 %vm204_vm1, %v10855_v30  ;;  %v13388_v30 = vld [vmem:[#allocation22_spill] sm:$0xff] }
 0x155   : > { %9406 = vmatprep.mubr.msk.f32.mxu0 %vm204_vm1, %v10857_v31  ;;  %v13389_v31 = vld [vmem:[#allocation23_spill] sm:$0xff] }
 0x158   : > { %9407 = vmatmul.mubr.msk.f32.gmra.mrb[24].mxu0 %vm204_vm1, %v10864_v33  ;;  %v13390_v33 = vld [vmem:[#allocation24_spill] sm:$0xff] }
 0x159   : > { %9409 = vmatprep.mubr.msk.f32.mxu0 %vm204_vm1, %v10866_v34  ;;  %v13391_v34 = vld [vmem:[#allocation25_spill] sm:$0xff] }
 0x15c   : > { %9410 = vmatmul.mubr.msk.f32.gmra.mrb[26].mxu0 %vm204_vm1, %v13369_v27  ;;  %v13395_v27 = vld [vmem:[#allocation29_spill] sm:$0xff] }
 0x15d   : > { %9412 = vmatprep.mubr.msk.f32.mxu0 %vm204_vm1, %v13370_v28  ;;  %v13396_v28 = vld [vmem:[#allocation30_spill] sm:$0xff] }
 0x160   : > { %9413 = vmatmul.mubr.msk.f32.gmra.mrb[28].mxu0 %vm204_vm1, %v13371_v47  ;;  %v11360_v47 = vld [vmem:[#allocation2 + $0x182] sm:$0xff] }
 0x161   : > { %9415 = vmatprep.mubr.msk.f32.mxu0 %vm204_vm1, %v11287_v39 }
 0x164   : > { %9416 = vmatmul.mubr.msk.f32.gmra.mrb[30].mxu0 %vm204_vm1, %v11293_v51 }
 0x165   : > { %9420 = vmatprep.mubr.msk.f32.mxu0 %vm204_vm1, %v13372_v53  ;;  %v11366_v53 = vld [vmem:[#allocation2 + $0x18a] sm:$0xff] }
 0x168   : > { %9421 = vmatmul.mubr.msk.f32.vlgmr.msra.gmra.mrb[0].mxu0 %vm204_vm1, %v13373_v58  ;;  %v3402_v58 = vld [vmem:[%s13235_s1 + $0x20] sm:$0xf] }
 0x169   : > { %9469 = vmatpush3.msk.msra.mxu0 %vm483_vm0, %v2624_v50  ;;  %9423 = vmatprep.mubr.msk.f32.mxu0 %vm204_vm1, %v13374_v62  ;;  %v13393_v50 = vld [vmem:[#allocation27_spill] sm:$0xff] }
 0x16a   : > { %9518 = vmatprep.subr.msk.mxu0 %vm483_vm0, %v3013_v56 }
 0x16c   : > { %9424 = vmatmul.mubr.msk.f32.gmra.mrb[2].mxu0 %vm204_vm1, %v13375_v0 }
 0x16d   : > { %9426 = vmatprep.mubr.msk.f32.mxu0 %vm204_vm1, %v13376_v5 }
 0x170   : > { %9427 = vmatmul.mubr.msk.f32.gmra.mrb[4].mxu0 %vm204_vm1, %v13377_v7 }
 0x171   : > { %9429 = vmatprep.mubr.msk.f32.mxu0 %vm204_vm1, %v13378_v11 }
 0x174   : > { %9430 = vmatmul.mubr.msk.f32.gmra.mrb[6].mxu0 %vm204_vm1, %v13379_v12 }
 0x175   : > { %9432 = vmatprep.mubr.msk.f32.mxu0 %vm204_vm1, %v13380_v14 }
 0x178   : > { %9433 = vmatmul.mubr.msk.f32.gmra.mrb[8].mxu0 %vm204_vm1, %v13381_v15 }
 0x179   : > { %9435 = vmatprep.mubr.msk.f32.mxu0 %vm204_vm1, %v13382_v17 }
 0x17c   : > { %9436 = vmatmul.mubr.msk.f32.gmra.mrb[10].mxu0 %vm204_vm1, %v13383_v18 }
 0x17d   : > { %9438 = vmatprep.mubr.msk.f32.mxu0 %vm204_vm1, %v13384_v20 }
 0x180   : > { %9439 = vmatmul.mubr.msk.f32.gmra.mrb[12].mxu0 %vm204_vm1, %v13385_v21 }
 0x181   : > { %9441 = vmatprep.mubr.msk.f32.mxu0 %vm204_vm1, %v13386_v23 }
 0x184   : > { %9442 = vmatmul.mubr.msk.f32.gmra.mrb[14].mxu0 %vm204_vm1, %v13387_v24 }
 0x185   : > { %9444 = vmatprep.mubr.msk.f32.mxu0 %vm204_vm1, %v13388_v30 }
 0x188   : > { %9445 = vmatmul.mubr.msk.f32.gmra.mrb[16].mxu0 %vm204_vm1, %v13389_v31 }
 0x189   : > { %9447 = vmatprep.mubr.msk.f32.mxu0 %vm204_vm1, %v13390_v33 }
 0x18c   : > { %9448 = vmatmul.mubr.msk.f32.gmra.mrb[18].mxu0 %vm204_vm1, %v13391_v34 }
 0x18d   : > { %9450 = vmatprep.mubr.msk.f32.mxu0 %vm204_vm1, %v13392_v36 }
 0x190   : > { %9451 = vmatmul.mubr.msk.f32.gmra.mrb[20].mxu0 %vm204_vm1, %v13393_v50 }
 0x191   : > { %9453 = vmatprep.mubr.msk.f32.mxu0 %vm204_vm1, %v13394_v26 }
 0x194   : > { %9454 = vmatmul.mubr.msk.f32.gmra.mrb[22].mxu0 %vm204_vm1, %v11120_v32 }
 0x195   : > { %9456 = vmatprep.mubr.msk.f32.mxu0 %vm204_vm1, %v13395_v27 }
 0x198   : > { %9457 = vmatmul.mubr.msk.f32.gmra.mrb[24].mxu0 %vm204_vm1, %v11128_v49 }
 0x199   : > { %9459 = vmatprep.mubr.msk.f32.mxu0 %vm204_vm1, %v13396_v28 }
 0x19c   : > { %9460 = vmatmul.mubr.msk.f32.gmra.mrb[26].mxu0 %vm204_vm1, %v11136_v10 }
 0x19d   : > { %9462 = vmatprep.mubr.msk.f32.mxu0 %vm204_vm1, %v11138_v25 }
 0x1a0   : > { %9463 = vmatmul.mubr.msk.f32.gmra.mrb[28].mxu0 %vm204_vm1, %v11144_v41 }
 0x1a1   : > { %9465 = vmatprep.mubr.msk.f32.mxu0 %vm204_vm1, %v11360_v47 }
 0x1a4   : > { %9466 = vmatmul.mubr.msk.f32.gmra.mrb[30].mxu0 %vm204_vm1, %v11366_v53 }
 0x1a5   : > { %9470 = vmatprep.mubr.msk.f32.mxu0 %vm204_vm1, %v10896_v43  ;;  %v302_v43 = vld [vmem:[#allocation2 + $0x1a7] sm:$0x1] }
 0x1a6   : > { %320 = vst.msk [vmem:[#allocation2 + $0x1a9] sm:$0x1] %vm266_vm2, %v302_v43  ;;  %v3012_v43 = vld [vmem:[#allocation2 + $0x1a1] sm:$0xff] }
 0x1a8   : > { %9471 = vmatmul.mubr.msk.f32.vlgmr.msra.gmra.mrb[0].mxu0 %vm204_vm1, %v10904_v44  ;;  %v2622_v44 = vld [vmem:[#allocation2 + $0x198] sm:$0xff] }
 0x1a9   : > { %9519 = vmatpush3.msk.msra.mxu0 %vm483_vm0, %v3013_v56  ;;  %9473 = vmatprep.mubr.msk.f32.mxu0 %vm204_vm1, %v10906_v45  ;;  %v2623_v45 = vld [vmem:[#allocation2 + $0x1a0] sm:$0xff]  ;;  %v3008_v56 = vld [vmem:[#allocation2 + $0x171] sm:$0xff] }
 0x1aa   : > { %9568 = vmatprep.subr.msk.mxu0 %vm483_vm0, %v3402_v58 }
 0x1ac   : > { %9474 = vmatmul.mubr.msk.f32.gmra.mrb[2].mxu0 %vm204_vm1, %v10912_v29  ;;  %v2981_v29 = vld [vmem:[#allocation2 + $0x31] sm:$0xff] }
 0x1ad   : > { %9476 = vmatprep.mubr.msk.f32.mxu0 %vm204_vm1, %v10914_v46  ;;  %v2982_v46 = vld [vmem:[#allocation2 + $0x39] sm:$0xff] }
 0x1b0   : > { %9477 = vmatmul.mubr.msk.f32.gmra.mrb[4].mxu0 %vm204_vm1, %v10920_v48  ;;  %v2983_v48 = vld [vmem:[#allocation2 + $0x49] sm:$0xff] }
 0x1b1   : > { %9479 = vmatprep.mubr.msk.f32.mxu0 %vm204_vm1, %v10922_v52  ;;  %v2984_v52 = vld [vmem:[#allocation2 + $0x51] sm:$0xff] }
 0x1b4   : > { %9480 = vmatmul.mubr.msk.f32.gmra.mrb[6].mxu0 %vm204_vm1, %v10928_v54  ;;  %v2985_v54 = vld [vmem:[#allocation2 + $0x61] sm:$0xff] }
 0x1b5   : > { %9482 = vmatprep.mubr.msk.f32.mxu0 %vm204_vm1, %v10930_v55  ;;  %v2986_v55 = vld [vmem:[#allocation2 + $0x69] sm:$0xff] }
 0x1b8   : > { %9483 = vmatmul.mubr.msk.f32.gmra.mrb[8].mxu0 %vm204_vm1, %v10936_v57  ;;  %v2987_v57 = vld [vmem:[#allocation2 + $0x79] sm:$0xff] }
 0x1b9   : > { %9485 = vmatprep.mubr.msk.f32.mxu0 %vm204_vm1, %v10938_v59  ;;  %v2988_v59 = vld [vmem:[#allocation2 + $0x81] sm:$0xff] }
 0x1bc   : > { %9486 = vmatmul.mubr.msk.f32.gmra.mrb[10].mxu0 %vm204_vm1, %v10944_v60  ;;  %v2989_v60 = vld [vmem:[#allocation2 + $0x91] sm:$0xff] }
 0x1bd   : > { %9488 = vmatprep.mubr.msk.f32.mxu0 %vm204_vm1, %v10946_v61  ;;  %v2990_v61 = vld [vmem:[#allocation2 + $0x99] sm:$0xff] }
 0x1c0   : > { %9489 = vmatmul.mubr.msk.f32.gmra.mrb[12].mxu0 %vm204_vm1, %v10952_v63  ;;  %v2991_v63 = vld [vmem:[#allocation2 + $0xa9] sm:$0xff] }
 0x1c1   : > { %9491 = vmatprep.mubr.msk.f32.mxu0 %vm204_vm1, %v10954_v1  ;;  %v2992_v1 = vld [vmem:[#allocation2 + $0xb1] sm:$0xff] }
 0x1c4   : > { %9492 = vmatmul.mubr.msk.f32.gmra.mrb[14].mxu0 %vm204_vm1, %v10960_v2  ;;  %v2993_v2 = vld [vmem:[#allocation2 + $0xc1] sm:$0xff] }
 0x1c5   : > { %9494 = vmatprep.mubr.msk.f32.mxu0 %vm204_vm1, %v10962_v3  ;;  %v2994_v3 = vld [vmem:[#allocation2 + $0xc9] sm:$0xff] }
 0x1c8   : > { %9495 = vmatmul.mubr.msk.f32.gmra.mrb[16].mxu0 %vm204_vm1, %v10968_v4  ;;  %v2995_v4 = vld [vmem:[#allocation2 + $0xd9] sm:$0xff] }
 0x1c9   : > { %9497 = vmatprep.mubr.msk.f32.mxu0 %vm204_vm1, %v10970_v6  ;;  %v2996_v6 = vld [vmem:[#allocation2 + $0xe1] sm:$0xff] }
 0x1cc   : > { %9498 = vmatmul.mubr.msk.f32.gmra.mrb[18].mxu0 %vm204_vm1, %v10976_v8  ;;  %v2997_v8 = vld [vmem:[#allocation2 + $0xf1] sm:$0xff] }
 0x1cd   : > { %9500 = vmatprep.mubr.msk.f32.mxu0 %vm204_vm1, %v10978_v9  ;;  %v2998_v9 = vld [vmem:[#allocation2 + $0xf9] sm:$0xff] }
 0x1d0   : > { %9501 = vmatmul.mubr.msk.f32.gmra.mrb[20].mxu0 %vm204_vm1, %v10986_v13  ;;  %v2999_v13 = vld [vmem:[#allocation2 + $0x109] sm:$0xff] }
 0x1d1   : > { %9503 = vmatprep.mubr.msk.f32.mxu0 %vm204_vm1, %v10988_v16  ;;  %v3000_v16 = vld [vmem:[#allocation2 + $0x111] sm:$0xff] }
 0x1d4   : > { %9504 = vmatmul.mubr.msk.f32.gmra.mrb[22].mxu0 %vm204_vm1, %v10994_v19  ;;  %v3001_v19 = vld [vmem:[#allocation2 + $0x121] sm:$0xff] }
 0x1d5   : > { %9506 = vmatprep.mubr.msk.f32.mxu0 %vm204_vm1, %v10996_v22  ;;  %v3002_v22 = vld [vmem:[#allocation2 + $0x129] sm:$0xff] }
 0x1d8   : > { %9507 = vmatmul.mubr.msk.f32.gmra.mrb[24].mxu0 %vm204_vm1, %v11005_v35  ;;  %v3003_v35 = vld [vmem:[#allocation2 + $0x139] sm:$0xff] }
 0x1d9   : > { %9509 = vmatprep.mubr.msk.f32.mxu0 %vm204_vm1, %v11007_v37  ;;  %v3004_v37 = vld [vmem:[#allocation2 + $0x141] sm:$0xff] }
 0x1dc   : > { %9510 = vmatmul.mubr.msk.f32.gmra.mrb[26].mxu0 %vm204_vm1, %v11013_v38  ;;  %v3005_v38 = vld [vmem:[#allocation2 + $0x151] sm:$0xff] }
 0x1dd   : > { %9512 = vmatprep.mubr.msk.f32.mxu0 %vm204_vm1, %v11213_v40  ;;  %v3006_v40 = vld [vmem:[#allocation2 + $0x159] sm:$0xff] }
 0x1e0   : > { %9513 = vmatmul.mubr.msk.f32.gmra.mrb[28].mxu0 %vm204_vm1, %v11219_v42  ;;  %v3007_v42 = vld [vmem:[#allocation2 + $0x169] sm:$0xff] }
 0x1e1   : > { %9515 = vmatprep.mubr.msk.f32.mxu0 %vm204_vm1, %v2622_v44 }
 0x1e4   : > { %9516 = vmatmul.mubr.msk.f32.gmra.mrb[30].mxu0 %vm204_vm1, %v2623_v45 }
 0x1e5   : > { %9520 = vmatprep.mubr.msk.f32.mxu0 %vm204_vm1, %v2981_v29 }
 0x1e8   : > { %9521 = vmatmul.mubr.msk.f32.vlgmr.msra.gmra.mrb[0].mxu0 %vm204_vm1, %v2982_v46 }
 0x1e9   : > { %9569 = vmatpush3.msk.msra.mxu0 %vm483_vm0, %v3402_v58  ;;  %9523 = vmatprep.mubr.msk.f32.mxu0 %vm204_vm1, %v2983_v48  ;;  %v3011_v58 = vld [vmem:[#allocation2 + $0x199] sm:$0xff] }
 0x1ec   : > { %9524 = vmatmul.mubr.msk.f32.gmra.mrb[2].mxu0 %vm204_vm1, %v2984_v52 }
 0x1ed   : > { %9526 = vmatprep.mubr.msk.f32.mxu0 %vm204_vm1, %v2985_v54 }
 0x1f0   : > { %9527 = vmatmul.mubr.msk.f32.gmra.mrb[4].mxu0 %vm204_vm1, %v2986_v55 }
 0x1f1   : > { %9529 = vmatprep.mubr.msk.f32.mxu0 %vm204_vm1, %v2987_v57 }
 0x1f4   : > { %9530 = vmatmul.mubr.msk.f32.gmra.mrb[6].mxu0 %vm204_vm1, %v2988_v59 }
 0x1f5   : > { %9532 = vmatprep.mubr.msk.f32.mxu0 %vm204_vm1, %v2989_v60 }
 0x1f8   : > { %9533 = vmatmul.mubr.msk.f32.gmra.mrb[8].mxu0 %vm204_vm1, %v2990_v61 }
 0x1f9   : > { %9535 = vmatprep.mubr.msk.f32.mxu0 %vm204_vm1, %v2991_v63 }
 0x1fc   : > { %9536 = vmatmul.mubr.msk.f32.gmra.mrb[10].mxu0 %vm204_vm1, %v2992_v1 }
 0x1fd   : > { %9538 = vmatprep.mubr.msk.f32.mxu0 %vm204_vm1, %v2993_v2 }
 0x200   : > { %9539 = vmatmul.mubr.msk.f32.gmra.mrb[12].mxu0 %vm204_vm1, %v2994_v3 }
 0x201   : > { %9541 = vmatprep.mubr.msk.f32.mxu0 %vm204_vm1, %v2995_v4 }
 0x204   : > { %9542 = vmatmul.mubr.msk.f32.gmra.mrb[14].mxu0 %vm204_vm1, %v2996_v6 }
 0x205   : > { %9544 = vmatprep.mubr.msk.f32.mxu0 %vm204_vm1, %v2997_v8 }
 0x208   : > { %9545 = vmatmul.mubr.msk.f32.gmra.mrb[16].mxu0 %vm204_vm1, %v2998_v9 }
 0x209   : > { %9547 = vmatprep.mubr.msk.f32.mxu0 %vm204_vm1, %v2999_v13 }
 0x20c   : > { %9548 = vmatmul.mubr.msk.f32.gmra.mrb[18].mxu0 %vm204_vm1, %v3000_v16 }
 0x20d   : > { %9550 = vmatprep.mubr.msk.f32.mxu0 %vm204_vm1, %v3001_v19 }
 0x210   : > { %9551 = vmatmul.mubr.msk.f32.gmra.mrb[20].mxu0 %vm204_vm1, %v3002_v22 }
 0x211   : > { %9553 = vmatprep.mubr.msk.f32.mxu0 %vm204_vm1, %v3003_v35 }
 0x214   : > { %9554 = vmatmul.mubr.msk.f32.gmra.mrb[22].mxu0 %vm204_vm1, %v3004_v37 }
 0x215   : > { %9556 = vmatprep.mubr.msk.f32.mxu0 %vm204_vm1, %v3005_v38 }
 0x218   : > { %9557 = vmatmul.mubr.msk.f32.gmra.mrb[24].mxu0 %vm204_vm1, %v3006_v40 }
 0x219   : > { %9559 = vmatprep.mubr.msk.f32.mxu0 %vm204_vm1, %v3007_v42 }
 0x21c   : > { %9560 = vmatmul.mubr.msk.f32.gmra.mrb[26].mxu0 %vm204_vm1, %v3008_v56 }
 0x21d   : > { %9562 = vmatprep.mubr.msk.f32.mxu0 %vm204_vm1, %v11287_v39 }
 0x220   : > { %9563 = vmatmul.mubr.msk.f32.gmra.mrb[28].mxu0 %vm204_vm1, %v11293_v51 }
 0x221   : > { %9565 = vmatprep.mubr.msk.f32.mxu0 %vm204_vm1, %v3011_v58 }
 0x224   : > { %9566 = vmatmul.mubr.msk.f32.gmra.mrb[30].mxu0 %vm204_vm1, %v3012_v43 }
 0x225   : > { %9570 = vmatprep.mubr.msk.f32.mxu0 %vm204_vm1, %v13374_v62 }
 0x228   : > { %9571 = vmatmul.mubr.msk.f32.vlgmr.msra.gmra.mrb[0].mxu0 %vm204_vm1, %v13375_v0 }
 0x229   : > { %9573 = vmatprep.mubr.msk.f32.mxu0 %vm204_vm1, %v13376_v5 }
 0x22c   : > { %9574 = vmatmul.mubr.msk.f32.gmra.mrb[2].mxu0 %vm204_vm1, %v13377_v7 }
 0x22d   : > { %9576 = vmatprep.mubr.msk.f32.mxu0 %vm204_vm1, %v13378_v11 }
 0x230   : > { %9577 = vmatmul.mubr.msk.f32.gmra.mrb[4].mxu0 %vm204_vm1, %v13379_v12 }
 0x231   : > { %9579 = vmatprep.mubr.msk.f32.mxu0 %vm204_vm1, %v13380_v14 }
 0x234   : > { %9580 = vmatmul.mubr.msk.f32.gmra.mrb[6].mxu0 %vm204_vm1, %v13381_v15 }
 0x235   : > { %9582 = vmatprep.mubr.msk.f32.mxu0 %vm204_vm1, %v13382_v17 }
 0x238   : > { %9583 = vmatmul.mubr.msk.f32.gmra.mrb[8].mxu0 %vm204_vm1, %v13383_v18 }
 0x239   : > { %9585 = vmatprep.mubr.msk.f32.mxu0 %vm204_vm1, %v13384_v20 }
 0x23c   : > { %9586 = vmatmul.mubr.msk.f32.gmra.mrb[10].mxu0 %vm204_vm1, %v13385_v21 }
 0x23d   : > { %9588 = vmatprep.mubr.msk.f32.mxu0 %vm204_vm1, %v13386_v23 }
 0x240   : > { %9589 = vmatmul.mubr.msk.f32.gmra.mrb[12].mxu0 %vm204_vm1, %v13387_v24 }
 0x241   : > { %9591 = vmatprep.mubr.msk.f32.mxu0 %vm204_vm1, %v13388_v30 }
 0x244   : > { %9592 = vmatmul.mubr.msk.f32.gmra.mrb[14].mxu0 %vm204_vm1, %v13389_v31 }
 0x245   : > { %9594 = vmatprep.mubr.msk.f32.mxu0 %vm204_vm1, %v13390_v33 }
 0x248   : > { %9595 = vmatmul.mubr.msk.f32.gmra.mrb[16].mxu0 %vm204_vm1, %v13391_v34 }
 0x249   : > { %9597 = vmatprep.mubr.msk.f32.mxu0 %vm204_vm1, %v13392_v36 }
 0x24c   : > { %9598 = vmatmul.mubr.msk.f32.gmra.mrb[18].mxu0 %vm204_vm1, %v13393_v50 }
 0x24d   : > { %9600 = vmatprep.mubr.msk.f32.mxu0 %vm204_vm1, %v13394_v26 }
 0x250   : > { %9601 = vmatmul.mubr.msk.f32.gmra.mrb[20].mxu0 %vm204_vm1, %v11120_v32  ;;  %v3400_v32 = vld [vmem:[#allocation2 + $0x19a] sm:$0xff] }
 0x251   : > { %9603 = vmatprep.mubr.msk.f32.mxu0 %vm204_vm1, %v13395_v27 }
 0x254   : > { %9604 = vmatmul.mubr.msk.f32.gmra.mrb[22].mxu0 %vm204_vm1, %v11128_v49  ;;  %v3401_v49 = vld [vmem:[#allocation2 + $0x1a2] sm:$0xff] }
 0x255   : > { %9606 = vmatprep.mubr.msk.f32.mxu0 %vm204_vm1, %v13396_v28 }
 0x258   : > { %9607 = vmatmul.mubr.msk.f32.gmra.mrb[24].mxu0 %vm204_vm1, %v11136_v10 }
 0x259   : > { %9609 = vmatprep.mubr.msk.f32.mxu0 %vm204_vm1, %v11138_v25 }
 0x25c   : > { %9610 = vmatmul.mubr.msk.f32.gmra.mrb[26].mxu0 %vm204_vm1, %v11144_v41 }
 0x25d   : > { %9612 = vmatprep.mubr.msk.f32.mxu0 %vm204_vm1, %v11360_v47 }
 0x260   : > { %9613 = vmatmul.mubr.msk.f32.gmra.mrb[28].mxu0 %vm204_vm1, %v11366_v53 }
 0x261   : > { %9615 = vmatprep.mubr.msk.f32.mxu0 %vm204_vm1, %v3400_v32 }
 0x264   : > { %9616 = vmatmul.mubr.msk.f32.gmra.mrb[30].mxu0 %vm204_vm1, %v3401_v49 }
 0x2fb   : > { %v11535_v39 = vpop.f32.mrb[0].mxu0 }
 0x2fc   : > { %v3760_v10 = vsel %vm204_vm1, %v11535_v39, 0.0  ;;  %v11539_v25 = vpop.f32.mrb[1].mxu0 }
 0x2fd   : > { %v3759_v41 = vsel %vm204_vm1, %v11539_v25, 0.0 }
 0x2fe   : > { %v3761_v51 = vadd.f32 %v3760_v10, %v3759_v41 }
 0x2ff   : > { %v11543_v62 = vpop.f32.mrb[2].mxu0 }
 0x300   : > { %v11545_v0 = vpop.f32.mrb[3].mxu0  ;;  %v3764_v11 = vsel %vm204_vm1, %v11543_v62, 0.0 }
 0x301   : > { %v3762_v5 = vsel %vm204_vm1, %v11545_v0, 0.0 }
 0x302   : > { %v3763_v7 = vadd.f32 %v3762_v5, %v3761_v51 }
 0x303   : > { %v11551_v12 = vpop.f32.mrb[4].mxu0 }
 0x304   : > { %v11553_v14 = vpop.f32.mrb[5].mxu0  ;;  %v3765_v15 = vadd.f32 %v3764_v11, %v3763_v7  ;;  %v3768_v20 = vsel %vm204_vm1, %v11551_v12, 0.0 }
 0x305   : > { %v3766_v17 = vsel %vm204_vm1, %v11553_v14, 0.0 }
 0x306   : > { %v3767_v18 = vadd.f32 %v3766_v17, %v3765_v15 }
 0x307   : > { %v11559_v21 = vpop.f32.mrb[6].mxu0 }
 0x308   : > { %v11561_v23 = vpop.f32.mrb[7].mxu0  ;;  %v3769_v24 = vadd.f32 %v3768_v20, %v3767_v18  ;;  %v3772_v33 = vsel %vm204_vm1, %v11559_v21, 0.0 }
 0x309   : > { %v3770_v30 = vsel %vm204_vm1, %v11561_v23, 0.0 }
 0x30a   : > { %v3771_v31 = vadd.f32 %v3770_v30, %v3769_v24 }
 0x30b   : > { %v11567_v34 = vpop.f32.mrb[8].mxu0 }
 0x30c   : > { %v11569_v36 = vpop.f32.mrb[9].mxu0  ;;  %v3773_v50 = vadd.f32 %v3772_v33, %v3771_v31  ;;  %v3776_v28 = vsel %vm204_vm1, %v11567_v34, 0.0 }
 0x30d   : > { %v3774_v26 = vsel %vm204_vm1, %v11569_v36, 0.0 }
 0x30e   : > { %v3775_v27 = vadd.f32 %v3774_v26, %v3773_v50 }
 0x30f   : > { %v11575_v47 = vpop.f32.mrb[10].mxu0 }
 0x310   : > { %v11577_v53 = vpop.f32.mrb[11].mxu0  ;;  %v3777_v44 = vadd.f32 %v3776_v28, %v3775_v27  ;;  %v3780_v46 = vsel %vm204_vm1, %v11575_v47, 0.0 }
 0x311   : > { %v3778_v45 = vsel %vm204_vm1, %v11577_v53, 0.0 }
 0x312   : > { %v3779_v29 = vadd.f32 %v3778_v45, %v3777_v44 }
 0x313   : > { %v11583_v48 = vpop.f32.mrb[12].mxu0 }
 0x314   : > { %v11585_v52 = vpop.f32.mrb[13].mxu0  ;;  %v3781_v54 = vadd.f32 %v3780_v46, %v3779_v29  ;;  %v3784_v59 = vsel %vm204_vm1, %v11583_v48, 0.0 }
 0x315   : > { %v3782_v55 = vsel %vm204_vm1, %v11585_v52, 0.0 }
 0x316   : > { %v3783_v57 = vadd.f32 %v3782_v55, %v3781_v54 }
 0x317   : > { %v11591_v60 = vpop.f32.mrb[14].mxu0 }
 0x318   : > { %v11593_v61 = vpop.f32.mrb[15].mxu0  ;;  %v3785_v63 = vadd.f32 %v3784_v59, %v3783_v57  ;;  %v3788_v3 = vsel %vm204_vm1, %v11591_v60, 0.0 }
 0x319   : > { %v3786_v1 = vsel %vm204_vm1, %v11593_v61, 0.0 }
 0x31a   : > { %v3787_v2 = vadd.f32 %v3786_v1, %v3785_v63 }
 0x31b   : > { %v11599_v4 = vpop.f32.mrb[16].mxu0 }
 0x31c   : > { %v11601_v6 = vpop.f32.mrb[17].mxu0  ;;  %v3789_v8 = vadd.f32 %v3788_v3, %v3787_v2  ;;  %v3792_v16 = vsel %vm204_vm1, %v11599_v4, 0.0 }
 0x31d   : > { %v3790_v9 = vsel %vm204_vm1, %v11601_v6, 0.0 }
 0x31e   : > { %v3791_v13 = vadd.f32 %v3790_v9, %v3789_v8 }
 0x31f   : > { %v11607_v19 = vpop.f32.mrb[18].mxu0 }
 0x320   : > { %v11609_v22 = vpop.f32.mrb[19].mxu0  ;;  %v3793_v35 = vadd.f32 %v3792_v16, %v3791_v13  ;;  %v3796_v40 = vsel %vm204_vm1, %v11607_v19, 0.0 }
 0x321   : > { %v3794_v37 = vsel %vm204_vm1, %v11609_v22, 0.0 }
 0x322   : > { %v3795_v38 = vadd.f32 %v3794_v37, %v3793_v35  ;;  %v4206_v37 = vld [vmem:[%s13236_s2 + $0x4] sm:$0xf] }
 0x323   : > { %v11615_v42 = vpop.f32.mrb[20].mxu0  ;;  %9618 = vmatprep.subr.msk.mxu1 %vm483_vm0, %v4206_v37 }
 0x324   : > { %v11617_v56 = vpop.f32.mrb[21].mxu0  ;;  %v3797_v58 = vadd.f32 %v3796_v40, %v3795_v38  ;;  %v3800_v49 = vsel %vm204_vm1, %v11615_v42, 0.0  ;;  %9619 = vmatpush3.msk.msra.mxu1 %vm483_vm0, %v4206_v37 }
 0x325   : > { %v3798_v43 = vsel %vm204_vm1, %v11617_v56, 0.0 }
 0x326   : > { %v3799_v32 = vadd.f32 %v3798_v43, %v3797_v58 }
 0x327   : > { %v11623_v10 = vpop.f32.mrb[22].mxu0 }
 0x328   : > { %v11625_v41 = vpop.f32.mrb[23].mxu0  ;;  %v3801_v51 = vadd.f32 %v3800_v49, %v3799_v32  ;;  %v3804_v11 = vsel %vm204_vm1, %v11623_v10, 0.0 }
 0x329   : > { %v3802_v5 = vsel %vm204_vm1, %v11625_v41, 0.0 }
 0x32a   : > { %v3803_v7 = vadd.f32 %v3802_v5, %v3801_v51 }
 0x32b   : > { %v9608_v15 = vpop.f32.mrb[24].mxu0 }
 0x32c   : > { %v3688_v17 = vpop.f32.mrb[25].mxu0  ;;  %v3805_v18 = vadd.f32 %v3804_v11, %v3803_v7  ;;  %v3808_v30 = vsel %vm204_vm1, %v9608_v15, 0.0 }
 0x32d   : > { %v3806_v20 = vsel %vm204_vm1, %v3688_v17, 0.0 }
 0x32e   : > { %v3807_v24 = vadd.f32 %v3806_v20, %v3805_v18 }
 0x32f   : > { %v9611_v31 = vpop.f32.mrb[26].mxu0 }
 0x330   : > { %v3698_v33 = vpop.f32.mrb[27].mxu0  ;;  %v3809_v50 = vadd.f32 %v3808_v30, %v3807_v24  ;;  %v3812_v28 = vsel %vm204_vm1, %v9611_v31, 0.0 }
 0x331   : > { %v3810_v26 = vsel %vm204_vm1, %v3698_v33, 0.0 }
 0x332   : > { %v3811_v27 = vadd.f32 %v3810_v26, %v3809_v50 }
 0x333   : > { %v9614_v44 = vpop.f32.mrb[28].mxu0 }
 0x334   : > { %v3708_v45 = vpop.f32.mrb[29].mxu0  ;;  %v3813_v29 = vadd.f32 %v3812_v28, %v3811_v27  ;;  %v3816_v55 = vsel %vm204_vm1, %v9614_v44, 0.0 }
 0x335   : > { %v3814_v46 = vsel %vm204_vm1, %v3708_v45, 0.0 }
 0x336   : > { %v3815_v54 = vadd.f32 %v3814_v46, %v3813_v29 }
 0x337   : > { %v9617_v57 = vpop.f32.mrb[30].mxu0 }
 0x338   : > { %v3718_v59 = vpop.f32.mrb[31].mxu0  ;;  %v3817_v63 = vadd.f32 %v3816_v55, %v3815_v54  ;;  %v3820_v3 = vsel %vm204_vm1, %v9617_v57, 0.0 }
 0x339   : > { %v3818_v1 = vsel %vm204_vm1, %v3718_v59, 0.0 }
 0x33a   : > { %v3819_v2 = vadd.f32 %v3818_v1, %v3817_v63 }
 0x33c   : > { %v3821_v8 = vadd.f32 %v3820_v3, %v3819_v2 }
 0x33e   : > { %v3822_v9 = vrot.slane %v3821_v8, 4 }
 0x340   : > { %v3823_v13 = vadd.f32 %v3822_v9, %v3821_v8 }
 0x342   : > { %v3824_v16 = vrot.slane %v3823_v13, 2 }
 0x344   : > { %v3825_v35 = vadd.f32 %v3824_v16, %v3823_v13 }
 0x346   : > { %v3826_v38 = vrot.slane %v3825_v35, 1 }
 0x348   : > { %v3827_v40 = vadd.f32 %v3826_v38, %v3825_v35 }
 0x34a   : > { %v3828_v58 = vmul.f32 0.00390625, %v3827_v40 }
 0x34c   : > { %v11645_v43 = vsub.f32 %v11539_v25, %v3828_v58  ;;  %v11648_v32 = vsub.f32 %v11535_v39, %v3828_v58  ;;  %v11651_v49 = vsub.f32 %v11545_v0, %v3828_v58  ;;  %v11654_v51 = vsub.f32 %v11543_v62, %v3828_v58 }
 0x34d   : > { %v11657_v5 = vsub.f32 %v11553_v14, %v3828_v58  ;;  %v11660_v7 = vsub.f32 %v11551_v12, %v3828_v58  ;;  %v11663_v11 = vsub.f32 %v11561_v23, %v3828_v58  ;;  %v11666_v25 = vsub.f32 %v11559_v21, %v3828_v58 }
 0x34e   : > { %v11669_v39 = vsub.f32 %v11569_v36, %v3828_v58  ;;  %v11672_v0 = vsub.f32 %v11567_v34, %v3828_v58  ;;  %v11675_v62 = vsub.f32 %v11577_v53, %v3828_v58  ;;  %v11678_v14 = vsub.f32 %v11575_v47, %v3828_v58 }
 0x34f   : > { %v11681_v12 = vsub.f32 %v11585_v52, %v3828_v58  ;;  %v11684_v23 = vsub.f32 %v11583_v48, %v3828_v58  ;;  %v11687_v21 = vsub.f32 %v11593_v61, %v3828_v58  ;;  %v11690_v36 = vsub.f32 %v11591_v60, %v3828_v58  ;;  %v11707_v48 = vld [vmem:[%s13236_s2] sm:$0xf] }
 0x350   : > { %v11693_v34 = vsub.f32 %v11601_v6, %v3828_v58  ;;  %v11696_v53 = vsub.f32 %v11599_v4, %v3828_v58  ;;  %v11699_v47 = vsub.f32 %v11609_v22, %v3828_v58  ;;  %v11702_v52 = vsub.f32 %v11607_v19, %v3828_v58  ;;  %9668 = vmatprep.subr.msk.mxu1 %vm483_vm0, %v11707_v48 }
 0x351   : > { %v11710_v60 = vsub.f32 %v11617_v56, %v3828_v58  ;;  %v11713_v61 = vsub.f32 %v11615_v42, %v3828_v58  ;;  %v11716_v4 = vsub.f32 %v11625_v41, %v3828_v58  ;;  %v11719_v6 = vsub.f32 %v11623_v10, %v3828_v58 }
 0x352   : > { %v11723_v19 = vsub.f32 %v3688_v17, %v3828_v58  ;;  %v11725_v22 = vsub.f32 %v9608_v15, %v3828_v58  ;;  %v11727_v18 = vsub.f32 %v3698_v33, %v3828_v58  ;;  %v11729_v56 = vsub.f32 %v9611_v31, %v3828_v58 }
 0x353   : > { %v11731_v20 = vsub.f32 %v3708_v45, %v3828_v58  ;;  %v11733_v42 = vsub.f32 %v9614_v44, %v3828_v58  ;;  %v11735_v41 = vsub.f32 %v3718_v59, %v3828_v58  ;;  %v11737_v24 = vsub.f32 %v9617_v57, %v3828_v58 }
 0x354   : > { %v3861_v10 = vmul.f32 %v11645_v43, %v11645_v43  ;;  %v3862_v17 = vmul.f32 %v11648_v32, %v11648_v32  ;;  %v3863_v15 = vmul.f32 %v11651_v49, %v11651_v49  ;;  %v3864_v30 = vmul.f32 %v11654_v51, %v11654_v51 }
 0x355   : > { %v3865_v26 = vmul.f32 %v11657_v5, %v11657_v5  ;;  %v3866_v44 = vmul.f32 %v11660_v7, %v11660_v7  ;;  %v3867_v46 = vmul.f32 %v11663_v11, %v11663_v11  ;;  %v3868_v57 = vmul.f32 %v11666_v25, %v11666_v25 }
 0x356   : > { %v3893_v31 = vsel %vm204_vm1, %v3861_v10, 0.0  ;;  %v3894_v33 = vsel %vm204_vm1, %v3862_v17, 0.0  ;;  %v3896_v27 = vsel %vm204_vm1, %v3863_v15, 0.0  ;;  %v3898_v45 = vsel %vm204_vm1, %v3864_v30, 0.0 }
 0x357   : > { %v3895_v50 = vadd.f32 %v3894_v33, %v3893_v31  ;;  %v3900_v54 = vsel %vm204_vm1, %v3865_v26, 0.0  ;;  %v3902_v59 = vsel %vm204_vm1, %v3866_v44, 0.0  ;;  %v3869_v1 = vmul.f32 %v11669_v39, %v11669_v39 }
 0x358   : > { %v3904_v2 = vsel %vm204_vm1, %v3867_v46, 0.0  ;;  %v3870_v8 = vmul.f32 %v11672_v0, %v11672_v0  ;;  %v3906_v9 = vsel %vm204_vm1, %v3868_v57, 0.0  ;;  %v3871_v16 = vmul.f32 %v11675_v62, %v11675_v62 }
 0x359   : > { %v3897_v28 = vadd.f32 %v3896_v27, %v3895_v50  ;;  %v3908_v35 = vsel %vm204_vm1, %v3869_v1, 0.0  ;;  %v3872_v38 = vmul.f32 %v11678_v14, %v11678_v14  ;;  %v3873_v10 = vmul.f32 %v11681_v12, %v11681_v12 }
 0x35a   : > { %v3910_v40 = vsel %vm204_vm1, %v3870_v8, 0.0  ;;  %v3912_v17 = vsel %vm204_vm1, %v3871_v16, 0.0  ;;  %v3874_v30 = vmul.f32 %v11684_v23, %v11684_v23  ;;  %v3875_v50 = vmul.f32 %v11687_v21, %v11687_v21 }
 0x35b   : > { %v3899_v29 = vadd.f32 %v3898_v45, %v3897_v28  ;;  %v3914_v31 = vsel %vm204_vm1, %v3872_v38, 0.0  ;;  %v3916_v26 = vsel %vm204_vm1, %v3873_v10, 0.0  ;;  %v3876_v28 = vmul.f32 %v11690_v36, %v11690_v36 }
 0x35c   : > { %v3918_v44 = vsel %vm204_vm1, %v3874_v30, 0.0  ;;  %v3920_v46 = vsel %vm204_vm1, %v3875_v50, 0.0 }
 0x35d   : > { %v3901_v55 = vadd.f32 %v3900_v54, %v3899_v29  ;;  %v3877_v29 = vmul.f32 %v11693_v34, %v11693_v34  ;;  %v3922_v57 = vsel %vm204_vm1, %v3876_v28, 0.0 }
 0x35f   : > { %v3903_v63 = vadd.f32 %v3902_v59, %v3901_v55  ;;  %v3878_v55 = vmul.f32 %v11696_v53, %v11696_v53  ;;  %v3924_v1 = vsel %vm204_vm1, %v3877_v29, 0.0 }
 0x361   : > { %v3905_v3 = vadd.f32 %v3904_v2, %v3903_v63  ;;  %v3879_v63 = vmul.f32 %v11699_v47, %v11699_v47  ;;  %v3926_v8 = vsel %vm204_vm1, %v3878_v55, 0.0 }
 0x363   : > { %v3907_v13 = vadd.f32 %v3906_v9, %v3905_v3  ;;  %v3880_v3 = vmul.f32 %v11702_v52, %v11702_v52  ;;  %v3928_v16 = vsel %vm204_vm1, %v3879_v63, 0.0 }
 0x365   : > { %v3909_v37 = vadd.f32 %v3908_v35, %v3907_v13  ;;  %v3881_v13 = vmul.f32 %v11710_v60, %v11710_v60  ;;  %v3930_v38 = vsel %vm204_vm1, %v3880_v3, 0.0 }
 0x367   : > { %v3911_v58 = vadd.f32 %v3910_v40, %v3909_v37  ;;  %v3882_v37 = vmul.f32 %v11713_v61, %v11713_v61  ;;  %v3932_v10 = vsel %vm204_vm1, %v3881_v13, 0.0 }
 0x369   : > { %v3913_v15 = vadd.f32 %v3912_v17, %v3911_v58  ;;  %v3883_v58 = vmul.f32 %v11716_v4, %v11716_v4  ;;  %v3934_v30 = vsel %vm204_vm1, %v3882_v37, 0.0 }
 0x36b   : > { %v3915_v33 = vadd.f32 %v3914_v31, %v3913_v15  ;;  %v3884_v15 = vmul.f32 %v11719_v6, %v11719_v6  ;;  %v3936_v50 = vsel %vm204_vm1, %v3883_v58, 0.0 }
 0x36d   : > { %v3917_v27 = vadd.f32 %v3916_v26, %v3915_v33  ;;  %v3885_v33 = vmul.f32 %v11723_v19, %v11723_v19  ;;  %v3938_v28 = vsel %vm204_vm1, %v3884_v15, 0.0 }
 0x36f   : > { %v3919_v45 = vadd.f32 %v3918_v44, %v3917_v27  ;;  %v3886_v27 = vmul.f32 %v11725_v22, %v11725_v22  ;;  %v3940_v29 = vsel %vm204_vm1, %v3885_v33, 0.0 }
 0x371   : > { %v3921_v54 = vadd.f32 %v3920_v46, %v3919_v45  ;;  %v3887_v45 = vmul.f32 %v11727_v18, %v11727_v18  ;;  %v3942_v55 = vsel %vm204_vm1, %v3886_v27, 0.0 }
 0x373   : > { %v3923_v59 = vadd.f32 %v3922_v57, %v3921_v54  ;;  %v3888_v54 = vmul.f32 %v11729_v56, %v11729_v56  ;;  %v3944_v63 = vsel %vm204_vm1, %v3887_v45, 0.0 }
 0x375   : > { %v3925_v2 = vadd.f32 %v3924_v1, %v3923_v59  ;;  %v3889_v59 = vmul.f32 %v11731_v20, %v11731_v20  ;;  %v3946_v3 = vsel %vm204_vm1, %v3888_v54, 0.0 }
 0x377   : > { %v3927_v9 = vadd.f32 %v3926_v8, %v3925_v2  ;;  %v3890_v2 = vmul.f32 %v11733_v42, %v11733_v42  ;;  %v3948_v13 = vsel %vm204_vm1, %v3889_v59, 0.0 }
 0x379   : > { %v3929_v35 = vadd.f32 %v3928_v16, %v3927_v9  ;;  %v3891_v9 = vmul.f32 %v11735_v41, %v11735_v41  ;;  %v3950_v37 = vsel %vm204_vm1, %v3890_v2, 0.0 }
 0x37b   : > { %v3931_v40 = vadd.f32 %v3930_v38, %v3929_v35  ;;  %v3892_v35 = vmul.f32 %v11737_v24, %v11737_v24 }
 0x37d   : > { %v3933_v17 = vadd.f32 %v3932_v10, %v3931_v40  ;;  %v3952_v40 = vsel %vm204_vm1, %v3891_v9, 0.0  ;;  %v3954_v10 = vsel %vm204_vm1, %v3892_v35, 0.0 }
 0x37f   : > { %v3935_v31 = vadd.f32 %v3934_v30, %v3933_v17 }
 0x381   : > { %v3937_v26 = vadd.f32 %v3936_v50, %v3935_v31 }
 0x383   : > { %v3939_v44 = vadd.f32 %v3938_v28, %v3937_v26 }
 0x385   : > { %v3941_v46 = vadd.f32 %v3940_v29, %v3939_v44 }
 0x387   : > { %v3943_v57 = vadd.f32 %v3942_v55, %v3941_v46 }
 0x389   : > { %v3945_v1 = vadd.f32 %v3944_v63, %v3943_v57 }
 0x38b   : > { %v3947_v8 = vadd.f32 %v3946_v3, %v3945_v1 }
 0x38d   : > { %v3949_v16 = vadd.f32 %v3948_v13, %v3947_v8 }
 0x38f   : > { %v3951_v38 = vadd.f32 %v3950_v37, %v3949_v16 }
 0x391   : > { %v3953_v58 = vadd.f32 %v3952_v40, %v3951_v38 }
 0x393   : > { %v3955_v17 = vadd.f32 %v3954_v10, %v3953_v58 }
 0x395   : > { %v3956_v15 = vrot.slane %v3955_v17, 4 }
 0x397   : > { %v3957_v30 = vadd.f32 %v3956_v15, %v3955_v17 }
 0x399   : > { %v3958_v31 = vrot.slane %v3957_v30, 2 }
 0x39b   : > { %v3959_v33 = vadd.f32 %v3958_v31, %v3957_v30 }
 0x39d   : > { %v3960_v50 = vrot.slane %v3959_v33, 1 }
 0x39f   : > { %v3961_v26 = vadd.f32 %v3960_v50, %v3959_v33 }
 0x3a1   : > { %v3962_v27 = vmul.f32 0.00390625, %v3961_v26 }
 0x3a3   : > { %v3963_v28 = vadd.f32 1e-05, %v3962_v27 }
 0x3a5   : > { %10588 = vrsqrt.f32 %v3963_v28 }
 0x3af   : > { %v10589_v44 = vpop.eup %10588 }
 0x3b0   : > { %v3995_v45 = vmul.f32 %v10589_v44, %v11735_v41  ;;  %v3965_v29 = vmul.f32 %v10589_v44, %v11645_v43  ;;  %v3966_v46 = vmul.f32 %v10589_v44, %v11648_v32  ;;  %v3967_v54 = vmul.f32 %v10589_v44, %v11651_v49 }
 0x3b1   : > { %v3968_v55 = vmul.f32 %v10589_v44, %v11654_v51  ;;  %v3969_v57 = vmul.f32 %v10589_v44, %v11657_v5  ;;  %v3970_v59 = vmul.f32 %v10589_v44, %v11660_v7  ;;  %v3971_v63 = vmul.f32 %v10589_v44, %v11663_v11 }
 0x3b2   : > { %v4027_v1 = vmax.f32 %v3995_v45, 0.0  ;;  %v3972_v2 = vmul.f32 %v10589_v44, %v11666_v25  ;;  %v3973_v3 = vmul.f32 %v10589_v44, %v11669_v39  ;;  %v3974_v41 = vmul.f32 %v10589_v44, %v11672_v0 }
 0x3b3   : > { %v3975_v43 = vmul.f32 %v10589_v44, %v11675_v62  ;;  %v3976_v32 = vmul.f32 %v10589_v44, %v11678_v14  ;;  %v3977_v49 = vmul.f32 %v10589_v44, %v11681_v12  ;;  %v3978_v51 = vmul.f32 %v10589_v44, %v11684_v23 }
 0x3b4   : > { %v3979_v5 = vmul.f32 %v10589_v44, %v11687_v21  ;;  %v3980_v7 = vmul.f32 %v10589_v44, %v11690_v36  ;;  %v3981_v11 = vmul.f32 %v10589_v44, %v11693_v34  ;;  %v3982_v25 = vmul.f32 %v10589_v44, %v11696_v53  ;;  %4059 = vst.msk [vmem:[#allocation2 + $0x181] sm:$0xff] %vm204_vm1, %v4027_v1 }
 0x3b5   : > { %v3983_v39 = vmul.f32 %v10589_v44, %v11699_v47  ;;  %v11857_v0 = vmul.f32 %v10589_v44, %v11702_v52  ;;  %v11860_v62 = vmul.f32 %v10589_v44, %v11710_v60  ;;  %v11863_v14 = vmul.f32 %v10589_v44, %v11713_v61 }
 0x3b6   : > { %v11866_v12 = vmul.f32 %v10589_v44, %v11716_v4  ;;  %v11869_v23 = vmul.f32 %v10589_v44, %v11719_v6  ;;  %v11872_v21 = vmul.f32 %v10589_v44, %v11723_v19  ;;  %v11875_v36 = vmul.f32 %v10589_v44, %v11725_v22 }
 0x3b7   : > { %v11878_v34 = vmul.f32 %v10589_v44, %v11727_v18  ;;  %v11881_v53 = vmul.f32 %v10589_v44, %v11729_v56  ;;  %v11884_v47 = vmul.f32 %v10589_v44, %v11731_v20  ;;  %v11887_v52 = vmul.f32 %v10589_v44, %v11733_v42 }
 0x3b8   : > { %v11890_v60 = vmul.f32 %v10589_v44, %v11737_v24  ;;  %v3997_v61 = vmax.f32 %v3965_v29, 0.0  ;;  %v3998_v4 = vmax.f32 %v3966_v46, 0.0  ;;  %v3999_v6 = vmax.f32 %v3967_v54, 0.0 }
 0x3b9   : > { %v4000_v19 = vmax.f32 %v3968_v55, 0.0  ;;  %v4001_v22 = vmax.f32 %v3969_v57, 0.0  ;;  %v4002_v8 = vmax.f32 %v3970_v59, 0.0  ;;  %v4003_v18 = vmax.f32 %v3971_v63, 0.0  ;;  %v11950_v63 = vld [vmem:[%s13236_s2 + $0x8] sm:$0xf] }
 0x3ba   : > { %v4004_v9 = vmax.f32 %v3972_v2, 0.0  ;;  %v4005_v13 = vmax.f32 %v3973_v3, 0.0  ;;  %v4006_v56 = vmax.f32 %v3974_v41, 0.0  ;;  %v4007_v16 = vmax.f32 %v3975_v43, 0.0  ;;  %4029 = vst.msk [vmem:[#allocation2 + $0x19] sm:$0xff] %vm204_vm1, %v3997_v61  ;;  %4030 = vst.msk [vmem:[#allocation2 + $0x21] sm:$0xff] %vm204_vm1, %v3998_v4 }
 0x3bb   : > { %4031 = vst.msk [vmem:[#allocation2 + $0x31] sm:$0xff] %vm204_vm1, %v3999_v6  ;;  %v4008_v20 = vmax.f32 %v3976_v32, 0.0  ;;  %v4009_v42 = vmax.f32 %v3977_v49, 0.0  ;;  %v4010_v24 = vmax.f32 %v3978_v51, 0.0  ;;  %v4011_v35 = vmax.f32 %v3979_v5, 0.0  ;;  %4032 = vst.msk [vmem:[#allocation2 + $0x39] sm:$0xff] %vm204_vm1, %v4000_v19 }
 0x3bc   : > { %4033 = vst.msk [vmem:[#allocation2 + $0x49] sm:$0xff] %vm204_vm1, %v4001_v22  ;;  %4034 = vst.msk [vmem:[#allocation2 + $0x51] sm:$0xff] %vm204_vm1, %v4002_v8  ;;  %v4085_v37 = vld [vmem:[#allocation2 + $0x182] sm:$0x1]  ;;  %v4012_v38 = vmax.f32 %v3980_v7, 0.0  ;;  %v4013_v40 = vmax.f32 %v3981_v11, 0.0 }
 0x3bd   : > { %4035 = vst.msk [vmem:[#allocation2 + $0x61] sm:$0xff] %vm204_vm1, %v4003_v18  ;;  %v4014_v58 = vmax.f32 %v3982_v25, 0.0  ;;  %v4015_v10 = vmax.f32 %v3983_v39, 0.0  ;;  %4036 = vst.msk [vmem:[#allocation2 + $0x69] sm:$0xff] %vm204_vm1, %v4004_v9  ;;  %v4016_v17 = vmax.f32 %v11857_v0, 0.0  ;;  %v4017_v15 = vmax.f32 %v11860_v62, 0.0 }
 0x3be   : > { %4037 = vst.msk [vmem:[#allocation2 + $0x79] sm:$0xff] %vm204_vm1, %v4005_v13  ;;  %4038 = vst.msk [vmem:[#allocation2 + $0x81] sm:$0xff] %vm204_vm1, %v4006_v56  ;;  %v4018_v30 = vmax.f32 %v11863_v14, 0.0  ;;  %v4019_v31 = vmax.f32 %v11866_v12, 0.0  ;;  %v4020_v33 = vmax.f32 %v11869_v23, 0.0  ;;  %v4021_v50 = vmax.f32 %v11872_v21, 0.0 }
 0x3bf   : > { %4039 = vst.msk [vmem:[#allocation2 + $0x91] sm:$0xff] %vm204_vm1, %v4007_v16  ;;  %4040 = vst.msk [vmem:[#allocation2 + $0x99] sm:$0xff] %vm204_vm1, %v4008_v20  ;;  %v4022_v26 = vmax.f32 %v11875_v36, 0.0  ;;  %v4023_v27 = vmax.f32 %v11878_v34, 0.0  ;;  %v4024_v28 = vmax.f32 %v11881_v53, 0.0  ;;  %v4025_v44 = vmax.f32 %v11884_v47, 0.0 }
 0x3c0   : > { %4103 = vst.msk [vmem:[#allocation2 + $0x180] sm:$0x1] %vm266_vm2, %v4085_v37  ;;  %v4026_v45 = vmax.f32 %v11887_v52, 0.0  ;;  %v4028_v29 = vmax.f32 %v11890_v60, 0.0 }
 0x3c1   : > { %4041 = vst.msk [vmem:[#allocation2 + $0xa9] sm:$0xff] %vm204_vm1, %v4009_v42  ;;  %4042 = vst.msk [vmem:[#allocation2 + $0xb1] sm:$0xff] %vm204_vm1, %v4010_v24  ;;  %v11945_v59 = vld [vmem:[#allocation2 + $0x19] sm:$0xff]  ;;  %v4106_v60 = vld [vmem:[#allocation2 + $0x27] sm:$0x1] }
 0x3c2   : > { %4043 = vst.msk [vmem:[#allocation2 + $0xc1] sm:$0xff] %vm204_vm1, %v4011_v35  ;;  %4044 = vst.msk [vmem:[#allocation2 + $0xc9] sm:$0xff] %vm204_vm1, %v4012_v38  ;;  %v11936_v46 = vld [vmem:[#allocation2 + $0x31] sm:$0xff]  ;;  %v11940_v54 = vld [vmem:[#allocation2 + $0x39] sm:$0xff] }
 0x3c3   : > { %4045 = vst.msk [vmem:[#allocation2 + $0xd9] sm:$0xff] %vm204_vm1, %v4013_v40  ;;  %4046 = vst.msk [vmem:[#allocation2 + $0xe1] sm:$0xff] %vm204_vm1, %v4014_v58  ;;  %v4070_v41 = vld [vmem:[#allocation2 + $0x1a] sm:$0x1]  ;;  %v4071_v43 = vld [vmem:[#allocation2 + $0x32] sm:$0x1] }
 0x3c4   : > { %4047 = vst.msk [vmem:[#allocation2 + $0xf1] sm:$0xff] %vm204_vm1, %v4015_v10  ;;  %4048 = vst.msk [vmem:[#allocation2 + $0xf9] sm:$0xff] %vm204_vm1, %v4016_v17  ;;  %v4072_v32 = vld [vmem:[#allocation2 + $0x4a] sm:$0x1]  ;;  %v4073_v49 = vld [vmem:[#allocation2 + $0x62] sm:$0x1] }
 0x3c5   : > { %4049 = vst.msk [vmem:[#allocation2 + $0x109] sm:$0xff] %vm204_vm1, %v4017_v15  ;;  %4050 = vst.msk [vmem:[#allocation2 + $0x111] sm:$0xff] %vm204_vm1, %v4018_v30  ;;  %v4074_v51 = vld [vmem:[#allocation2 + $0x7a] sm:$0x1]  ;;  %v11985_v0 = vld [vmem:[#allocation2 + $0x49] sm:$0xff] }
 0x3c6   : > { %4051 = vst.msk [vmem:[#allocation2 + $0x121] sm:$0xff] %vm204_vm1, %v4019_v31  ;;  %4052 = vst.msk [vmem:[#allocation2 + $0x129] sm:$0xff] %vm204_vm1, %v4020_v33  ;;  %v4075_v5 = vld [vmem:[#allocation2 + $0x92] sm:$0x1]  ;;  %v11997_v36 = vld [vmem:[#allocation2 + $0x61] sm:$0xff] }
 0x3c7   : > { %4053 = vst.msk [vmem:[#allocation2 + $0x139] sm:$0xff] %vm204_vm1, %v4021_v50  ;;  %4054 = vst.msk [vmem:[#allocation2 + $0x141] sm:$0xff] %vm204_vm1, %v4022_v26  ;;  %v11992_v23 = vld [vmem:[#allocation2 + $0x51] sm:$0xff]  ;;  %v12003_v53 = vld [vmem:[#allocation2 + $0x69] sm:$0xff] }
 0x3c8   : > { %4055 = vst.msk [vmem:[#allocation2 + $0x151] sm:$0xff] %vm204_vm1, %v4023_v27  ;;  %4056 = vst.msk [vmem:[#allocation2 + $0x159] sm:$0xff] %vm204_vm1, %v4024_v28  ;;  %v4076_v7 = vld [vmem:[#allocation2 + $0xaa] sm:$0x1]  ;;  %v12007_v52 = vld [vmem:[#allocation2 + $0x79] sm:$0xff] }
 0x3c9   : > { %4057 = vst.msk [vmem:[#allocation2 + $0x169] sm:$0xff] %vm204_vm1, %v4025_v44  ;;  %4058 = vst.msk [vmem:[#allocation2 + $0x171] sm:$0xff] %vm204_vm1, %v4026_v45  ;;  %v4077_v11 = vld [vmem:[#allocation2 + $0xc2] sm:$0x1]  ;;  %v4107_v61 = vld [vmem:[#allocation2 + $0x3f] sm:$0x1] }
 0x3ca   : > { %4060 = vst.msk [vmem:[#allocation2 + $0x189] sm:$0xff] %vm204_vm1, %v4028_v29  ;;  %4063 = vst.msk [vmem:[#allocation2 + $0x1] sm:$0xff] %vm204_vm1, %v11936_v46  ;;  %v4078_v25 = vld [vmem:[#allocation2 + $0xda] sm:$0x1]  ;;  %v4108_v4 = vld [vmem:[#allocation2 + $0x57] sm:$0x1] }
 0x3cb   : > { %4064 = vst.msk [vmem:[#allocation2 + $0x9] sm:$0xff] %vm204_vm1, %v11940_v54  ;;  %v4079_v39 = vld [vmem:[#allocation2 + $0xf2] sm:$0x1]  ;;  %v12014_v6 = vld [vmem:[#allocation2 + $0x81] sm:$0xff]  ;;  %v4109_v19 = vld [vmem:[#allocation2 + $0x6f] sm:$0x1] }
 0x3cc   : > { %4088 = vst.msk [vmem:[#allocation2 + $0x18] sm:$0x1] %vm266_vm2, %v4070_v41  ;;  %4089 = vst.msk [vmem:[#allocation2 + $0x30] sm:$0x1] %vm266_vm2, %v4071_v43  ;;  %v4080_v62 = vld [vmem:[#allocation2 + $0x10a] sm:$0x1] }
 0x3cd   : > { %4090 = vst.msk [vmem:[#allocation2 + $0x48] sm:$0x1] %vm266_vm2, %v4072_v32  ;;  %4091 = vst.msk [vmem:[#allocation2 + $0x60] sm:$0x1] %vm266_vm2, %v4073_v49  ;;  %v4081_v14 = vld [vmem:[#allocation2 + $0x122] sm:$0x1] }
 0x3ce   : > { %4092 = vst.msk [vmem:[#allocation2 + $0x78] sm:$0x1] %vm266_vm2, %v4074_v51  ;;  %4093 = vst.msk [vmem:[#allocation2 + $0x90] sm:$0x1] %vm266_vm2, %v4075_v5  ;;  %v4082_v12 = vld [vmem:[#allocation2 + $0x13a] sm:$0x1] }
 0x3cf   : > { %4094 = vst.msk [vmem:[#allocation2 + $0xa8] sm:$0x1] %vm266_vm2, %v4076_v7  ;;  %4095 = vst.msk [vmem:[#allocation2 + $0xc0] sm:$0x1] %vm266_vm2, %v4077_v11  ;;  %v4083_v21 = vld [vmem:[#allocation2 + $0x152] sm:$0x1] }
 0x3d0   : > { %v11953_v1 = vld [vmem:[#allocation2 + $0x169] sm:$0xff]  ;;  %v11955_v2 = vld [vmem:[#allocation2 + $0x171] sm:$0xff]  ;;  %4096 = vst.msk [vmem:[#allocation2 + $0xd8] sm:$0x1] %vm266_vm2, %v4078_v25  ;;  %4097 = vst.msk [vmem:[#allocation2 + $0xf0] sm:$0x1] %vm266_vm2, %v4079_v39 }
 0x3d1   : > { %v4174_v55 = vld [vmem:[#allocation2 + $0x1] sm:$0xff]  ;;  %13397 = vst [vmem:[#allocation5_spill] sm:$0xff] %v11953_v1  ;;  %13398 = vst [vmem:[#allocation3_spill] sm:$0xff] %v11955_v2  ;;  %v4084_v34 = vld [vmem:[#allocation2 + $0x16a] sm:$0x1] }
 0x3d2   : > { %9620 = vmatprep.mubr.msk.f32.mxu1 %vm204_vm1, %v4174_v55  ;;  %v4175_v57 = vld [vmem:[#allocation2 + $0x9] sm:$0xff]  ;;  %v4069_v3 = vld [vmem:[#allocation2 + $0x2] sm:$0x1]  ;;  %4067 = vst.msk [vmem:[#allocation2 + $0x199] sm:$0xff] %vm204_vm1, %v11953_v1  ;;  %4068 = vst.msk [vmem:[#allocation2 + $0x1a1] sm:$0xff] %vm204_vm1, %v11955_v2 }
 0x3d3   : > { %9621 = vmatmul.mubr.msk.f32.vlgmr.msra.gmra.mrb[0].mxu1 %vm204_vm1, %v4175_v57  ;;  %4087 = vst.msk [vmem:[#allocation2] sm:$0x1] %vm266_vm2, %v4069_v3  ;;  %4098 = vst.msk [vmem:[#allocation2 + $0x108] sm:$0x1] %vm266_vm2, %v4080_v62  ;;  %v4105_v47 = vld [vmem:[#allocation2 + $0xf] sm:$0x1] }
 0x3d4   : > { %9669 = vmatpush3.msk.msra.mxu1 %vm483_vm0, %v11707_v48  ;;  %9623 = vmatprep.mubr.msk.f32.mxu1 %vm204_vm1, %v11945_v59  ;;  %v11969_v48 = vld [vmem:[#allocation2 + $0x21] sm:$0xff]  ;;  %4099 = vst.msk [vmem:[#allocation2 + $0x120] sm:$0x1] %vm266_vm2, %v4081_v14  ;;  %4100 = vst.msk [vmem:[#allocation2 + $0x138] sm:$0x1] %vm266_vm2, %v4082_v12  ;;  %v12019_v22 = vld [vmem:[#allocation2 + $0x91] sm:$0xff] }
 0x3d5   : > { %9718 = vmatprep.subr.msk.mxu1 %vm483_vm0, %v11950_v63  ;;  %4101 = vst.msk [vmem:[#allocation2 + $0x150] sm:$0x1] %vm266_vm2, %v4083_v21  ;;  %4102 = vst.msk [vmem:[#allocation2 + $0x168] sm:$0x1] %vm266_vm2, %v4084_v34  ;;  %v4110_v8 = vld [vmem:[#allocation2 + $0x87] sm:$0x1] }
 0x3d6   : > { %4123 = vst.msk [vmem:[#allocation2 + $0x11] sm:$0x1] %vm266_vm2, %v4105_v47  ;;  %4124 = vst.msk [vmem:[#allocation2 + $0x29] sm:$0x1] %vm266_vm2, %v4106_v60  ;;  %v4111_v18 = vld [vmem:[#allocation2 + $0x9f] sm:$0x1] }
 0x3d7   : > { %9624 = vmatmul.mubr.msk.f32.gmra.mrb[2].mxu1 %vm204_vm1, %v11969_v48  ;;  %4125 = vst.msk [vmem:[#allocation2 + $0x41] sm:$0x1] %vm266_vm2, %v4107_v61  ;;  %4126 = vst.msk [vmem:[#allocation2 + $0x59] sm:$0x1] %vm266_vm2, %v4108_v4  ;;  %v4112_v9 = vld [vmem:[#allocation2 + $0xb7] sm:$0x1] }
 0x3d8   : > { %9626 = vmatprep.mubr.msk.f32.mxu1 %vm204_vm1, %v11936_v46  ;;  %4127 = vst.msk [vmem:[#allocation2 + $0x71] sm:$0x1] %vm266_vm2, %v4109_v19  ;;  %4128 = vst.msk [vmem:[#allocation2 + $0x89] sm:$0x1] %vm266_vm2, %v4110_v8  ;;  %v4113_v13 = vld [vmem:[#allocation2 + $0xcf] sm:$0x1] }
 0x3d9   : > { %4129 = vst.msk [vmem:[#allocation2 + $0xa1] sm:$0x1] %vm266_vm2, %v4111_v18  ;;  %v12026_v56 = vld [vmem:[#allocation2 + $0x99] sm:$0xff]  ;;  %4130 = vst.msk [vmem:[#allocation2 + $0xb9] sm:$0x1] %vm266_vm2, %v4112_v9  ;;  %v12032_v20 = vld [vmem:[#allocation2 + $0xa9] sm:$0xff] }
 0x3da   : > { %4131 = vst.msk [vmem:[#allocation2 + $0xd1] sm:$0x1] %vm266_vm2, %v4113_v13  ;;  %v4114_v16 = vld [vmem:[#allocation2 + $0xe7] sm:$0x1]  ;;  %v4115_v42 = vld [vmem:[#allocation2 + $0xff] sm:$0x1] }
 0x3db   : > { %9627 = vmatmul.mubr.msk.f32.gmra.mrb[4].mxu1 %vm204_vm1, %v11940_v54  ;;  %4132 = vst.msk [vmem:[#allocation2 + $0xe9] sm:$0x1] %vm266_vm2, %v4114_v16  ;;  %4133 = vst.msk [vmem:[#allocation2 + $0x101] sm:$0x1] %vm266_vm2, %v4115_v42  ;;  %v4116_v24 = vld [vmem:[#allocation2 + $0x117] sm:$0x1] }
 0x3dc   : > { %9629 = vmatprep.mubr.msk.f32.mxu1 %vm204_vm1, %v11985_v0  ;;  %4134 = vst.msk [vmem:[#allocation2 + $0x119] sm:$0x1] %vm266_vm2, %v4116_v24  ;;  %v4117_v35 = vld [vmem:[#allocation2 + $0x12f] sm:$0x1]  ;;  %v12039_v37 = vld [vmem:[#allocation2 + $0xb1] sm:$0xff]  ;;  %v12044_v40 = vld [vmem:[#allocation2 + $0xc1] sm:$0xff] }
 0x3dd   : > { %4135 = vst.msk [vmem:[#allocation2 + $0x131] sm:$0x1] %vm266_vm2, %v4117_v35  ;;  %v4118_v38 = vld [vmem:[#allocation2 + $0x147] sm:$0x1]  ;;  %v4119_v58 = vld [vmem:[#allocation2 + $0x15f] sm:$0x1] }
 0x3de   : > { %4136 = vst.msk [vmem:[#allocation2 + $0x149] sm:$0x1] %vm266_vm2, %v4118_v38  ;;  %4137 = vst.msk [vmem:[#allocation2 + $0x161] sm:$0x1] %vm266_vm2, %v4119_v58  ;;  %v4120_v10 = vld [vmem:[#allocation2 + $0x177] sm:$0x1] }
 0x3df   : > { %9630 = vmatmul.mubr.msk.f32.gmra.mrb[6].mxu1 %vm204_vm1, %v11992_v23  ;;  %4138 = vst.msk [vmem:[#allocation2 + $0x179] sm:$0x1] %vm266_vm2, %v4120_v10  ;;  %v12051_v17 = vld [vmem:[#allocation2 + $0xc9] sm:$0xff]  ;;  %v12055_v15 = vld [vmem:[#allocation2 + $0xd9] sm:$0xff]  ;;  %v12061_v33 = vld [vmem:[#allocation2 + $0xe1] sm:$0xff] }
 0x3e0   : > { %9632 = vmatprep.mubr.msk.f32.mxu1 %vm204_vm1, %v11997_v36  ;;  %v4121_v30 = vld [vmem:[#allocation2 + $0x18f] sm:$0x1]  ;;  %v4086_v31 = vld [vmem:[#allocation2 + $0x19a] sm:$0x1]  ;;  %v12065_v50 = vld [vmem:[#allocation2 + $0xf1] sm:$0xff] }
 0x3e1   : > { %4139 = vst.msk [vmem:[#allocation2 + $0x191] sm:$0x1] %vm266_vm2, %v4121_v30  ;;  %4104 = vst.msk [vmem:[#allocation2 + $0x198] sm:$0x1] %vm266_vm2, %v4086_v31  ;;  %v12069_v26 = vld [vmem:[#allocation2 + $0xf9] sm:$0xff]  ;;  %v12073_v27 = vld [vmem:[#allocation2 + $0x109] sm:$0xff] }
 0x3e2   : > { %v12077_v28 = vld [vmem:[#allocation2 + $0x111] sm:$0xff]  ;;  %v12081_v44 = vld [vmem:[#allocation2 + $0x121] sm:$0xff]  ;;  %v12085_v29 = vld [vmem:[#allocation2 + $0x129] sm:$0xff] }
 0x3e3   : > { %9633 = vmatmul.mubr.msk.f32.gmra.mrb[8].mxu1 %vm204_vm1, %v12003_v53  ;;  %v4122_v45 = vld [vmem:[#allocation2 + $0x1a7] sm:$0x1]  ;;  %v12090_v55 = vld [vmem:[#allocation2 + $0x139] sm:$0xff]  ;;  %v12098_v3 = vld [vmem:[#allocation2 + $0x151] sm:$0xff] }
 0x3e4   : > { %9635 = vmatprep.mubr.msk.f32.mxu1 %vm204_vm1, %v12007_v52  ;;  %4140 = vst.msk [vmem:[#allocation2 + $0x1a9] sm:$0x1] %vm266_vm2, %v4122_v45  ;;  %v12094_v57 = vld [vmem:[#allocation2 + $0x141] sm:$0xff]  ;;  %v12102_v41 = vld [vmem:[#allocation2 + $0x159] sm:$0xff]  ;;  %v12114_v49 = vld [vmem:[%s13236_s2 + $0xc] sm:$0xf] }
 0x3e5   : > { %v4141_v43 = vld [vmem:[#allocation2] sm:$0xff]  ;;  %v4142_v32 = vld [vmem:[#allocation2 + $0x8] sm:$0xff]  ;;  %v12117_v51 = vld [vmem:[#allocation2 + $0x18] sm:$0xff] }
 0x3e6   : > { %v12125_v5 = vld [vmem:[#allocation2 + $0x20] sm:$0xff]  ;;  %v12129_v7 = vld [vmem:[#allocation2 + $0x30] sm:$0xff]  ;;  %v12133_v11 = vld [vmem:[#allocation2 + $0x38] sm:$0xff] }
 0x3e7   : > { %9636 = vmatmul.mubr.msk.f32.gmra.mrb[10].mxu1 %vm204_vm1, %v12014_v6  ;;  %v12141_v25 = vld [vmem:[#allocation2 + $0x50] sm:$0xff]  ;;  %v12145_v39 = vld [vmem:[#allocation2 + $0x60] sm:$0xff]  ;;  %v12149_v62 = vld [vmem:[#allocation2 + $0x68] sm:$0xff] }
 0x3e8   : > { %9638 = vmatprep.mubr.msk.f32.mxu1 %vm204_vm1, %v12019_v22  ;;  %v12153_v14 = vld [vmem:[#allocation2 + $0x78] sm:$0xff]  ;;  %v12157_v12 = vld [vmem:[#allocation2 + $0x80] sm:$0xff]  ;;  %v12161_v21 = vld [vmem:[#allocation2 + $0x90] sm:$0xff] }
 0x3e9   : > { %v12165_v34 = vld [vmem:[#allocation2 + $0x98] sm:$0xff]  ;;  %v12169_v47 = vld [vmem:[#allocation2 + $0xa8] sm:$0xff]  ;;  %v12173_v60 = vld [vmem:[#allocation2 + $0xb0] sm:$0xff] }
 0x3ea   : > { %v12177_v61 = vld [vmem:[#allocation2 + $0xc0] sm:$0xff]  ;;  %v12181_v4 = vld [vmem:[#allocation2 + $0xc8] sm:$0xff]  ;;  %v12185_v19 = vld [vmem:[#allocation2 + $0xd8] sm:$0xff] }
 0x3eb   : > { %9639 = vmatmul.mubr.msk.f32.gmra.mrb[12].mxu1 %vm204_vm1, %v12026_v56  ;;  %v12189_v8 = vld [vmem:[#allocation2 + $0xe0] sm:$0xff]  ;;  %v12193_v18 = vld [vmem:[#allocation2 + $0xf0] sm:$0xff]  ;;  %v12197_v9 = vld [vmem:[#allocation2 + $0xf8] sm:$0xff] }
 0x3ec   : > { %9641 = vmatprep.mubr.msk.f32.mxu1 %vm204_vm1, %v12032_v20  ;;  %v12201_v13 = vld [vmem:[#allocation2 + $0x108] sm:$0xff]  ;;  %v12205_v16 = vld [vmem:[#allocation2 + $0x110] sm:$0xff]  ;;  %v12209_v42 = vld [vmem:[#allocation2 + $0x120] sm:$0xff] }
 0x3ed   : > { %v12213_v24 = vld [vmem:[#allocation2 + $0x128] sm:$0xff]  ;;  %v12217_v35 = vld [vmem:[#allocation2 + $0x138] sm:$0xff]  ;;  %v12221_v38 = vld [vmem:[#allocation2 + $0x140] sm:$0xff] }
 0x3ee   : > { %v12225_v58 = vld [vmem:[#allocation2 + $0x150] sm:$0xff]  ;;  %v12229_v10 = vld [vmem:[#allocation2 + $0x158] sm:$0xff]  ;;  %v12233_v30 = vld [vmem:[#allocation2 + $0x168] sm:$0xff] }
 0x3ef   : > { %9642 = vmatmul.mubr.msk.f32.gmra.mrb[14].mxu1 %vm204_vm1, %v12039_v37  ;;  %v12237_v31 = vld [vmem:[#allocation2 + $0x170] sm:$0xff]  ;;  %v4855_v45 = vld [vmem:[#allocation2 + $0x2] sm:$0xff] }
 0x3f0   : > { %9644 = vmatprep.mubr.msk.f32.mxu1 %vm204_vm1, %v12044_v40 }
 0x3f3   : > { %9645 = vmatmul.mubr.msk.f32.gmra.mrb[16].mxu1 %vm204_vm1, %v12051_v17 }
 0x3f4   : > { %9647 = vmatprep.mubr.msk.f32.mxu1 %vm204_vm1, %v12055_v15 }
 0x3f7   : > { %9648 = vmatmul.mubr.msk.f32.gmra.mrb[18].mxu1 %vm204_vm1, %v12061_v33 }
 0x3f8   : > { %9650 = vmatprep.mubr.msk.f32.mxu1 %vm204_vm1, %v12065_v50 }
 0x3fb   : > { %9651 = vmatmul.mubr.msk.f32.gmra.mrb[20].mxu1 %vm204_vm1, %v12069_v26 }
 0x3fc   : > { %9653 = vmatprep.mubr.msk.f32.mxu1 %vm204_vm1, %v12073_v27 }
 0x3ff   : > { %9654 = vmatmul.mubr.msk.f32.gmra.mrb[22].mxu1 %vm204_vm1, %v12077_v28 }
 0x400   : > { %9656 = vmatprep.mubr.msk.f32.mxu1 %vm204_vm1, %v12081_v44 }
 0x403   : > { %9657 = vmatmul.mubr.msk.f32.gmra.mrb[24].mxu1 %vm204_vm1, %v12085_v29 }
 0x404   : > { %9659 = vmatprep.mubr.msk.f32.mxu1 %vm204_vm1, %v12090_v55 }
 0x407   : > { %9660 = vmatmul.mubr.msk.f32.gmra.mrb[26].mxu1 %vm204_vm1, %v12094_v57 }
 0x408   : > { %9662 = vmatprep.mubr.msk.f32.mxu1 %vm204_vm1, %v12098_v3 }
 0x40b   : > { %9663 = vmatmul.mubr.msk.f32.gmra.mrb[28].mxu1 %vm204_vm1, %v12102_v41 }
 0x40c   : > { %9665 = vmatprep.mubr.msk.f32.mxu1 %vm204_vm1, %v11953_v1  ;;  %v12260_v1 = vld [vmem:[#allocation2 + $0x32] sm:$0xff] }
 0x40d   : > { %13401 = vst [vmem:[#allocation7_spill] sm:$0xff] %v12260_v1 }
 0x40f   : > { %9666 = vmatmul.mubr.msk.f32.gmra.mrb[30].mxu1 %vm204_vm1, %v11955_v2  ;;  %v12248_v2 = vld [vmem:[#allocation2 + $0x1a] sm:$0xff] }
 0x410   : > { %9670 = vmatprep.mubr.msk.f32.mxu1 %vm204_vm1, %v4141_v43  ;;  %v4856_v43 = vld [vmem:[#allocation2 + $0xa] sm:$0xff]  ;;  %13399 = vst [vmem:[#allocation4_spill] sm:$0xff] %v12248_v2 }
 0x413   : > { %9671 = vmatmul.mubr.msk.f32.vlgmr.msra.gmra.mrb[0].mxu1 %vm204_vm1, %v4142_v32  ;;  %v12245_v32 = vld [vmem:[%s13236_s2 + $0x10] sm:$0xf] }
 0x414   : > { %9719 = vmatpush3.msk.msra.mxu1 %vm483_vm0, %v11950_v63  ;;  %9673 = vmatprep.mubr.msk.f32.mxu1 %vm204_vm1, %v12117_v51  ;;  %v12137_v63 = vld [vmem:[#allocation2 + $0x48] sm:$0xff] }
 0x415   : > { %9768 = vmatprep.subr.msk.mxu1 %vm483_vm0, %v12114_v49 }
 0x417   : > { %9674 = vmatmul.mubr.msk.f32.gmra.mrb[2].mxu1 %vm204_vm1, %v12125_v5 }
 0x418   : > { %9676 = vmatprep.mubr.msk.f32.mxu1 %vm204_vm1, %v12129_v7 }
 0x41b   : > { %9677 = vmatmul.mubr.msk.f32.gmra.mrb[4].mxu1 %vm204_vm1, %v12133_v11 }
 0x41c   : > { %9679 = vmatprep.mubr.msk.f32.mxu1 %vm204_vm1, %v12137_v63 }
 0x41f   : > { %9680 = vmatmul.mubr.msk.f32.gmra.mrb[6].mxu1 %vm204_vm1, %v12141_v25 }
 0x420   : > { %9682 = vmatprep.mubr.msk.f32.mxu1 %vm204_vm1, %v12145_v39 }
 0x423   : > { %9683 = vmatmul.mubr.msk.f32.gmra.mrb[8].mxu1 %vm204_vm1, %v12149_v62 }
 0x424   : > { %9685 = vmatprep.mubr.msk.f32.mxu1 %vm204_vm1, %v12153_v14 }
 0x427   : > { %9686 = vmatmul.mubr.msk.f32.gmra.mrb[10].mxu1 %vm204_vm1, %v12157_v12 }
 0x428   : > { %9688 = vmatprep.mubr.msk.f32.mxu1 %vm204_vm1, %v12161_v21 }
 0x42b   : > { %9689 = vmatmul.mubr.msk.f32.gmra.mrb[12].mxu1 %vm204_vm1, %v12165_v34 }
 0x42c   : > { %9691 = vmatprep.mubr.msk.f32.mxu1 %vm204_vm1, %v12169_v47 }
 0x42f   : > { %9692 = vmatmul.mubr.msk.f32.gmra.mrb[14].mxu1 %vm204_vm1, %v12173_v60 }
 0x430   : > { %9694 = vmatprep.mubr.msk.f32.mxu1 %vm204_vm1, %v12177_v61 }
 0x433   : > { %9695 = vmatmul.mubr.msk.f32.gmra.mrb[16].mxu1 %vm204_vm1, %v12181_v4 }
 0x434   : > { %9697 = vmatprep.mubr.msk.f32.mxu1 %vm204_vm1, %v12185_v19 }
 0x437   : > { %9698 = vmatmul.mubr.msk.f32.gmra.mrb[18].mxu1 %vm204_vm1, %v12189_v8 }
 0x438   : > { %9700 = vmatprep.mubr.msk.f32.mxu1 %vm204_vm1, %v12193_v18 }
 0x43b   : > { %9701 = vmatmul.mubr.msk.f32.gmra.mrb[20].mxu1 %vm204_vm1, %v12197_v9 }
 0x43c   : > { %9703 = vmatprep.mubr.msk.f32.mxu1 %vm204_vm1, %v12201_v13 }
 0x43f   : > { %9704 = vmatmul.mubr.msk.f32.gmra.mrb[22].mxu1 %vm204_vm1, %v12205_v16 }
 0x440   : > { %9706 = vmatprep.mubr.msk.f32.mxu1 %vm204_vm1, %v12209_v42 }
 0x443   : > { %9707 = vmatmul.mubr.msk.f32.gmra.mrb[24].mxu1 %vm204_vm1, %v12213_v24 }
 0x444   : > { %9709 = vmatprep.mubr.msk.f32.mxu1 %vm204_vm1, %v12217_v35 }
 0x447   : > { %9710 = vmatmul.mubr.msk.f32.gmra.mrb[26].mxu1 %vm204_vm1, %v12221_v38 }
 0x448   : > { %9712 = vmatprep.mubr.msk.f32.mxu1 %vm204_vm1, %v12225_v58 }
 0x44b   : > { %9713 = vmatmul.mubr.msk.f32.gmra.mrb[28].mxu1 %vm204_vm1, %v12229_v10 }
 0x44c   : > { %9715 = vmatprep.mubr.msk.f32.mxu1 %vm204_vm1, %v12233_v30 }
 0x44f   : > { %9716 = vmatmul.mubr.msk.f32.gmra.mrb[30].mxu1 %vm204_vm1, %v12237_v31 }
 0x450   : > { %9720 = vmatprep.mubr.msk.f32.mxu1 %vm204_vm1, %v4855_v45  ;;  %v12256_v45 = vld [vmem:[#allocation2 + $0x22] sm:$0xff] }
 0x451   : > { %13400 = vst [vmem:[#allocation6_spill] sm:$0xff] %v12256_v45 }
 0x453   : > { %9721 = vmatmul.mubr.msk.f32.vlgmr.msra.gmra.mrb[0].mxu1 %vm204_vm1, %v4856_v43  ;;  %v12264_v43 = vld [vmem:[#allocation2 + $0x3a] sm:$0xff] }
 0x454   : > { %9769 = vmatpush3.msk.msra.mxu1 %vm483_vm0, %v12114_v49  ;;  %9723 = vmatprep.mubr.msk.f32.mxu1 %vm204_vm1, %v12248_v2  ;;  %13402 = vst [vmem:[#allocation8_spill] sm:$0xff] %v12264_v43  ;;  %v12268_v49 = vld [vmem:[#allocation2 + $0x4a] sm:$0xff]  ;;  %v12272_v2 = vld [vmem:[#allocation2 + $0x52] sm:$0xff] }
 0x455   : > { %9818 = vmatprep.subr.msk.mxu1 %vm483_vm0, %v12245_v32  ;;  %13403 = vst [vmem:[#allocation9_spill] sm:$0xff] %v12268_v49  ;;  %13404 = vst [vmem:[#allocation10_spill] sm:$0xff] %v12272_v2 }
 0x457   : > { %9724 = vmatmul.mubr.msk.f32.gmra.mrb[2].mxu1 %vm204_vm1, %v12256_v45  ;;  %v12276_v45 = vld [vmem:[#allocation2 + $0x62] sm:$0xff] }
 0x458   : > { %9726 = vmatprep.mubr.msk.f32.mxu1 %vm204_vm1, %v12260_v1  ;;  %13405 = vst [vmem:[#allocation11_spill] sm:$0xff] %v12276_v45  ;;  %v12280_v1 = vld [vmem:[#allocation2 + $0x6a] sm:$0xff] }
 0x459   : > { %13406 = vst [vmem:[#allocation12_spill] sm:$0xff] %v12280_v1 }
 0x45b   : > { %9727 = vmatmul.mubr.msk.f32.gmra.mrb[4].mxu1 %vm204_vm1, %v12264_v43  ;;  %v12284_v43 = vld [vmem:[#allocation2 + $0x7a] sm:$0xff] }
 0x45c   : > { %9729 = vmatprep.mubr.msk.f32.mxu1 %vm204_vm1, %v12268_v49  ;;  %13407 = vst [vmem:[#allocation13_spill] sm:$0xff] %v12284_v43  ;;  %v12288_v49 = vld [vmem:[#allocation2 + $0x82] sm:$0xff] }
 0x45d   : > { %13408 = vst [vmem:[#allocation14_spill] sm:$0xff] %v12288_v49 }
 0x45f   : > { %9730 = vmatmul.mubr.msk.f32.gmra.mrb[6].mxu1 %vm204_vm1, %v12272_v2  ;;  %v12292_v2 = vld [vmem:[#allocation2 + $0x92] sm:$0xff] }
 0x460   : > { %9732 = vmatprep.mubr.msk.f32.mxu1 %vm204_vm1, %v12276_v45  ;;  %13409 = vst [vmem:[#allocation15_spill] sm:$0xff] %v12292_v2  ;;  %v12296_v45 = vld [vmem:[#allocation2 + $0x9a] sm:$0xff] }
 0x461   : > { %13410 = vst [vmem:[#allocation16_spill] sm:$0xff] %v12296_v45 }
 0x463   : > { %9733 = vmatmul.mubr.msk.f32.gmra.mrb[8].mxu1 %vm204_vm1, %v12280_v1  ;;  %v12300_v1 = vld [vmem:[#allocation2 + $0xaa] sm:$0xff] }
 0x464   : > { %9735 = vmatprep.mubr.msk.f32.mxu1 %vm204_vm1, %v12284_v43  ;;  %13411 = vst [vmem:[#allocation17_spill] sm:$0xff] %v12300_v1  ;;  %v12304_v43 = vld [vmem:[#allocation2 + $0xb2] sm:$0xff] }
 0x465   : > { %13412 = vst [vmem:[#allocation18_spill] sm:$0xff] %v12304_v43 }
 0x467   : > { %9736 = vmatmul.mubr.msk.f32.gmra.mrb[10].mxu1 %vm204_vm1, %v12288_v49  ;;  %v12308_v49 = vld [vmem:[#allocation2 + $0xc2] sm:$0xff] }
 0x468   : > { %9738 = vmatprep.mubr.msk.f32.mxu1 %vm204_vm1, %v12292_v2  ;;  %13413 = vst [vmem:[#allocation19_spill] sm:$0xff] %v12308_v49  ;;  %v12312_v2 = vld [vmem:[#allocation2 + $0xca] sm:$0xff] }
 0x469   : > { %13414 = vst [vmem:[#allocation20_spill] sm:$0xff] %v12312_v2 }
 0x46b   : > { %9739 = vmatmul.mubr.msk.f32.gmra.mrb[12].mxu1 %vm204_vm1, %v12296_v45  ;;  %v12316_v45 = vld [vmem:[#allocation2 + $0xda] sm:$0xff] }
 0x46c   : > { %9741 = vmatprep.mubr.msk.f32.mxu1 %vm204_vm1, %v12300_v1  ;;  %13415 = vst [vmem:[#allocation21_spill] sm:$0xff] %v12316_v45  ;;  %v12320_v1 = vld [vmem:[#allocation2 + $0xe2] sm:$0xff] }
 0x46d   : > { %13416 = vst [vmem:[#allocation22_spill] sm:$0xff] %v12320_v1 }
 0x46f   : > { %9742 = vmatmul.mubr.msk.f32.gmra.mrb[14].mxu1 %vm204_vm1, %v12304_v43  ;;  %v12324_v43 = vld [vmem:[#allocation2 + $0xf2] sm:$0xff] }
 0x470   : > { %9744 = vmatprep.mubr.msk.f32.mxu1 %vm204_vm1, %v12308_v49  ;;  %13417 = vst [vmem:[#allocation23_spill] sm:$0xff] %v12324_v43  ;;  %v12328_v49 = vld [vmem:[#allocation2 + $0xfa] sm:$0xff] }
 0x471   : > { %13418 = vst [vmem:[#allocation24_spill] sm:$0xff] %v12328_v49 }
 0x473   : > { %9745 = vmatmul.mubr.msk.f32.gmra.mrb[16].mxu1 %vm204_vm1, %v12312_v2  ;;  %v12332_v2 = vld [vmem:[#allocation2 + $0x10a] sm:$0xff] }
 0x474   : > { %9747 = vmatprep.mubr.msk.f32.mxu1 %vm204_vm1, %v12316_v45  ;;  %13419 = vst [vmem:[#allocation25_spill] sm:$0xff] %v12332_v2  ;;  %v12336_v45 = vld [vmem:[#allocation2 + $0x112] sm:$0xff] }
 0x475   : > { %13420 = vst [vmem:[#allocation26_spill] sm:$0xff] %v12336_v45 }
 0x477   : > { %9748 = vmatmul.mubr.msk.f32.gmra.mrb[18].mxu1 %vm204_vm1, %v12320_v1  ;;  %v12340_v1 = vld [vmem:[#allocation2 + $0x122] sm:$0xff] }
 0x478   : > { %9750 = vmatprep.mubr.msk.f32.mxu1 %vm204_vm1, %v12324_v43  ;;  %13421 = vst [vmem:[#allocation27_spill] sm:$0xff] %v12340_v1  ;;  %v12344_v43 = vld [vmem:[#allocation2 + $0x12a] sm:$0xff] }
 0x479   : > { %13422 = vst [vmem:[#allocation28_spill] sm:$0xff] %v12344_v43 }
 0x47b   : > { %9751 = vmatmul.mubr.msk.f32.gmra.mrb[20].mxu1 %vm204_vm1, %v12328_v49  ;;  %v12348_v49 = vld [vmem:[#allocation2 + $0x13a] sm:$0xff] }
 0x47c   : > { %9753 = vmatprep.mubr.msk.f32.mxu1 %vm204_vm1, %v12332_v2  ;;  %13423 = vst [vmem:[#allocation29_spill] sm:$0xff] %v12348_v49  ;;  %v12352_v2 = vld [vmem:[#allocation2 + $0x142] sm:$0xff] }
 0x47f   : > { %9754 = vmatmul.mubr.msk.f32.gmra.mrb[22].mxu1 %vm204_vm1, %v12336_v45  ;;  %v12356_v45 = vld [vmem:[#allocation2 + $0x152] sm:$0xff] }
 0x480   : > { %9756 = vmatprep.mubr.msk.f32.mxu1 %vm204_vm1, %v12340_v1  ;;  %13424 = vst [vmem:[#allocation30_spill] sm:$0xff] %v12356_v45  ;;  %v12360_v1 = vld [vmem:[#allocation2 + $0x15a] sm:$0xff] }
 0x483   : > { %9757 = vmatmul.mubr.msk.f32.gmra.mrb[24].mxu1 %vm204_vm1, %v12344_v43  ;;  %v12364_v43 = vld [vmem:[#allocation2 + $0x16a] sm:$0xff] }
 0x484   : > { %9759 = vmatprep.mubr.msk.f32.mxu1 %vm204_vm1, %v12348_v49  ;;  %v12368_v49 = vld [vmem:[#allocation2 + $0x172] sm:$0xff] }
 0x487   : > { %9760 = vmatmul.mubr.msk.f32.gmra.mrb[26].mxu1 %vm204_vm1, %v12352_v2 }
 0x488   : > { %9762 = vmatprep.mubr.msk.f32.mxu1 %vm204_vm1, %v12356_v45  ;;  %v6054_v45 = vld [vmem:[%s13236_s2 + $0x14] sm:$0xf] }
 0x48b   : > { %9763 = vmatmul.mubr.msk.f32.gmra.mrb[28].mxu1 %vm204_vm1, %v12360_v1 }
 0x48c   : > { %9765 = vmatprep.mubr.msk.f32.mxu1 %vm204_vm1, %v12364_v43 }
 0x48f   : > { %9766 = vmatmul.mubr.msk.f32.gmra.mrb[30].mxu1 %vm204_vm1, %v12368_v49 }
 0x490   : > { %9770 = vmatprep.mubr.msk.f32.mxu1 %vm204_vm1, %v12117_v51  ;;  %v12438_v51 = vld [vmem:[#allocation2 + $0x180] sm:$0xff] }
 0x493   : > { %9771 = vmatmul.mubr.msk.f32.vlgmr.msra.gmra.mrb[0].mxu1 %vm204_vm1, %v12125_v5  ;;  %v12442_v5 = vld [vmem:[#allocation2 + $0x188] sm:$0xff] }
 0x494   : > { %9819 = vmatpush3.msk.msra.mxu1 %vm483_vm0, %v12245_v32  ;;  %9773 = vmatprep.mubr.msk.f32.mxu1 %vm204_vm1, %v12129_v7  ;;  %v6443_v32 = vld [vmem:[%s13236_s2 + $0x18] sm:$0xf] }
 0x495   : > { %9868 = vmatprep.subr.msk.mxu1 %vm483_vm0, %v6054_v45 }
 0x497   : > { %9774 = vmatmul.mubr.msk.f32.gmra.mrb[2].mxu1 %vm204_vm1, %v12133_v11 }
 0x498   : > { %9776 = vmatprep.mubr.msk.f32.mxu1 %vm204_vm1, %v12137_v63 }
 0x49b   : > { %9777 = vmatmul.mubr.msk.f32.gmra.mrb[4].mxu1 %vm204_vm1, %v12141_v25 }
 0x49c   : > { %9779 = vmatprep.mubr.msk.f32.mxu1 %vm204_vm1, %v12145_v39 }
 0x49f   : > { %9780 = vmatmul.mubr.msk.f32.gmra.mrb[6].mxu1 %vm204_vm1, %v12149_v62 }
 0x4a0   : > { %9782 = vmatprep.mubr.msk.f32.mxu1 %vm204_vm1, %v12153_v14 }
 0x4a3   : > { %9783 = vmatmul.mubr.msk.f32.gmra.mrb[8].mxu1 %vm204_vm1, %v12157_v12 }
 0x4a4   : > { %9785 = vmatprep.mubr.msk.f32.mxu1 %vm204_vm1, %v12161_v21 }
 0x4a7   : > { %9786 = vmatmul.mubr.msk.f32.gmra.mrb[10].mxu1 %vm204_vm1, %v12165_v34 }
 0x4a8   : > { %9788 = vmatprep.mubr.msk.f32.mxu1 %vm204_vm1, %v12169_v47 }
 0x4ab   : > { %9789 = vmatmul.mubr.msk.f32.gmra.mrb[12].mxu1 %vm204_vm1, %v12173_v60 }
 0x4ac   : > { %9791 = vmatprep.mubr.msk.f32.mxu1 %vm204_vm1, %v12177_v61 }
 0x4af   : > { %9792 = vmatmul.mubr.msk.f32.gmra.mrb[14].mxu1 %vm204_vm1, %v12181_v4 }
 0x4b0   : > { %9794 = vmatprep.mubr.msk.f32.mxu1 %vm204_vm1, %v12185_v19 }
 0x4b3   : > { %9795 = vmatmul.mubr.msk.f32.gmra.mrb[16].mxu1 %vm204_vm1, %v12189_v8 }
 0x4b4   : > { %9797 = vmatprep.mubr.msk.f32.mxu1 %vm204_vm1, %v12193_v18 }
 0x4b7   : > { %9798 = vmatmul.mubr.msk.f32.gmra.mrb[18].mxu1 %vm204_vm1, %v12197_v9 }
 0x4b8   : > { %9800 = vmatprep.mubr.msk.f32.mxu1 %vm204_vm1, %v12201_v13 }
 0x4bb   : > { %9801 = vmatmul.mubr.msk.f32.gmra.mrb[20].mxu1 %vm204_vm1, %v12205_v16 }
 0x4bc   : > { %9803 = vmatprep.mubr.msk.f32.mxu1 %vm204_vm1, %v12209_v42 }
 0x4bf   : > { %9804 = vmatmul.mubr.msk.f32.gmra.mrb[22].mxu1 %vm204_vm1, %v12213_v24 }
 0x4c0   : > { %9806 = vmatprep.mubr.msk.f32.mxu1 %vm204_vm1, %v12217_v35 }
 0x4c3   : > { %9807 = vmatmul.mubr.msk.f32.gmra.mrb[24].mxu1 %vm204_vm1, %v12221_v38 }
 0x4c4   : > { %9809 = vmatprep.mubr.msk.f32.mxu1 %vm204_vm1, %v12225_v58 }
 0x4c7   : > { %9810 = vmatmul.mubr.msk.f32.gmra.mrb[26].mxu1 %vm204_vm1, %v12229_v10 }
 0x4c8   : > { %9812 = vmatprep.mubr.msk.f32.mxu1 %vm204_vm1, %v12233_v30 }
 0x4cb   : > { %9813 = vmatmul.mubr.msk.f32.gmra.mrb[28].mxu1 %vm204_vm1, %v12237_v31 }
 0x4cc   : > { %9815 = vmatprep.mubr.msk.f32.mxu1 %vm204_vm1, %v12438_v51 }
 0x4cf   : > { %9816 = vmatmul.mubr.msk.f32.gmra.mrb[30].mxu1 %vm204_vm1, %v12442_v5 }
 0x4d0   : > { %9820 = vmatprep.mubr.msk.f32.mxu1 %vm204_vm1, %v11945_v59  ;;  %v12511_v59 = vld [vmem:[#allocation2 + $0x181] sm:$0xff] }
 0x4d3   : > { %9821 = vmatmul.mubr.msk.f32.vlgmr.msra.gmra.mrb[0].mxu1 %vm204_vm1, %v11969_v48  ;;  %v12515_v48 = vld [vmem:[#allocation2 + $0x189] sm:$0xff] }
 0x4d4   : > { %9869 = vmatpush3.msk.msra.mxu1 %vm483_vm0, %v6054_v45  ;;  %9823 = vmatprep.mubr.msk.f32.mxu1 %vm204_vm1, %v11936_v46  ;;  %v13425_v46 = vld [vmem:[#allocation5_spill] sm:$0xff]  ;;  %v13450_v45 = vld [vmem:[#allocation28_spill] sm:$0xff] }
 0x4d5   : > { %9918 = vmatprep.subr.msk.mxu1 %vm483_vm0, %v6443_v32 }
 0x4d7   : > { %9824 = vmatmul.mubr.msk.f32.gmra.mrb[2].mxu1 %vm204_vm1, %v11940_v54  ;;  %v13426_v54 = vld [vmem:[#allocation3_spill] sm:$0xff] }
 0x4d8   : > { %9826 = vmatprep.mubr.msk.f32.mxu1 %vm204_vm1, %v11985_v0  ;;  %v13427_v0 = vld [vmem:[#allocation4_spill] sm:$0xff] }
 0x4db   : > { %9827 = vmatmul.mubr.msk.f32.gmra.mrb[4].mxu1 %vm204_vm1, %v11992_v23  ;;  %v6832_v23 = vld [vmem:[%s13236_s2 + $0x1c] sm:$0xf] }
 0x4dc   : > { %9829 = vmatprep.mubr.msk.f32.mxu1 %vm204_vm1, %v11997_v36  ;;  %v13428_v36 = vld [vmem:[#allocation6_spill] sm:$0xff] }
 0x4df   : > { %9830 = vmatmul.mubr.msk.f32.gmra.mrb[6].mxu1 %vm204_vm1, %v12003_v53  ;;  %v13429_v53 = vld [vmem:[#allocation7_spill] sm:$0xff] }
 0x4e0   : > { %9832 = vmatprep.mubr.msk.f32.mxu1 %vm204_vm1, %v12007_v52  ;;  %v13430_v52 = vld [vmem:[#allocation8_spill] sm:$0xff] }
 0x4e3   : > { %9833 = vmatmul.mubr.msk.f32.gmra.mrb[8].mxu1 %vm204_vm1, %v12014_v6  ;;  %v13431_v6 = vld [vmem:[#allocation9_spill] sm:$0xff] }
 0x4e4   : > { %9835 = vmatprep.mubr.msk.f32.mxu1 %vm204_vm1, %v12019_v22  ;;  %v13432_v22 = vld [vmem:[#allocation10_spill] sm:$0xff] }
 0x4e7   : > { %9836 = vmatmul.mubr.msk.f32.gmra.mrb[10].mxu1 %vm204_vm1, %v12026_v56  ;;  %v13433_v56 = vld [vmem:[#allocation11_spill] sm:$0xff] }
 0x4e8   : > { %9838 = vmatprep.mubr.msk.f32.mxu1 %vm204_vm1, %v12032_v20  ;;  %v13434_v20 = vld [vmem:[#allocation12_spill] sm:$0xff] }
 0x4eb   : > { %9839 = vmatmul.mubr.msk.f32.gmra.mrb[12].mxu1 %vm204_vm1, %v12039_v37  ;;  %v13435_v37 = vld [vmem:[#allocation13_spill] sm:$0xff] }
 0x4ec   : > { %9841 = vmatprep.mubr.msk.f32.mxu1 %vm204_vm1, %v12044_v40  ;;  %v13436_v40 = vld [vmem:[#allocation14_spill] sm:$0xff] }
 0x4ef   : > { %9842 = vmatmul.mubr.msk.f32.gmra.mrb[14].mxu1 %vm204_vm1, %v12051_v17  ;;  %v13437_v17 = vld [vmem:[#allocation15_spill] sm:$0xff] }
 0x4f0   : > { %9844 = vmatprep.mubr.msk.f32.mxu1 %vm204_vm1, %v12055_v15  ;;  %v13438_v15 = vld [vmem:[#allocation16_spill] sm:$0xff] }
 0x4f3   : > { %9845 = vmatmul.mubr.msk.f32.gmra.mrb[16].mxu1 %vm204_vm1, %v12061_v33  ;;  %v13439_v33 = vld [vmem:[#allocation17_spill] sm:$0xff] }
 0x4f4   : > { %9847 = vmatprep.mubr.msk.f32.mxu1 %vm204_vm1, %v12065_v50  ;;  %v13440_v50 = vld [vmem:[#allocation18_spill] sm:$0xff] }
 0x4f7   : > { %9848 = vmatmul.mubr.msk.f32.gmra.mrb[18].mxu1 %vm204_vm1, %v12069_v26  ;;  %v13441_v26 = vld [vmem:[#allocation19_spill] sm:$0xff] }
 0x4f8   : > { %9850 = vmatprep.mubr.msk.f32.mxu1 %vm204_vm1, %v12073_v27  ;;  %v13442_v27 = vld [vmem:[#allocation20_spill] sm:$0xff] }
 0x4fb   : > { %9851 = vmatmul.mubr.msk.f32.gmra.mrb[20].mxu1 %vm204_vm1, %v12077_v28  ;;  %v13443_v28 = vld [vmem:[#allocation21_spill] sm:$0xff] }
 0x4fc   : > { %9853 = vmatprep.mubr.msk.f32.mxu1 %vm204_vm1, %v12081_v44  ;;  %v13444_v44 = vld [vmem:[#allocation22_spill] sm:$0xff] }
 0x4ff   : > { %9854 = vmatmul.mubr.msk.f32.gmra.mrb[22].mxu1 %vm204_vm1, %v12085_v29  ;;  %v13445_v29 = vld [vmem:[#allocation23_spill] sm:$0xff] }
 0x500   : > { %9856 = vmatprep.mubr.msk.f32.mxu1 %vm204_vm1, %v12090_v55  ;;  %v13446_v55 = vld [vmem:[#allocation24_spill] sm:$0xff] }
 0x503   : > { %9857 = vmatmul.mubr.msk.f32.gmra.mrb[24].mxu1 %vm204_vm1, %v12094_v57  ;;  %v13447_v57 = vld [vmem:[#allocation25_spill] sm:$0xff] }
 0x504   : > { %9859 = vmatprep.mubr.msk.f32.mxu1 %vm204_vm1, %v12098_v3  ;;  %v13448_v3 = vld [vmem:[#allocation26_spill] sm:$0xff] }
 0x507   : > { %9860 = vmatmul.mubr.msk.f32.gmra.mrb[26].mxu1 %vm204_vm1, %v12102_v41  ;;  %v13449_v41 = vld [vmem:[#allocation27_spill] sm:$0xff] }
 0x508   : > { %9862 = vmatprep.mubr.msk.f32.mxu1 %vm204_vm1, %v13425_v46  ;;  %v13452_v46 = vld [vmem:[#allocation30_spill] sm:$0xff] }
 0x50b   : > { %9863 = vmatmul.mubr.msk.f32.gmra.mrb[28].mxu1 %vm204_vm1, %v13426_v54  ;;  %v12584_v54 = vld [vmem:[#allocation2 + $0x182] sm:$0xff] }
 0x50c   : > { %9865 = vmatprep.mubr.msk.f32.mxu1 %vm204_vm1, %v12511_v59 }
 0x50f   : > { %9866 = vmatmul.mubr.msk.f32.gmra.mrb[30].mxu1 %vm204_vm1, %v12515_v48 }
 0x510   : > { %9870 = vmatprep.mubr.msk.f32.mxu1 %vm204_vm1, %v13427_v0  ;;  %v12588_v0 = vld [vmem:[#allocation2 + $0x18a] sm:$0xff] }
 0x513   : > { %9871 = vmatmul.mubr.msk.f32.vlgmr.msra.gmra.mrb[0].mxu1 %vm204_vm1, %v13428_v36  ;;  %v7221_v36 = vld [vmem:[%s13236_s2 + $0x20] sm:$0xf] }
 0x514   : > { %9919 = vmatpush3.msk.msra.mxu1 %vm483_vm0, %v6443_v32  ;;  %9873 = vmatprep.mubr.msk.f32.mxu1 %vm204_vm1, %v13429_v53  ;;  %v13451_v32 = vld [vmem:[#allocation29_spill] sm:$0xff] }
 0x515   : > { %9968 = vmatprep.subr.msk.mxu1 %vm483_vm0, %v6832_v23 }
 0x517   : > { %9874 = vmatmul.mubr.msk.f32.gmra.mrb[2].mxu1 %vm204_vm1, %v13430_v52 }
 0x518   : > { %9876 = vmatprep.mubr.msk.f32.mxu1 %vm204_vm1, %v13431_v6 }
 0x51b   : > { %9877 = vmatmul.mubr.msk.f32.gmra.mrb[4].mxu1 %vm204_vm1, %v13432_v22 }
 0x51c   : > { %9879 = vmatprep.mubr.msk.f32.mxu1 %vm204_vm1, %v13433_v56 }
 0x51f   : > { %9880 = vmatmul.mubr.msk.f32.gmra.mrb[6].mxu1 %vm204_vm1, %v13434_v20 }
 0x520   : > { %9882 = vmatprep.mubr.msk.f32.mxu1 %vm204_vm1, %v13435_v37 }
 0x523   : > { %9883 = vmatmul.mubr.msk.f32.gmra.mrb[8].mxu1 %vm204_vm1, %v13436_v40 }
 0x524   : > { %9885 = vmatprep.mubr.msk.f32.mxu1 %vm204_vm1, %v13437_v17 }
 0x527   : > { %9886 = vmatmul.mubr.msk.f32.gmra.mrb[10].mxu1 %vm204_vm1, %v13438_v15 }
 0x528   : > { %9888 = vmatprep.mubr.msk.f32.mxu1 %vm204_vm1, %v13439_v33 }
 0x52b   : > { %9889 = vmatmul.mubr.msk.f32.gmra.mrb[12].mxu1 %vm204_vm1, %v13440_v50 }
 0x52c   : > { %9891 = vmatprep.mubr.msk.f32.mxu1 %vm204_vm1, %v13441_v26 }
 0x52f   : > { %9892 = vmatmul.mubr.msk.f32.gmra.mrb[14].mxu1 %vm204_vm1, %v13442_v27 }
 0x530   : > { %9894 = vmatprep.mubr.msk.f32.mxu1 %vm204_vm1, %v13443_v28 }
 0x533   : > { %9895 = vmatmul.mubr.msk.f32.gmra.mrb[16].mxu1 %vm204_vm1, %v13444_v44 }
 0x534   : > { %9897 = vmatprep.mubr.msk.f32.mxu1 %vm204_vm1, %v13445_v29 }
 0x537   : > { %9898 = vmatmul.mubr.msk.f32.gmra.mrb[18].mxu1 %vm204_vm1, %v13446_v55 }
 0x538   : > { %9900 = vmatprep.mubr.msk.f32.mxu1 %vm204_vm1, %v13447_v57 }
 0x53b   : > { %9901 = vmatmul.mubr.msk.f32.gmra.mrb[20].mxu1 %vm204_vm1, %v13448_v3 }
 0x53c   : > { %9903 = vmatprep.mubr.msk.f32.mxu1 %vm204_vm1, %v13449_v41 }
 0x53f   : > { %9904 = vmatmul.mubr.msk.f32.gmra.mrb[22].mxu1 %vm204_vm1, %v13450_v45 }
 0x540   : > { %9906 = vmatprep.mubr.msk.f32.mxu1 %vm204_vm1, %v13451_v32 }
 0x543   : > { %9907 = vmatmul.mubr.msk.f32.gmra.mrb[24].mxu1 %vm204_vm1, %v12352_v2 }
 0x544   : > { %9909 = vmatprep.mubr.msk.f32.mxu1 %vm204_vm1, %v13452_v46 }
 0x547   : > { %9910 = vmatmul.mubr.msk.f32.gmra.mrb[26].mxu1 %vm204_vm1, %v12360_v1 }
 0x548   : > { %9912 = vmatprep.mubr.msk.f32.mxu1 %vm204_vm1, %v12364_v43 }
 0x54b   : > { %9913 = vmatmul.mubr.msk.f32.gmra.mrb[28].mxu1 %vm204_vm1, %v12368_v49 }
 0x54c   : > { %9915 = vmatprep.mubr.msk.f32.mxu1 %vm204_vm1, %v12584_v54 }
 0x54f   : > { %9916 = vmatmul.mubr.msk.f32.gmra.mrb[30].mxu1 %vm204_vm1, %v12588_v0 }
 0x550   : > { %9920 = vmatprep.mubr.msk.f32.mxu1 %vm204_vm1, %v12129_v7  ;;  %v6441_v7 = vld [vmem:[#allocation2 + $0x198] sm:$0xff] }
 0x553   : > { %9921 = vmatmul.mubr.msk.f32.vlgmr.msra.gmra.mrb[0].mxu1 %vm204_vm1, %v12133_v11  ;;  %v6442_v11 = vld [vmem:[#allocation2 + $0x1a0] sm:$0xff] }
 0x554   : > { %9969 = vmatpush3.msk.msra.mxu1 %vm483_vm0, %v6832_v23  ;;  %9923 = vmatprep.mubr.msk.f32.mxu1 %vm204_vm1, %v12137_v63  ;;  %v6800_v63 = vld [vmem:[#allocation2 + $0x31] sm:$0xff]  ;;  %v6830_v23 = vld [vmem:[#allocation2 + $0x199] sm:$0xff] }
 0x555   : > { %10018 = vmatprep.subr.msk.mxu1 %vm483_vm0, %v7221_v36 }
 0x557   : > { %9924 = vmatmul.mubr.msk.f32.gmra.mrb[2].mxu1 %vm204_vm1, %v12141_v25  ;;  %v6801_v25 = vld [vmem:[#allocation2 + $0x39] sm:$0xff] }
 0x558   : > { %9926 = vmatprep.mubr.msk.f32.mxu1 %vm204_vm1, %v12145_v39  ;;  %v6802_v39 = vld [vmem:[#allocation2 + $0x49] sm:$0xff] }
 0x55b   : > { %9927 = vmatmul.mubr.msk.f32.gmra.mrb[4].mxu1 %vm204_vm1, %v12149_v62  ;;  %v6803_v62 = vld [vmem:[#allocation2 + $0x51] sm:$0xff] }
 0x55c   : > { %9929 = vmatprep.mubr.msk.f32.mxu1 %vm204_vm1, %v12153_v14  ;;  %v6804_v14 = vld [vmem:[#allocation2 + $0x61] sm:$0xff] }
 0x55f   : > { %9930 = vmatmul.mubr.msk.f32.gmra.mrb[6].mxu1 %vm204_vm1, %v12157_v12  ;;  %v6805_v12 = vld [vmem:[#allocation2 + $0x69] sm:$0xff] }
 0x560   : > { %9932 = vmatprep.mubr.msk.f32.mxu1 %vm204_vm1, %v12161_v21  ;;  %v6806_v21 = vld [vmem:[#allocation2 + $0x79] sm:$0xff] }
 0x563   : > { %9933 = vmatmul.mubr.msk.f32.gmra.mrb[8].mxu1 %vm204_vm1, %v12165_v34  ;;  %v6807_v34 = vld [vmem:[#allocation2 + $0x81] sm:$0xff] }
 0x564   : > { %9935 = vmatprep.mubr.msk.f32.mxu1 %vm204_vm1, %v12169_v47  ;;  %v6808_v47 = vld [vmem:[#allocation2 + $0x91] sm:$0xff] }
 0x567   : > { %9936 = vmatmul.mubr.msk.f32.gmra.mrb[10].mxu1 %vm204_vm1, %v12173_v60  ;;  %v6809_v60 = vld [vmem:[#allocation2 + $0x99] sm:$0xff] }
 0x568   : > { %9938 = vmatprep.mubr.msk.f32.mxu1 %vm204_vm1, %v12177_v61  ;;  %v6810_v61 = vld [vmem:[#allocation2 + $0xa9] sm:$0xff] }
 0x56b   : > { %9939 = vmatmul.mubr.msk.f32.gmra.mrb[12].mxu1 %vm204_vm1, %v12181_v4  ;;  %v6811_v4 = vld [vmem:[#allocation2 + $0xb1] sm:$0xff] }
 0x56c   : > { %9941 = vmatprep.mubr.msk.f32.mxu1 %vm204_vm1, %v12185_v19  ;;  %v6812_v19 = vld [vmem:[#allocation2 + $0xc1] sm:$0xff] }
 0x56f   : > { %9942 = vmatmul.mubr.msk.f32.gmra.mrb[14].mxu1 %vm204_vm1, %v12189_v8  ;;  %v6813_v8 = vld [vmem:[#allocation2 + $0xc9] sm:$0xff] }
 0x570   : > { %9944 = vmatprep.mubr.msk.f32.mxu1 %vm204_vm1, %v12193_v18  ;;  %v6814_v18 = vld [vmem:[#allocation2 + $0xd9] sm:$0xff] }
 0x573   : > { %9945 = vmatmul.mubr.msk.f32.gmra.mrb[16].mxu1 %vm204_vm1, %v12197_v9  ;;  %v6815_v9 = vld [vmem:[#allocation2 + $0xe1] sm:$0xff] }
 0x574   : > { %9947 = vmatprep.mubr.msk.f32.mxu1 %vm204_vm1, %v12201_v13  ;;  %v6816_v13 = vld [vmem:[#allocation2 + $0xf1] sm:$0xff] }
 0x577   : > { %9948 = vmatmul.mubr.msk.f32.gmra.mrb[18].mxu1 %vm204_vm1, %v12205_v16  ;;  %v6817_v16 = vld [vmem:[#allocation2 + $0xf9] sm:$0xff] }
 0x578   : > { %9950 = vmatprep.mubr.msk.f32.mxu1 %vm204_vm1, %v12209_v42  ;;  %v6818_v42 = vld [vmem:[#allocation2 + $0x109] sm:$0xff] }
 0x57b   : > { %9951 = vmatmul.mubr.msk.f32.gmra.mrb[20].mxu1 %vm204_vm1, %v12213_v24  ;;  %v6819_v24 = vld [vmem:[#allocation2 + $0x111] sm:$0xff] }
 0x57c   : > { %9953 = vmatprep.mubr.msk.f32.mxu1 %vm204_vm1, %v12217_v35  ;;  %v6820_v35 = vld [vmem:[#allocation2 + $0x121] sm:$0xff] }
 0x57f   : > { %9954 = vmatmul.mubr.msk.f32.gmra.mrb[22].mxu1 %vm204_vm1, %v12221_v38  ;;  %v6821_v38 = vld [vmem:[#allocation2 + $0x129] sm:$0xff] }
 0x580   : > { %9956 = vmatprep.mubr.msk.f32.mxu1 %vm204_vm1, %v12225_v58  ;;  %v6822_v58 = vld [vmem:[#allocation2 + $0x139] sm:$0xff] }
 0x583   : > { %9957 = vmatmul.mubr.msk.f32.gmra.mrb[24].mxu1 %vm204_vm1, %v12229_v10  ;;  %v6823_v10 = vld [vmem:[#allocation2 + $0x141] sm:$0xff] }
 0x584   : > { %9959 = vmatprep.mubr.msk.f32.mxu1 %vm204_vm1, %v12233_v30  ;;  %v6824_v30 = vld [vmem:[#allocation2 + $0x151] sm:$0xff] }
 0x587   : > { %9960 = vmatmul.mubr.msk.f32.gmra.mrb[26].mxu1 %vm204_vm1, %v12237_v31  ;;  %v6825_v31 = vld [vmem:[#allocation2 + $0x159] sm:$0xff] }
 0x588   : > { %9962 = vmatprep.mubr.msk.f32.mxu1 %vm204_vm1, %v12438_v51  ;;  %v6826_v51 = vld [vmem:[#allocation2 + $0x169] sm:$0xff] }
 0x58b   : > { %9963 = vmatmul.mubr.msk.f32.gmra.mrb[28].mxu1 %vm204_vm1, %v12442_v5  ;;  %v6827_v5 = vld [vmem:[#allocation2 + $0x171] sm:$0xff] }
 0x58c   : > { %9965 = vmatprep.mubr.msk.f32.mxu1 %vm204_vm1, %v6441_v7 }
 0x58f   : > { %9966 = vmatmul.mubr.msk.f32.gmra.mrb[30].mxu1 %vm204_vm1, %v6442_v11 }
 0x590   : > { %9970 = vmatprep.mubr.msk.f32.mxu1 %vm204_vm1, %v6800_v63 }
 0x593   : > { %9971 = vmatmul.mubr.msk.f32.vlgmr.msra.gmra.mrb[0].mxu1 %vm204_vm1, %v6801_v25 }
 0x594   : > { %10019 = vmatpush3.msk.msra.mxu1 %vm483_vm0, %v7221_v36  ;;  %9973 = vmatprep.mubr.msk.f32.mxu1 %vm204_vm1, %v6802_v39  ;;  %v6831_v36 = vld [vmem:[#allocation2 + $0x1a1] sm:$0xff] }
 0x597   : > { %9974 = vmatmul.mubr.msk.f32.gmra.mrb[2].mxu1 %vm204_vm1, %v6803_v62 }
 0x598   : > { %9976 = vmatprep.mubr.msk.f32.mxu1 %vm204_vm1, %v6804_v14 }
 0x59b   : > { %9977 = vmatmul.mubr.msk.f32.gmra.mrb[4].mxu1 %vm204_vm1, %v6805_v12 }
 0x59c   : > { %9979 = vmatprep.mubr.msk.f32.mxu1 %vm204_vm1, %v6806_v21 }
 0x59f   : > { %9980 = vmatmul.mubr.msk.f32.gmra.mrb[6].mxu1 %vm204_vm1, %v6807_v34 }
 0x5a0   : > { %9982 = vmatprep.mubr.msk.f32.mxu1 %vm204_vm1, %v6808_v47 }
 0x5a3   : > { %9983 = vmatmul.mubr.msk.f32.gmra.mrb[8].mxu1 %vm204_vm1, %v6809_v60 }
 0x5a4   : > { %9985 = vmatprep.mubr.msk.f32.mxu1 %vm204_vm1, %v6810_v61 }
 0x5a7   : > { %9986 = vmatmul.mubr.msk.f32.gmra.mrb[10].mxu1 %vm204_vm1, %v6811_v4 }
 0x5a8   : > { %9988 = vmatprep.mubr.msk.f32.mxu1 %vm204_vm1, %v6812_v19 }
 0x5ab   : > { %9989 = vmatmul.mubr.msk.f32.gmra.mrb[12].mxu1 %vm204_vm1, %v6813_v8 }
 0x5ac   : > { %9991 = vmatprep.mubr.msk.f32.mxu1 %vm204_vm1, %v6814_v18 }
 0x5af   : > { %9992 = vmatmul.mubr.msk.f32.gmra.mrb[14].mxu1 %vm204_vm1, %v6815_v9 }
 0x5b0   : > { %9994 = vmatprep.mubr.msk.f32.mxu1 %vm204_vm1, %v6816_v13 }
 0x5b3   : > { %9995 = vmatmul.mubr.msk.f32.gmra.mrb[16].mxu1 %vm204_vm1, %v6817_v16 }
 0x5b4   : > { %9997 = vmatprep.mubr.msk.f32.mxu1 %vm204_vm1, %v6818_v42 }
 0x5b7   : > { %9998 = vmatmul.mubr.msk.f32.gmra.mrb[18].mxu1 %vm204_vm1, %v6819_v24 }
 0x5b8   : > { %10000 = vmatprep.mubr.msk.f32.mxu1 %vm204_vm1, %v6820_v35 }
 0x5bb   : > { %10001 = vmatmul.mubr.msk.f32.gmra.mrb[20].mxu1 %vm204_vm1, %v6821_v38 }
 0x5bc   : > { %10003 = vmatprep.mubr.msk.f32.mxu1 %vm204_vm1, %v6822_v58 }
 0x5bf   : > { %10004 = vmatmul.mubr.msk.f32.gmra.mrb[22].mxu1 %vm204_vm1, %v6823_v10 }
 0x5c0   : > { %10006 = vmatprep.mubr.msk.f32.mxu1 %vm204_vm1, %v6824_v30 }
 0x5c3   : > { %10007 = vmatmul.mubr.msk.f32.gmra.mrb[24].mxu1 %vm204_vm1, %v6825_v31 }
 0x5c4   : > { %10009 = vmatprep.mubr.msk.f32.mxu1 %vm204_vm1, %v6826_v51 }
 0x5c7   : > { %10010 = vmatmul.mubr.msk.f32.gmra.mrb[26].mxu1 %vm204_vm1, %v6827_v5 }
 0x5c8   : > { %10012 = vmatprep.mubr.msk.f32.mxu1 %vm204_vm1, %v12511_v59  ;;  %v7219_v59 = vld [vmem:[#allocation2 + $0x19a] sm:$0xff] }
 0x5cb   : > { %10013 = vmatmul.mubr.msk.f32.gmra.mrb[28].mxu1 %vm204_vm1, %v12515_v48 }
 0x5cc   : > { %10015 = vmatprep.mubr.msk.f32.mxu1 %vm204_vm1, %v6830_v23 }
 0x5cf   : > { %10016 = vmatmul.mubr.msk.f32.gmra.mrb[30].mxu1 %vm204_vm1, %v6831_v36 }
 0x5d0   : > { %10020 = vmatprep.mubr.msk.f32.mxu1 %vm204_vm1, %v13429_v53 }
 0x5d3   : > { %10021 = vmatmul.mubr.msk.f32.vlgmr.msra.gmra.mrb[0].mxu1 %vm204_vm1, %v13430_v52 }
 0x5d4   : > { %10023 = vmatprep.mubr.msk.f32.mxu1 %vm204_vm1, %v13431_v6 }
 0x5d7   : > { %10024 = vmatmul.mubr.msk.f32.gmra.mrb[2].mxu1 %vm204_vm1, %v13432_v22 }
 0x5d8   : > { %10026 = vmatprep.mubr.msk.f32.mxu1 %vm204_vm1, %v13433_v56 }
 0x5db   : > { %10027 = vmatmul.mubr.msk.f32.gmra.mrb[4].mxu1 %vm204_vm1, %v13434_v20 }
 0x5dc   : > { %10029 = vmatprep.mubr.msk.f32.mxu1 %vm204_vm1, %v13435_v37 }
 0x5df   : > { %10030 = vmatmul.mubr.msk.f32.gmra.mrb[6].mxu1 %vm204_vm1, %v13436_v40 }
 0x5e0   : > { %10032 = vmatprep.mubr.msk.f32.mxu1 %vm204_vm1, %v13437_v17 }
 0x5e3   : > { %10033 = vmatmul.mubr.msk.f32.gmra.mrb[8].mxu1 %vm204_vm1, %v13438_v15 }
 0x5e4   : > { %10035 = vmatprep.mubr.msk.f32.mxu1 %vm204_vm1, %v13439_v33 }
 0x5e7   : > { %10036 = vmatmul.mubr.msk.f32.gmra.mrb[10].mxu1 %vm204_vm1, %v13440_v50 }
 0x5e8   : > { %10038 = vmatprep.mubr.msk.f32.mxu1 %vm204_vm1, %v13441_v26 }
 0x5eb   : > { %10039 = vmatmul.mubr.msk.f32.gmra.mrb[12].mxu1 %vm204_vm1, %v13442_v27 }
 0x5ec   : > { %10041 = vmatprep.mubr.msk.f32.mxu1 %vm204_vm1, %v13443_v28 }
 0x5ef   : > { %10042 = vmatmul.mubr.msk.f32.gmra.mrb[14].mxu1 %vm204_vm1, %v13444_v44 }
 0x5f0   : > { %10044 = vmatprep.mubr.msk.f32.mxu1 %vm204_vm1, %v13445_v29 }
 0x5f3   : > { %10045 = vmatmul.mubr.msk.f32.gmra.mrb[16].mxu1 %vm204_vm1, %v13446_v55 }
 0x5f4   : > { %10047 = vmatprep.mubr.msk.f32.mxu1 %vm204_vm1, %v13447_v57 }
 0x5f7   : > { %10048 = vmatmul.mubr.msk.f32.gmra.mrb[18].mxu1 %vm204_vm1, %v13448_v3 }
 0x5f8   : > { %10050 = vmatprep.mubr.msk.f32.mxu1 %vm204_vm1, %v13449_v41 }
 0x5fb   : > { %10051 = vmatmul.mubr.msk.f32.gmra.mrb[20].mxu1 %vm204_vm1, %v13450_v45 }
 0x5fc   : > { %10053 = vmatprep.mubr.msk.f32.mxu1 %vm204_vm1, %v13451_v32 }
 0x5ff   : > { %10054 = vmatmul.mubr.msk.f32.gmra.mrb[22].mxu1 %vm204_vm1, %v12352_v2  ;;  %v7220_v2 = vld [vmem:[#allocation2 + $0x1a2] sm:$0xff] }
 0x600   : > { %10056 = vmatprep.mubr.msk.f32.mxu1 %vm204_vm1, %v13452_v46 }
 0x603   : > { %10057 = vmatmul.mubr.msk.f32.gmra.mrb[24].mxu1 %vm204_vm1, %v12360_v1 }
 0x604   : > { %10059 = vmatprep.mubr.msk.f32.mxu1 %vm204_vm1, %v12364_v43 }
 0x607   : > { %10060 = vmatmul.mubr.msk.f32.gmra.mrb[26].mxu1 %vm204_vm1, %v12368_v49 }
 0x608   : > { %10062 = vmatprep.mubr.msk.f32.mxu1 %vm204_vm1, %v12584_v54 }
 0x60b   : > { %10063 = vmatmul.mubr.msk.f32.gmra.mrb[28].mxu1 %vm204_vm1, %v12588_v0 }
 0x60c   : > { %10065 = vmatprep.mubr.msk.f32.mxu1 %vm204_vm1, %v7219_v59 }
 0x60f   : > { %10066 = vmatmul.mubr.msk.f32.gmra.mrb[30].mxu1 %vm204_vm1, %v7220_v2 }
 0x6a6   : > { %v12756_v48 = vpop.f32.mrb[0].mxu1 }
 0x6a7   : > { %v7579_v1 = vsel %vm204_vm1, %v12756_v48, 0.0  ;;  %v12760_v43 = vpop.f32.mrb[1].mxu1 }
 0x6a8   : > { %v7578_v49 = vsel %vm204_vm1, %v12760_v43, 0.0 }
 0x6a9   : > { %v7580_v53 = vadd.f32 %v7579_v1, %v7578_v49 }
 0x6aa   : > { %v12764_v52 = vpop.f32.mrb[2].mxu1 }
 0x6ab   : > { %v12766_v6 = vpop.f32.mrb[3].mxu1  ;;  %v7583_v20 = vsel %vm204_vm1, %v12764_v52, 0.0 }
 0x6ac   : > { %v7581_v22 = vsel %vm204_vm1, %v12766_v6, 0.0 }
 0x6ad   : > { %v7582_v56 = vadd.f32 %v7581_v22, %v7580_v53 }
 0x6ae   : > { %v12772_v37 = vpop.f32.mrb[4].mxu1 }
 0x6af   : > { %v12774_v40 = vpop.f32.mrb[5].mxu1  ;;  %v7584_v17 = vadd.f32 %v7583_v20, %v7582_v56  ;;  %v7587_v50 = vsel %vm204_vm1, %v12772_v37, 0.0 }
 0x6b0   : > { %v7585_v15 = vsel %vm204_vm1, %v12774_v40, 0.0 }
 0x6b1   : > { %v7586_v33 = vadd.f32 %v7585_v15, %v7584_v17 }
 0x6b2   : > { %v12780_v26 = vpop.f32.mrb[6].mxu1 }
 0x6b3   : > { %v12782_v27 = vpop.f32.mrb[7].mxu1  ;;  %v7588_v28 = vadd.f32 %v7587_v50, %v7586_v33  ;;  %v7591_v55 = vsel %vm204_vm1, %v12780_v26, 0.0 }
 0x6b4   : > { %v7589_v44 = vsel %vm204_vm1, %v12782_v27, 0.0 }
 0x6b5   : > { %v7590_v29 = vadd.f32 %v7589_v44, %v7588_v28 }
 0x6b6   : > { %v12788_v57 = vpop.f32.mrb[8].mxu1 }
 0x6b7   : > { %v12790_v3 = vpop.f32.mrb[9].mxu1  ;;  %v7592_v41 = vadd.f32 %v7591_v55, %v7590_v29  ;;  %v7595_v46 = vsel %vm204_vm1, %v12788_v57, 0.0 }
 0x6b8   : > { %v7593_v45 = vsel %vm204_vm1, %v12790_v3, 0.0 }
 0x6b9   : > { %v7594_v32 = vadd.f32 %v7593_v45, %v7592_v41 }
 0x6ba   : > { %v12796_v54 = vpop.f32.mrb[10].mxu1 }
 0x6bb   : > { %v12798_v0 = vpop.f32.mrb[11].mxu1  ;;  %v7596_v7 = vadd.f32 %v7595_v46, %v7594_v32  ;;  %v7599_v25 = vsel %vm204_vm1, %v12796_v54, 0.0 }
 0x6bc   : > { %v7597_v11 = vsel %vm204_vm1, %v12798_v0, 0.0 }
 0x6bd   : > { %v7598_v63 = vadd.f32 %v7597_v11, %v7596_v7 }
 0x6be   : > { %v12804_v39 = vpop.f32.mrb[12].mxu1 }
 0x6bf   : > { %v12806_v62 = vpop.f32.mrb[13].mxu1  ;;  %v7600_v14 = vadd.f32 %v7599_v25, %v7598_v63  ;;  %v7603_v34 = vsel %vm204_vm1, %v12804_v39, 0.0 }
 0x6c0   : > { %v7601_v12 = vsel %vm204_vm1, %v12806_v62, 0.0 }
 0x6c1   : > { %v7602_v21 = vadd.f32 %v7601_v12, %v7600_v14 }
 0x6c2   : > { %v12812_v47 = vpop.f32.mrb[14].mxu1 }
 0x6c3   : > { %v12814_v60 = vpop.f32.mrb[15].mxu1  ;;  %v7604_v61 = vadd.f32 %v7603_v34, %v7602_v21  ;;  %v7607_v8 = vsel %vm204_vm1, %v12812_v47, 0.0 }
 0x6c4   : > { %v7605_v4 = vsel %vm204_vm1, %v12814_v60, 0.0 }
 0x6c5   : > { %v7606_v19 = vadd.f32 %v7605_v4, %v7604_v61 }
 0x6c6   : > { %v12820_v18 = vpop.f32.mrb[16].mxu1 }
 0x6c7   : > { %v12822_v9 = vpop.f32.mrb[17].mxu1  ;;  %v7608_v13 = vadd.f32 %v7607_v8, %v7606_v19  ;;  %v7611_v24 = vsel %vm204_vm1, %v12820_v18, 0.0 }
 0x6c8   : > { %v7609_v16 = vsel %vm204_vm1, %v12822_v9, 0.0 }
 0x6c9   : > { %v7610_v42 = vadd.f32 %v7609_v16, %v7608_v13 }
 0x6ca   : > { %v12828_v35 = vpop.f32.mrb[18].mxu1 }
 0x6cb   : > { %v12830_v38 = vpop.f32.mrb[19].mxu1  ;;  %v7612_v58 = vadd.f32 %v7611_v24, %v7610_v42  ;;  %v7615_v31 = vsel %vm204_vm1, %v12828_v35, 0.0 }
 0x6cc   : > { %v7613_v10 = vsel %vm204_vm1, %v12830_v38, 0.0 }
 0x6cd   : > { %v7614_v30 = vadd.f32 %v7613_v10, %v7612_v58 }
 0x6ce   : > { %v12836_v51 = vpop.f32.mrb[20].mxu1 }
 0x6cf   : > { %v12838_v5 = vpop.f32.mrb[21].mxu1  ;;  %v7616_v23 = vadd.f32 %v7615_v31, %v7614_v30  ;;  %v7619_v2 = vsel %vm204_vm1, %v12836_v51, 0.0 }
 0x6d0   : > { %v7617_v36 = vsel %vm204_vm1, %v12838_v5, 0.0 }
 0x6d1   : > { %v7618_v59 = vadd.f32 %v7617_v36, %v7616_v23 }
 0x6d2   : > { %v10055_v1 = vpop.f32.mrb[22].mxu1 }
 0x6d3   : > { %v7497_v49 = vpop.f32.mrb[23].mxu1  ;;  %v7620_v53 = vadd.f32 %v7619_v2, %v7618_v59  ;;  %v7623_v20 = vsel %vm204_vm1, %v10055_v1, 0.0 }
 0x6d4   : > { %v7621_v22 = vsel %vm204_vm1, %v7497_v49, 0.0 }
 0x6d5   : > { %v7622_v56 = vadd.f32 %v7621_v22, %v7620_v53 }
 0x6d6   : > { %v10058_v17 = vpop.f32.mrb[24].mxu1 }
 0x6d7   : > { %v7507_v15 = vpop.f32.mrb[25].mxu1  ;;  %v7624_v33 = vadd.f32 %v7623_v20, %v7622_v56  ;;  %v7627_v44 = vsel %vm204_vm1, %v10058_v17, 0.0 }
 0x6d8   : > { %v7625_v50 = vsel %vm204_vm1, %v7507_v15, 0.0 }
 0x6d9   : > { %v7626_v28 = vadd.f32 %v7625_v50, %v7624_v33 }
 0x6da   : > { %v10061_v29 = vpop.f32.mrb[26].mxu1 }
 0x6db   : > { %v7517_v55 = vpop.f32.mrb[27].mxu1  ;;  %v7628_v41 = vadd.f32 %v7627_v44, %v7626_v28  ;;  %v7631_v46 = vsel %vm204_vm1, %v10061_v29, 0.0 }
 0x6dc   : > { %v7629_v45 = vsel %vm204_vm1, %v7517_v55, 0.0 }
 0x6dd   : > { %v7630_v32 = vadd.f32 %v7629_v45, %v7628_v41 }
 0x6de   : > { %v10064_v7 = vpop.f32.mrb[28].mxu1 }
 0x6df   : > { %v7527_v11 = vpop.f32.mrb[29].mxu1  ;;  %v7632_v63 = vadd.f32 %v7631_v46, %v7630_v32  ;;  %v7635_v12 = vsel %vm204_vm1, %v10064_v7, 0.0 }
 0x6e0   : > { %v7633_v25 = vsel %vm204_vm1, %v7527_v11, 0.0 }
 0x6e1   : > { %v7634_v14 = vadd.f32 %v7633_v25, %v7632_v63 }
 0x6e2   : > { %v10067_v21 = vpop.f32.mrb[30].mxu1 }
 0x6e3   : > { %v7537_v34 = vpop.f32.mrb[31].mxu1  ;;  %v7636_v61 = vadd.f32 %v7635_v12, %v7634_v14  ;;  %v7639_v8 = vsel %vm204_vm1, %v10067_v21, 0.0 }
 0x6e4   : > { %v7637_v4 = vsel %vm204_vm1, %v7537_v34, 0.0 }
 0x6e5   : > { %v7638_v19 = vadd.f32 %v7637_v4, %v7636_v61 }
 0x6e7   : > { %v7640_v13 = vadd.f32 %v7639_v8, %v7638_v19 }
 0x6e9   : > { %v7641_v16 = vrot.slane %v7640_v13, 4 }
 0x6eb   : > { %v7642_v42 = vadd.f32 %v7641_v16, %v7640_v13 }
 0x6ed   : > { %v7643_v24 = vrot.slane %v7642_v42, 2 }
 0x6ef   : > { %v7644_v58 = vadd.f32 %v7643_v24, %v7642_v42 }
 0x6f1   : > { %v7645_v10 = vrot.slane %v7644_v58, 1 }
 0x6f3   : > { %v7646_v30 = vadd.f32 %v7645_v10, %v7644_v58 }
 0x6f5   : > { %v7647_v31 = vmul.f32 0.00390625, %v7646_v30 }
 0x6f7   : > { %v12855_v23 = vsub.f32 %v12760_v43, %v7647_v31  ;;  %v12858_v36 = vsub.f32 %v12756_v48, %v7647_v31  ;;  %v12861_v59 = vsub.f32 %v12766_v6, %v7647_v31  ;;  %v12864_v2 = vsub.f32 %v12764_v52, %v7647_v31 }
 0x6f8   : > { %v12867_v53 = vsub.f32 %v12774_v40, %v7647_v31  ;;  %v12870_v22 = vsub.f32 %v12772_v37, %v7647_v31  ;;  %v12873_v56 = vsub.f32 %v12782_v27, %v7647_v31  ;;  %v12876_v43 = vsub.f32 %v12780_v26, %v7647_v31 }
 0x6f9   : > { %v12879_v48 = vsub.f32 %v12790_v3, %v7647_v31  ;;  %v12882_v6 = vsub.f32 %v12788_v57, %v7647_v31  ;;  %v12885_v52 = vsub.f32 %v12798_v0, %v7647_v31  ;;  %v12888_v40 = vsub.f32 %v12796_v54, %v7647_v31 }
 0x6fa   : > { %v12891_v37 = vsub.f32 %v12806_v62, %v7647_v31  ;;  %v12894_v27 = vsub.f32 %v12804_v39, %v7647_v31  ;;  %v12897_v26 = vsub.f32 %v12814_v60, %v7647_v31  ;;  %v12900_v3 = vsub.f32 %v12812_v47, %v7647_v31 }
 0x6fb   : > { %v12903_v57 = vsub.f32 %v12822_v9, %v7647_v31  ;;  %v12906_v0 = vsub.f32 %v12820_v18, %v7647_v31  ;;  %v12909_v54 = vsub.f32 %v12830_v38, %v7647_v31  ;;  %v12912_v62 = vsub.f32 %v12828_v35, %v7647_v31 }
 0x6fc   : > { %v12915_v39 = vsub.f32 %v12838_v5, %v7647_v31  ;;  %v12918_v60 = vsub.f32 %v12836_v51, %v7647_v31  ;;  %v12920_v47 = vsub.f32 %v7497_v49, %v7647_v31  ;;  %v12922_v20 = vsub.f32 %v10055_v1, %v7647_v31 }
 0x6fd   : > { %v12924_v9 = vsub.f32 %v7507_v15, %v7647_v31  ;;  %v12926_v18 = vsub.f32 %v10058_v17, %v7647_v31  ;;  %v12928_v33 = vsub.f32 %v7517_v55, %v7647_v31  ;;  %v12930_v38 = vsub.f32 %v10061_v29, %v7647_v31 }
 0x6fe   : > { %v12932_v35 = vsub.f32 %v7527_v11, %v7647_v31  ;;  %v12934_v50 = vsub.f32 %v10064_v7, %v7647_v31  ;;  %v12936_v5 = vsub.f32 %v7537_v34, %v7647_v31  ;;  %v12938_v51 = vsub.f32 %v10067_v21, %v7647_v31 }
 0x6ff   : > { %v7680_v1 = vmul.f32 %v12855_v23, %v12855_v23  ;;  %v7681_v49 = vmul.f32 %v12858_v36, %v12858_v36  ;;  %v7682_v17 = vmul.f32 %v12861_v59, %v12861_v59  ;;  %v7683_v15 = vmul.f32 %v12864_v2, %v12864_v2 }
 0x700   : > { %v7684_v55 = vmul.f32 %v12867_v53, %v12867_v53  ;;  %v7685_v32 = vmul.f32 %v12870_v22, %v12870_v22  ;;  %v7686_v11 = vmul.f32 %v12873_v56, %v12873_v56  ;;  %v7687_v14 = vmul.f32 %v12876_v43, %v12876_v43 }
 0x701   : > { %v7712_v28 = vsel %vm204_vm1, %v7680_v1, 0.0  ;;  %v7713_v44 = vsel %vm204_vm1, %v7681_v49, 0.0  ;;  %v7715_v41 = vsel %vm204_vm1, %v7682_v17, 0.0  ;;  %v7717_v46 = vsel %vm204_vm1, %v7683_v15, 0.0 }
 0x702   : > { %v7714_v29 = vadd.f32 %v7713_v44, %v7712_v28  ;;  %v7719_v63 = vsel %vm204_vm1, %v7684_v55, 0.0  ;;  %v7721_v12 = vsel %vm204_vm1, %v7685_v32, 0.0  ;;  %v7688_v34 = vmul.f32 %v12879_v48, %v12879_v48 }
 0x703   : > { %v7723_v61 = vsel %vm204_vm1, %v7686_v11, 0.0  ;;  %v7689_v19 = vmul.f32 %v12882_v6, %v12882_v6  ;;  %v7725_v8 = vsel %vm204_vm1, %v7687_v14, 0.0  ;;  %v7690_v16 = vmul.f32 %v12885_v52, %v12885_v52 }
 0x704   : > { %v7716_v45 = vadd.f32 %v7715_v41, %v7714_v29  ;;  %v7727_v42 = vsel %vm204_vm1, %v7688_v34, 0.0  ;;  %v7691_v58 = vmul.f32 %v12888_v40, %v12888_v40  ;;  %v7692_v31 = vmul.f32 %v12891_v37, %v12891_v37 }
 0x705   : > { %v7729_v10 = vsel %vm204_vm1, %v7689_v19, 0.0  ;;  %v7731_v1 = vsel %vm204_vm1, %v7690_v16, 0.0  ;;  %v7693_v17 = vmul.f32 %v12894_v27, %v12894_v27  ;;  %v7694_v44 = vmul.f32 %v12897_v26, %v12897_v26 }
 0x706   : > { %v7718_v7 = vadd.f32 %v7717_v46, %v7716_v45  ;;  %v7733_v15 = vsel %vm204_vm1, %v7691_v58, 0.0  ;;  %v7735_v29 = vsel %vm204_vm1, %v7692_v31, 0.0  ;;  %v7695_v41 = vmul.f32 %v12900_v3, %v12900_v3 }
 0x707   : > { %v7737_v45 = vsel %vm204_vm1, %v7693_v17, 0.0  ;;  %v7696_v46 = vmul.f32 %v12903_v57, %v12903_v57 }
 0x708   : > { %v7720_v25 = vadd.f32 %v7719_v63, %v7718_v7  ;;  %v7739_v7 = vsel %vm204_vm1, %v7694_v44, 0.0  ;;  %v7697_v63 = vmul.f32 %v12906_v0, %v12906_v0 }
 0x70a   : > { %v7722_v21 = vadd.f32 %v7721_v12, %v7720_v25  ;;  %v7741_v25 = vsel %vm204_vm1, %v7695_v41, 0.0  ;;  %v7698_v12 = vmul.f32 %v12909_v54, %v12909_v54 }
 0x70c   : > { %v7724_v4 = vadd.f32 %v7723_v61, %v7722_v21  ;;  %v7743_v21 = vsel %vm204_vm1, %v7696_v46, 0.0  ;;  %v7699_v61 = vmul.f32 %v12912_v62, %v12912_v62 }
 0x70e   : > { %v7726_v13 = vadd.f32 %v7725_v8, %v7724_v4  ;;  %v7745_v4 = vsel %vm204_vm1, %v7697_v63, 0.0  ;;  %v7700_v8 = vmul.f32 %v12915_v39, %v12915_v39 }
 0x710   : > { %v7728_v24 = vadd.f32 %v7727_v42, %v7726_v13  ;;  %v7747_v13 = vsel %vm204_vm1, %v7698_v12, 0.0  ;;  %v7701_v42 = vmul.f32 %v12918_v60, %v12918_v60 }
 0x712   : > { %v7730_v30 = vadd.f32 %v7729_v10, %v7728_v24  ;;  %v7749_v24 = vsel %vm204_vm1, %v7699_v61, 0.0  ;;  %v7702_v10 = vmul.f32 %v12920_v47, %v12920_v47 }
 0x714   : > { %v7732_v49 = vadd.f32 %v7731_v1, %v7730_v30  ;;  %v7751_v30 = vsel %vm204_vm1, %v7700_v8, 0.0  ;;  %v7703_v1 = vmul.f32 %v12922_v20, %v12922_v20 }
 0x716   : > { %v7734_v28 = vadd.f32 %v7733_v15, %v7732_v49  ;;  %v7753_v49 = vsel %vm204_vm1, %v7701_v42, 0.0  ;;  %v7704_v15 = vmul.f32 %v12924_v9, %v12924_v9 }
 0x718   : > { %v7736_v55 = vadd.f32 %v7735_v29, %v7734_v28  ;;  %v7755_v28 = vsel %vm204_vm1, %v7702_v10, 0.0  ;;  %v7705_v29 = vmul.f32 %v12926_v18, %v12926_v18 }
 0x71a   : > { %v7738_v32 = vadd.f32 %v7737_v45, %v7736_v55  ;;  %v7757_v55 = vsel %vm204_vm1, %v7703_v1, 0.0  ;;  %v7706_v45 = vmul.f32 %v12928_v33, %v12928_v33 }
 0x71c   : > { %v7740_v11 = vadd.f32 %v7739_v7, %v7738_v32  ;;  %v7759_v32 = vsel %vm204_vm1, %v7704_v15, 0.0  ;;  %v7707_v7 = vmul.f32 %v12930_v38, %v12930_v38 }
 0x71e   : > { %v7742_v14 = vadd.f32 %v7741_v25, %v7740_v11  ;;  %v7761_v11 = vsel %vm204_vm1, %v7705_v29, 0.0  ;;  %v7708_v25 = vmul.f32 %v12932_v35, %v12932_v35 }
 0x720   : > { %v7744_v34 = vadd.f32 %v7743_v21, %v7742_v14  ;;  %v7763_v14 = vsel %vm204_vm1, %v7706_v45, 0.0  ;;  %v7709_v21 = vmul.f32 %v12934_v50, %v12934_v50 }
 0x722   : > { %v7746_v19 = vadd.f32 %v7745_v4, %v7744_v34  ;;  %v7765_v34 = vsel %vm204_vm1, %v7707_v7, 0.0  ;;  %v7710_v4 = vmul.f32 %v12936_v5, %v12936_v5 }
 0x724   : > { %v7748_v16 = vadd.f32 %v7747_v13, %v7746_v19  ;;  %v7767_v19 = vsel %vm204_vm1, %v7708_v25, 0.0  ;;  %v7711_v13 = vmul.f32 %v12938_v51, %v12938_v51 }
 0x726   : > { %v7750_v58 = vadd.f32 %v7749_v24, %v7748_v16  ;;  %v7769_v16 = vsel %vm204_vm1, %v7709_v21, 0.0  ;;  %v7771_v24 = vsel %vm204_vm1, %v7710_v4, 0.0  ;;  %v7773_v10 = vsel %vm204_vm1, %v7711_v13, 0.0  ;;  %v7822_v21 = vld [vmem:[%s10648_s21 + $0x30] sm:$0xff]  ;;  %v7825_v4 = vld [vmem:[%s10648_s21 + $0x48] sm:$0xff]  ;;  %v7828_v13 = vld [vmem:[%s10648_s21 + $0x60] sm:$0xff] }
 0x728   : > { %v7752_v31 = vadd.f32 %v7751_v30, %v7750_v58 }
 0x72a   : > { %v7754_v17 = vadd.f32 %v7753_v49, %v7752_v31 }
 0x72c   : > { %v7756_v44 = vadd.f32 %v7755_v28, %v7754_v17 }
 0x72e   : > { %v7758_v41 = vadd.f32 %v7757_v55, %v7756_v44 }
 0x730   : > { %v7760_v46 = vadd.f32 %v7759_v32, %v7758_v41 }
 0x732   : > { %v7762_v63 = vadd.f32 %v7761_v11, %v7760_v46 }
 0x734   : > { %v7764_v12 = vadd.f32 %v7763_v14, %v7762_v63 }
 0x736   : > { %v7766_v61 = vadd.f32 %v7765_v34, %v7764_v12  ;;  %v7821_v12 = vld [vmem:[%s10648_s21 + $0x28] sm:$0xff]  ;;  %v7823_v34 = vld [vmem:[%s10648_s21 + $0x38] sm:$0xff] }
 0x738   : > { %v7768_v8 = vadd.f32 %v7767_v19, %v7766_v61  ;;  %v7824_v61 = vld [vmem:[%s10648_s21 + $0x40] sm:$0xff]  ;;  %v7826_v19 = vld [vmem:[%s10648_s21 + $0x50] sm:$0xff] }
 0x73a   : > { %v7770_v42 = vadd.f32 %v7769_v16, %v7768_v8  ;;  %v7829_v16 = vld [vmem:[%s10648_s21 + $0x68] sm:$0xff] }
 0x73c   : > { %v7772_v58 = vadd.f32 %v7771_v24, %v7770_v42  ;;  %v7830_v42 = vld [vmem:[%s10648_s21 + $0x70] sm:$0xff]  ;;  %v7831_v24 = vld [vmem:[%s10648_s21 + $0x78] sm:$0xff] }
 0x73e   : > { %v7774_v30 = vadd.f32 %v7773_v10, %v7772_v58  ;;  %v7832_v58 = vld [vmem:[%s10648_s21 + $0x80] sm:$0xff]  ;;  %v7833_v10 = vld [vmem:[%s10648_s21 + $0x88] sm:$0xff] }
 0x740   : > { %v7775_v31 = vrot.slane %v7774_v30, 4 }
 0x742   : > { %v7776_v1 = vadd.f32 %v7775_v31, %v7774_v30  ;;  %v7834_v30 = vld [vmem:[%s10648_s21 + $0x90] sm:$0xff] }
 0x744   : > { %v7777_v49 = vrot.slane %v7776_v1, 2 }
 0x746   : > { %v7778_v17 = vadd.f32 %v7777_v49, %v7776_v1 }
 0x748   : > { %v7779_v15 = vrot.slane %v7778_v17, 1 }
 0x74a   : > { %v7780_v28 = vadd.f32 %v7779_v15, %v7778_v17  ;;  %v7837_v17 = vld [vmem:[%s10648_s21 + $0xa8] sm:$0xff] }
 0x74c   : > { %v7781_v44 = vmul.f32 0.00390625, %v7780_v28 }
 0x74e   : > { %v7782_v29 = vadd.f32 1e-05, %v7781_v44 }
 0x750   : > { %10590 = vrsqrt.f32 %v7782_v29 }
 0x75a   : > { %v10591_v55 = vpop.eup %10590 }
 0x75b   : > { %v7784_v41 = vmul.f32 %v10591_v55, %v12855_v23  ;;  %v7785_v45 = vmul.f32 %v10591_v55, %v12858_v36  ;;  %v7786_v32 = vmul.f32 %v10591_v55, %v12861_v59  ;;  %v7787_v46 = vmul.f32 %v10591_v55, %v12864_v2 }
 0x75c   : > { %v7788_v7 = vmul.f32 %v10591_v55, %v12867_v53  ;;  %v7789_v11 = vmul.f32 %v10591_v55, %v12870_v22  ;;  %v7790_v63 = vmul.f32 %v10591_v55, %v12873_v56  ;;  %v7791_v25 = vmul.f32 %v10591_v55, %v12876_v43 }
 0x75d   : > { %v7792_v23 = vmul.f32 %v10591_v55, %v12879_v48  ;;  %v7793_v36 = vmul.f32 %v10591_v55, %v12882_v6  ;;  %v7794_v59 = vmul.f32 %v10591_v55, %v12885_v52  ;;  %v7795_v2 = vmul.f32 %v10591_v55, %v12888_v40  ;;  %v7816_v48 = vld [vmem:[%s10648_s21] sm:$0xff]  ;;  %v7817_v6 = vld [vmem:[%s10648_s21 + $0x8] sm:$0xff]  ;;  %v7818_v52 = vld [vmem:[%s10648_s21 + $0x10] sm:$0xff] }
 0x75e   : > { %v13049_v53 = vmul.f32 %v10591_v55, %v12891_v37  ;;  %v13052_v22 = vmul.f32 %v10591_v55, %v12894_v27  ;;  %v13055_v56 = vmul.f32 %v10591_v55, %v12897_v26  ;;  %v13058_v43 = vmul.f32 %v10591_v55, %v12900_v3  ;;  %v7819_v40 = vld [vmem:[%s10648_s21 + $0x18] sm:$0xff]  ;;  %v7820_v3 = vld [vmem:[%s10648_s21 + $0x20] sm:$0xff] }
 0x75f   : > { %v13065_v14 = vmul.f32 %v10591_v55, %v12903_v57  ;;  %v13068_v37 = vmul.f32 %v10591_v55, %v12906_v0  ;;  %v13071_v27 = vmul.f32 %v10591_v55, %v12909_v54  ;;  %v13074_v26 = vmul.f32 %v10591_v55, %v12912_v62 }
 0x760   : > { %v13081_v57 = vmul.f32 %v10591_v55, %v12915_v39  ;;  %v13084_v0 = vmul.f32 %v10591_v55, %v12918_v60  ;;  %v13087_v54 = vmul.f32 %v10591_v55, %v12920_v47  ;;  %v13090_v62 = vmul.f32 %v10591_v55, %v12922_v20  ;;  %v7827_v20 = vld [vmem:[%s10648_s21 + $0x58] sm:$0xff] }
 0x761   : > { %v13096_v8 = vmul.f32 %v10591_v55, %v12924_v9  ;;  %v13099_v39 = vmul.f32 %v10591_v55, %v12926_v18  ;;  %v13102_v60 = vmul.f32 %v10591_v55, %v12928_v33  ;;  %v13105_v47 = vmul.f32 %v10591_v55, %v12930_v38 }
 0x762   : > { %v13118_v9 = vmul.f32 %v10591_v55, %v12932_v35  ;;  %v13121_v18 = vmul.f32 %v10591_v55, %v12934_v50  ;;  %v13124_v33 = vmul.f32 %v10591_v55, %v12936_v5  ;;  %v13127_v38 = vmul.f32 %v10591_v55, %v12938_v51  ;;  %v7835_v35 = vld [vmem:[%s10648_s21 + $0x98] sm:$0xff]  ;;  %v7836_v5 = vld [vmem:[%s10648_s21 + $0xa0] sm:$0xff]  ;;  %v7838_v51 = vld [vmem:[%s10648_s21 + $0xb0] sm:$0xff] }
 0x763   : > { %v7848_v31 = vadd.f32 %v7816_v48, %v7784_v41  ;;  %v7849_v1 = vadd.f32 %v7817_v6, %v7785_v45  ;;  %v7850_v49 = vadd.f32 %v7818_v52, %v7786_v32  ;;  %v7851_v50 = vadd.f32 %v7819_v40, %v7787_v46  ;;  %v7839_v55 = vld [vmem:[%s10648_s21 + $0xb8] sm:$0xff]  ;;  %v7841_v41 = vld [vmem:[%s10648_s21 + $0xc8] sm:$0xff] }
 0x764   : > { %13453 = vst [vmem:[#allocation5_spill] sm:$0xff] %v13127_v38  ;;  %v7852_v15 = vadd.f32 %v7820_v3, %v7788_v7  ;;  %v7853_v28 = vadd.f32 %v7821_v12, %v7789_v11  ;;  %v7854_v44 = vadd.f32 %v7822_v21, %v7790_v63  ;;  %v7855_v29 = vadd.f32 %v7823_v34, %v7791_v25  ;;  %v7840_v38 = vld [vmem:[%s10648_s21 + $0xc0] sm:$0xff]  ;;  %v7842_v7 = vld [vmem:[%s10648_s21 + $0xd0] sm:$0xff]  ;;  %v7843_v11 = vld [vmem:[%s10648_s21 + $0xd8] sm:$0xff] }
 0x765   : > { %v7856_v45 = vadd.f32 %v7824_v61, %v7792_v23  ;;  %v7857_v32 = vadd.f32 %v7825_v4, %v7793_v36  ;;  %v7858_v46 = vadd.f32 %v7826_v19, %v7794_v59  ;;  %v7859_v48 = vadd.f32 %v7827_v20, %v7795_v2  ;;  %7880 = vst.msk [vmem:[%s13115_s6] sm:$0xff] %vm204_vm1, %v7848_v31  ;;  %v7844_v63 = vld [vmem:[%s10648_s21 + $0xe0] sm:$0xff]  ;;  %v7845_v2 = vld [vmem:[%s10648_s21 + $0xe8] sm:$0xff] }
 0x766   : > { %7881 = vst.msk [vmem:[%s13115_s6 + $0x8] sm:$0xff] %vm204_vm1, %v7849_v1  ;;  %7882 = vst.msk [vmem:[%s13115_s6 + $0x10] sm:$0xff] %vm204_vm1, %v7850_v49  ;;  %v7860_v25 = vadd.f32 %v7828_v13, %v13049_v53  ;;  %v7861_v23 = vadd.f32 %v7829_v16, %v13052_v22  ;;  %v7862_v36 = vadd.f32 %v7830_v42, %v13055_v56  ;;  %v7846_v53 = vld [vmem:[%s10648_s21 + $0xf0] sm:$0xff]  ;;  %v7847_v22 = vld [vmem:[%s10648_s21 + $0xf8] sm:$0xff] }
 0x767   : > { %7883 = vst.msk [vmem:[%s13115_s6 + $0x18] sm:$0xff] %vm204_vm1, %v7851_v50  ;;  %v7863_v59 = vadd.f32 %v7831_v24, %v13058_v43  ;;  %7884 = vst.msk [vmem:[%s13115_s6 + $0x20] sm:$0xff] %vm204_vm1, %v7852_v15  ;;  %v7864_v56 = vadd.f32 %v7832_v58, %v13065_v14  ;;  %v7865_v6 = vadd.f32 %v7833_v10, %v13068_v37 }
 0x768   : > { %7885 = vst.msk [vmem:[%s13115_s6 + $0x28] sm:$0xff] %vm204_vm1, %v7853_v28  ;;  %7886 = vst.msk [vmem:[%s13115_s6 + $0x30] sm:$0xff] %vm204_vm1, %v7854_v44  ;;  %v7866_v43 = vadd.f32 %v7834_v30, %v13071_v27  ;;  %v7867_v52 = vadd.f32 %v7835_v35, %v13074_v26  ;;  %v7868_v40 = vadd.f32 %v7836_v5, %v13081_v57 }
 0x769   : > { %7887 = vst.msk [vmem:[%s13115_s6 + $0x38] sm:$0xff] %vm204_vm1, %v7855_v29  ;;  %7888 = vst.msk [vmem:[%s13115_s6 + $0x40] sm:$0xff] %vm204_vm1, %v7856_v45  ;;  %v7869_v14 = vadd.f32 %v7837_v17, %v13084_v0  ;;  %v7870_v37 = vadd.f32 %v7838_v51, %v13087_v54  ;;  %v7871_v27 = vadd.f32 %v7839_v55, %v13090_v62 }
 0x76a   : > { %7889 = vst.msk [vmem:[%s13115_s6 + $0x48] sm:$0xff] %vm204_vm1, %v7857_v32  ;;  %7890 = vst.msk [vmem:[%s13115_s6 + $0x50] sm:$0xff] %vm204_vm1, %v7858_v46  ;;  %v7872_v26 = vadd.f32 %v7840_v38, %v13096_v8  ;;  %v7873_v3 = vadd.f32 %v7841_v41, %v13099_v39  ;;  %v7874_v12 = vadd.f32 %v7842_v7, %v13102_v60 }
 0x76b   : > { %7891 = vst.msk [vmem:[%s13115_s6 + $0x58] sm:$0xff] %vm204_vm1, %v7859_v48  ;;  %7892 = vst.msk [vmem:[%s13115_s6 + $0x60] sm:$0xff] %vm204_vm1, %v7860_v25  ;;  %v7875_v21 = vadd.f32 %v7843_v11, %v13105_v47  ;;  %v7876_v34 = vadd.f32 %v7844_v63, %v13118_v9  ;;  %v7877_v57 = vadd.f32 %v7845_v2, %v13121_v18  ;;  %v13454_v54 = vld [vmem:[#allocation5_spill] sm:$0xff] }
 0x76c   : > { %7893 = vst.msk [vmem:[%s13115_s6 + $0x68] sm:$0xff] %vm204_vm1, %v7861_v23  ;;  %7894 = vst.msk [vmem:[%s13115_s6 + $0x70] sm:$0xff] %vm204_vm1, %v7862_v36  ;;  %v7878_v0 = vadd.f32 %v7846_v53, %v13124_v33  ;;  %v7879_v62 = vadd.f32 %v7847_v22, %v13454_v54 }
 0x76d   : > { %7895 = vst.msk [vmem:[%s13115_s6 + $0x78] sm:$0xff] %vm204_vm1, %v7863_v59  ;;  %7896 = vst.msk [vmem:[%s13115_s6 + $0x80] sm:$0xff] %vm204_vm1, %v7864_v56 }
 0x76e   : > { %7897 = vst.msk [vmem:[%s13115_s6 + $0x88] sm:$0xff] %vm204_vm1, %v7865_v6  ;;  %7898 = vst.msk [vmem:[%s13115_s6 + $0x90] sm:$0xff] %vm204_vm1, %v7866_v43 }
 0x76f   : > { %7899 = vst.msk [vmem:[%s13115_s6 + $0x98] sm:$0xff] %vm204_vm1, %v7867_v52  ;;  %7900 = vst.msk [vmem:[%s13115_s6 + $0xa0] sm:$0xff] %vm204_vm1, %v7868_v40 }
 0x770   : > { %7901 = vst.msk [vmem:[%s13115_s6 + $0xa8] sm:$0xff] %vm204_vm1, %v7869_v14  ;;  %7902 = vst.msk [vmem:[%s13115_s6 + $0xb0] sm:$0xff] %vm204_vm1, %v7870_v37 }
 0x771   : > { %7903 = vst.msk [vmem:[%s13115_s6 + $0xb8] sm:$0xff] %vm204_vm1, %v7871_v27  ;;  %7904 = vst.msk [vmem:[%s13115_s6 + $0xc0] sm:$0xff] %vm204_vm1, %v7872_v26 }
 0x772   : > { %7905 = vst.msk [vmem:[%s13115_s6 + $0xc8] sm:$0xff] %vm204_vm1, %v7873_v3  ;;  %7906 = vst.msk [vmem:[%s13115_s6 + $0xd0] sm:$0xff] %vm204_vm1, %v7874_v12 }
 0x773   : > { %7907 = vst.msk [vmem:[%s13115_s6 + $0xd8] sm:$0xff] %vm204_vm1, %v7875_v21  ;;  %7908 = vst.msk [vmem:[%s13115_s6 + $0xe0] sm:$0xff] %vm204_vm1, %v7876_v34 }
 0x774   : > { %7909 = vst.msk [vmem:[%s13115_s6 + $0xe8] sm:$0xff] %vm204_vm1, %v7877_v57  ;;  %7910 = vst.msk [vmem:[%s13115_s6 + $0xf0] sm:$0xff] %vm204_vm1, %v7878_v0 }
 0x775   : > { %7911 = vst.msk [vmem:[%s13115_s6 + $0xf8] sm:$0xff] %vm204_vm1, %v7879_v62 }
 0x776 PF: > { %s13_s12 = sadd.s32 1, %s10598_s12  }
 0x777   : > { %p10_p4 = scmp.ge.s32.totalorder %s13_s12, 4  }
 0x779   :  { %12 = sbr.rel (!%p10_p4) target bundleno = 1 (0x1), region = 66 }

</bundles_post_ra>
